<compile_context>
chip_gen: v6e
topology: v6e:2x2x1
jax: 0.10.0
libtpu: 0.0.40
codegen_flags: <defaults>
</compile_context>

<pallas_src>
import functools
import math

import jax
import jax.numpy as jnp
from jax.experimental import pallas as pl
from jax.experimental.pallas import tpu as pltpu

# ----------------------------- model dimensions -----------------------------
B_HID = 128        # hidden size (lane-dense stand-in for 768)
B_LAYERS = 2       # encoder layers (stand-in for 12)
B_HEADS = 4        # attention heads (head_dim = 32)
B_FFN = 256        # FFN width (stand-in for 3072)
VOCAB = 64
MAX_POS = 32
PAD_IDX = 1        # RoBERTa padding_idx for position ids
NUM_CLASSES = 4    # classifier0 = Linear(hidden, 4)
N_PAD = 128        # classifier output padded to a full 128-lane store
LN_EPS = 1e-5


# ------------------------------ small helpers -------------------------------
def _layernorm(x, g, b, eps=LN_EPS):
    mu = jnp.mean(x, axis=-1, keepdims=True)
    var = jnp.mean(jnp.square(x - mu), axis=-1, keepdims=True)
    return (x - mu) * jax.lax.rsqrt(var + eps) * g + b


def _full_spec(shape):
    nd = len(shape)
    return pl.BlockSpec(shape, lambda *_: (0,) * nd)


# ------------------------------- fused kernel --------------------------------
def _fused_forward_kernel(emb_ref, bias_ref, embg_ref, embb_ref,
                          wqkv_ref, bqkv_ref, wo_ref, bo_ref, g1_ref, be1_ref,
                          w1_ref, b1_ref, w2_ref, b2_ref, g2_ref, be2_ref,
                          poolw_ref, poolb_ref, clsw_ref, clsb_ref,
                          out_ref, *, num_layers, nhead, head_dim, batch, seq):
    """Embedding-LN -> num_layers x (self-attn + FFN, post-LN) -> pooler -> classifier."""
    H = emb_ref.shape[-1]
    R = batch * seq
    scale = 1.0 / math.sqrt(head_dim)

    x = _layernorm(emb_ref[...], embg_ref[...], embb_ref[...])          # [R, H] f32
    bias3 = bias_ref[...][:, None, :]                                   # [B, 1, S]
    bias_bh = jnp.tile(bias3, (nhead, 1, 1))                            # [nhead*B, 1, S]

    for l in range(num_layers):                                         # static unroll
        xb = x.astype(jnp.bfloat16)

        # Fused QKV projection: one MXU matmul, 128-lane-aligned output slices.
        qkv = jnp.dot(xb, wqkv_ref[l],
                      preferred_element_type=jnp.float32) + bqkv_ref[l]  # [R, 3H]
        q3 = qkv[:, 0:H].reshape(batch, seq, H).astype(jnp.bfloat16)
        k3 = qkv[:, H:2 * H].reshape(batch, seq, H).astype(jnp.bfloat16)
        v3 = qkv[:, 2 * H:3 * H].reshape(batch, seq, H).astype(jnp.bfloat16)

        # Gather heads into ONE leading batch dim [nhead*B, S, head_dim]
        # (leading-axis concat of lane slices; keeps a single-batch-dim einsum).
        qh = jnp.concatenate(
            [q3[:, :, h * head_dim:(h + 1) * head_dim] for h in range(nhead)], axis=0)
        kh = jnp.concatenate(
            [k3[:, :, h * head_dim:(h + 1) * head_dim] for h in range(nhead)], axis=0)
        vh = jnp.concatenate(
            [v3[:, :, h * head_dim:(h + 1) * head_dim] for h in range(nhead)], axis=0)

        sc = jnp.einsum('bqd,bkd->bqk', qh, kh,
                        preferred_element_type=jnp.float32) * scale     # [nhead*B, S, S]
        sc = sc + bias_bh                                               # key-padding bias
        sc = sc - jnp.max(sc, axis=-1, keepdims=True)
        p = jnp.exp(sc)
        p = p * pl.reciprocal(jnp.sum(p, axis=-1, keepdims=True), approx=True)
        ctx = jnp.einsum('bqk,bkd->bqd', p.astype(jnp.bfloat16), vh,
                         preferred_element_type=jnp.float32)            # [nhead*B, S, hd]

        # Reassemble heads along lanes -> [R, H]; single full W_o matmul.
        ctx_full = jnp.concatenate(
            [ctx[h * batch:(h + 1) * batch] for h in range(nhead)], axis=-1)  # [B, S, H]
        attn = jnp.dot(ctx_full.reshape(R, H).astype(jnp.bfloat16), wo_ref[l],
                       preferred_element_type=jnp.float32) + bo_ref[l]

        x = _layernorm(x + attn, g1_ref[l], be1_ref[l])                 # post-LN

        h1 = jnp.dot(x.astype(jnp.bfloat16), w1_ref[l],
                     preferred_element_type=jnp.float32) + b1_ref[l]
        h1 = jax.nn.gelu(h1)  # TODO(synk): RoBERTa uses exact erf-GELU; tanh approx here.
        h2 = jnp.dot(h1.astype(jnp.bfloat16), w2_ref[l],
                     preferred_element_type=jnp.float32) + b2_ref[l]
        x = _layernorm(x + h2, g2_ref[l], be2_ref[l])

    # [CLS] row of each sequence -> pooler (tanh) -> classifier (padded to 128 lanes).
    cls = x.reshape(batch, seq, H)[:, 0, :]                             # [B, H]
    pooled = jnp.tanh(jnp.dot(cls.astype(jnp.bfloat16), poolw_ref[...],
                              preferred_element_type=jnp.float32) + poolb_ref[...])
    out_ref[...] = jnp.dot(pooled.astype(jnp.bfloat16), clsw_ref[...],
                           preferred_element_type=jnp.float32) + clsb_ref[...]


# ------------------------------ parameter setup ------------------------------
def init_my_bertweet_params(key):
    ks = jax.random.split(key, 11)
    n = lambda k, shape: jax.random.normal(k, shape, jnp.float32) * 0.02
    L, H, F = B_LAYERS, B_HID, B_FFN

    ones_h = jnp.ones((L, 1, H), jnp.float32)
    zeros_h = jnp.zeros((L, 1, H), jnp.float32)

    # Fused QKV weight: wq | wk | wv stacked along the output (lane) axis.
    wqkv = jnp.concatenate([n(ks[3], (L, H, H)),
                            n(ks[4], (L, H, H)),
                            n(ks[5], (L, H, H))], axis=-1)              # [L, H, 3H]

    cls_w = jnp.zeros((H, N_PAD), jnp.float32)
    cls_w = cls_w.at[:, :NUM_CLASSES].set(n(ks[10], (H, NUM_CLASSES)))

    return dict(
        word_emb=n(ks[0], (VOCAB, H)),
        pos_emb=n(ks[1], (MAX_POS, H)),
        type_emb=n(ks[2], (1, H)),
        emb_ln_g=jnp.ones((1, H), jnp.float32),
        emb_ln_b=jnp.zeros((1, H), jnp.float32),
        # stacked per-layer weights; matmul weights in bf16, biases/LN in f32
        wqkv=wqkv.astype(jnp.bfloat16),
        bqkv=jnp.zeros((L, 1, 3 * H), jnp.float32),
        wo=n(ks[6], (L, H, H)).astype(jnp.bfloat16), bo=zeros_h,
        g1=ones_h, be1=zeros_h,
        w1=n(ks[7], (L, H, F)).astype(jnp.bfloat16),
        b1=jnp.zeros((L, 1, F), jnp.float32),
        w2=n(ks[8], (L, F, H)).astype(jnp.bfloat16), b2=zeros_h,
        g2=ones_h, be2=zeros_h,
        pool_w=n(ks[9], (H, H)).astype(jnp.bfloat16),
        pool_b=jnp.zeros((1, H), jnp.float32),
        cls_w=cls_w.astype(jnp.bfloat16),
        cls_b=jnp.zeros((1, N_PAD), jnp.float32),
    )


# -------------------------------- forward pass --------------------------------
def my_bertweet_forward(params, input_ids, attention_mask=None):
    """Returns (logits,) like the torch module (outputs[2:] is empty for the base model)."""
    B, S = input_ids.shape
    if attention_mask is None:
        attention_mask = jnp.ones((B, S), jnp.int32)
    mask = attention_mask.astype(jnp.float32)

    # RoBERTa position ids: pads -> padding_idx, tokens -> cumsum(mask) + padding_idx
    position_ids = (jnp.cumsum(mask, axis=1) * mask).astype(jnp.int32) + PAD_IDX

    # Embedding gathers are plain-JAX glue; kernel receives the 2-D summed embeddings.
    emb = (params['word_emb'][input_ids]
           + params['pos_emb'][position_ids]
           + params['type_emb'][0][None, None, :])                     # [B, S, H]
    emb2 = emb.reshape(B * S, B_HID)
    bias = (mask - 1.0) * 1e9                                          # additive key bias

    args = (emb2, bias, params['emb_ln_g'], params['emb_ln_b'],
            params['wqkv'], params['bqkv'], params['wo'], params['bo'],
            params['g1'], params['be1'], params['w1'], params['b1'],
            params['w2'], params['b2'], params['g2'], params['be2'],
            params['pool_w'], params['pool_b'], params['cls_w'], params['cls_b'])

    kernel = functools.partial(_fused_forward_kernel,
                               num_layers=B_LAYERS, nhead=B_HEADS,
                               head_dim=B_HID // B_HEADS, batch=B, seq=S)

    logits_pad = pl.pallas_call(
        kernel,
        out_shape=jax.ShapeDtypeStruct((B, N_PAD), jnp.float32),
        grid=(1,),
        in_specs=[_full_spec(a.shape) for a in args],
        out_specs=_full_spec((B, N_PAD)),
        compiler_params=pltpu.CompilerParams(
            dimension_semantics=("arbitrary",)),
    )(*args)

    logits = logits_pad[:, :NUM_CLASSES]   # un-pad the lane-dense classifier output
    # dropout0 is an identity in eval mode.
    return (logits,)


# ------------------------------------ main ------------------------------------
if __name__ == "__main__":
    B, S = 2, 8
    key = jax.random.PRNGKey(0)
    kp, kid = jax.random.split(key)

    params = init_my_bertweet_params(kp)
    input_ids = jax.random.randint(kid, (B, S), 0, VOCAB, dtype=jnp.int32)
    attention_mask = jnp.ones((B, S), jnp.int32)

    fwd = jax.jit(my_bertweet_forward)
    (logits,) = fwd(params, input_ids, attention_mask)
    jax.block_until_ready(logits)

    assert logits.shape == (B, NUM_CLASSES)
    assert bool(jnp.all(jnp.isfinite(logits)))
    print("KERNEL_OK")
</pallas_src>

<mosaic_0001>
module attributes {stable_mosaic.version = 11 : i64} {
  func.func @_fused_forward_kernel(%arg0: i32, %arg1: memref<16x128xf32, #tpu.memory_space<vmem>>, %arg2: memref<2x8xf32, #tpu.memory_space<vmem>>, %arg3: memref<1x128xf32, #tpu.memory_space<vmem>>, %arg4: memref<1x128xf32, #tpu.memory_space<vmem>>, %arg5: memref<2x128x384xbf16, #tpu.memory_space<vmem>>, %arg6: memref<2x1x384xf32, #tpu.memory_space<vmem>>, %arg7: memref<2x128x128xbf16, #tpu.memory_space<vmem>>, %arg8: memref<2x1x128xf32, #tpu.memory_space<vmem>>, %arg9: memref<2x1x128xf32, #tpu.memory_space<vmem>>, %arg10: memref<2x1x128xf32, #tpu.memory_space<vmem>>, %arg11: memref<2x128x256xbf16, #tpu.memory_space<vmem>>, %arg12: memref<2x1x256xf32, #tpu.memory_space<vmem>>, %arg13: memref<2x256x128xbf16, #tpu.memory_space<vmem>>, %arg14: memref<2x1x128xf32, #tpu.memory_space<vmem>>, %arg15: memref<2x1x128xf32, #tpu.memory_space<vmem>>, %arg16: memref<2x1x128xf32, #tpu.memory_space<vmem>>, %arg17: memref<128x128xbf16, #tpu.memory_space<vmem>>, %arg18: memref<1x128xf32, #tpu.memory_space<vmem>>, %arg19: memref<128x128xbf16, #tpu.memory_space<vmem>>, %arg20: memref<1x128xf32, #tpu.memory_space<vmem>>, %arg21: memref<2x128xf32, #tpu.memory_space<vmem>>) attributes {dimension_semantics = [#tpu.dimension_semantics<arbitrary>], iteration_bounds = array<i64: 1>, scalar_prefetch = 0 : i64, scratch_operands = 0 : i64, tpu.core_type = #tpu.core_type<tc>, window_params = [{pipeline_mode = #tpu.pipeline_mode<synchronous>, transform_indices = @transform_0, window_bounds = array<i64: 16, 128>}, {pipeline_mode = #tpu.pipeline_mode<synchronous>, transform_indices = @transform_1, window_bounds = array<i64: 2, 8>}, {pipeline_mode = #tpu.pipeline_mode<synchronous>, transform_indices = @transform_2, window_bounds = array<i64: 1, 128>}, {pipeline_mode = #tpu.pipeline_mode<synchronous>, transform_indices = @transform_3, window_bounds = array<i64: 1, 128>}, {pipeline_mode = #tpu.pipeline_mode<synchronous>, transform_indices = @transform_4, window_bounds = array<i64: 2, 128, 384>}, {pipeline_mode = #tpu.pipeline_mode<synchronous>, transform_indices = @transform_5, window_bounds = array<i64: 2, 1, 384>}, {pipeline_mode = #tpu.pipeline_mode<synchronous>, transform_indices = @transform_6, window_bounds = array<i64: 2, 128, 128>}, {pipeline_mode = #tpu.pipeline_mode<synchronous>, transform_indices = @transform_7, window_bounds = array<i64: 2, 1, 128>}, {pipeline_mode = #tpu.pipeline_mode<synchronous>, transform_indices = @transform_8, window_bounds = array<i64: 2, 1, 128>}, {pipeline_mode = #tpu.pipeline_mode<synchronous>, transform_indices = @transform_9, window_bounds = array<i64: 2, 1, 128>}, {pipeline_mode = #tpu.pipeline_mode<synchronous>, transform_indices = @transform_10, window_bounds = array<i64: 2, 128, 256>}, {pipeline_mode = #tpu.pipeline_mode<synchronous>, transform_indices = @transform_11, window_bounds = array<i64: 2, 1, 256>}, {pipeline_mode = #tpu.pipeline_mode<synchronous>, transform_indices = @transform_12, window_bounds = array<i64: 2, 256, 128>}, {pipeline_mode = #tpu.pipeline_mode<synchronous>, transform_indices = @transform_13, window_bounds = array<i64: 2, 1, 128>}, {pipeline_mode = #tpu.pipeline_mode<synchronous>, transform_indices = @transform_14, window_bounds = array<i64: 2, 1, 128>}, {pipeline_mode = #tpu.pipeline_mode<synchronous>, transform_indices = @transform_15, window_bounds = array<i64: 2, 1, 128>}, {pipeline_mode = #tpu.pipeline_mode<synchronous>, transform_indices = @transform_16, window_bounds = array<i64: 128, 128>}, {pipeline_mode = #tpu.pipeline_mode<synchronous>, transform_indices = @transform_17, window_bounds = array<i64: 1, 128>}, {pipeline_mode = #tpu.pipeline_mode<synchronous>, transform_indices = @transform_18, window_bounds = array<i64: 128, 128>}, {pipeline_mode = #tpu.pipeline_mode<synchronous>, transform_indices = @transform_19, window_bounds = array<i64: 1, 128>}, {pipeline_mode = #tpu.pipeline_mode<synchronous>, transform_indices = @transform_20, window_bounds = array<i64: 2, 128>}]} {
    %c0 = arith.constant 0 : index
    %c0_0 = arith.constant 0 : index
    %0 = vector.load %arg1[%c0, %c0_0] : memref<16x128xf32, #tpu.memory_space<vmem>>, vector<16x128xf32>
    %c0_1 = arith.constant 0 : index
    %c0_2 = arith.constant 0 : index
    %1 = vector.load %arg3[%c0_1, %c0_2] : memref<1x128xf32, #tpu.memory_space<vmem>>, vector<1x128xf32>
    %c0_3 = arith.constant 0 : index
    %c0_4 = arith.constant 0 : index
    %2 = vector.load %arg4[%c0_3, %c0_4] : memref<1x128xf32, #tpu.memory_space<vmem>>, vector<1x128xf32>
    %cst = arith.constant dense<0.000000e+00> : vector<16xf32>
    %3 = vector.multi_reduction <add>, %0, %cst [1] : vector<16x128xf32> to vector<16xf32>
    %4 = vector.shape_cast %3 : vector<16xf32> to vector<16x1xf32>
    %cst_5 = arith.constant 1.280000e+02 : f32
    %5 = vector.broadcast %cst_5 : f32 to vector<16x1xf32>
    %6 = arith.divf %4, %5 : vector<16x1xf32>
    %7 = vector.broadcast %6 : vector<16x1xf32> to vector<16x128xf32>
    %8 = arith.subf %0, %7 : vector<16x128xf32>
    %9 = arith.mulf %8, %8 : vector<16x128xf32>
    %cst_6 = arith.constant dense<0.000000e+00> : vector<16xf32>
    %10 = vector.multi_reduction <add>, %9, %cst_6 [1] : vector<16x128xf32> to vector<16xf32>
    %11 = vector.shape_cast %10 : vector<16xf32> to vector<16x1xf32>
    %cst_7 = arith.constant 1.280000e+02 : f32
    %12 = vector.broadcast %cst_7 : f32 to vector<16x1xf32>
    %13 = arith.divf %11, %12 : vector<16x1xf32>
    %14 = vector.broadcast %6 : vector<16x1xf32> to vector<16x128xf32>
    %15 = arith.subf %0, %14 : vector<16x128xf32>
    %cst_8 = arith.constant 9.99999974E-6 : f32
    %16 = vector.broadcast %cst_8 : f32 to vector<16x1xf32>
    %17 = arith.addf %13, %16 : vector<16x1xf32>
    %18 = math.rsqrt %17 : vector<16x1xf32>
    %19 = vector.broadcast %18 : vector<16x1xf32> to vector<16x128xf32>
    %20 = arith.mulf %15, %19 : vector<16x128xf32>
    %21 = vector.broadcast %1 : vector<1x128xf32> to vector<16x128xf32>
    %22 = arith.mulf %20, %21 : vector<16x128xf32>
    %23 = vector.broadcast %2 : vector<1x128xf32> to vector<16x128xf32>
    %24 = arith.addf %22, %23 : vector<16x128xf32>
    %c0_9 = arith.constant 0 : index
    %c0_10 = arith.constant 0 : index
    %25 = vector.load %arg2[%c0_9, %c0_10] : memref<2x8xf32, #tpu.memory_space<vmem>>, vector<2x8xf32>
    %26 = vector.shape_cast %25 : vector<2x8xf32> to vector<2x1x8xf32>
    %27 = tpu.concatenate %26, %26, %26, %26 in 0 : vector<2x1x8xf32>, vector<2x1x8xf32>, vector<2x1x8xf32>, vector<2x1x8xf32> -> vector<8x1x8xf32>
    %28 = arith.truncf %24 : vector<16x128xf32> to vector<16x128xbf16>
    %c0_11 = arith.constant 0 : index
    %c0_12 = arith.constant 0 : index
    %c0_13 = arith.constant 0 : index
    %29 = vector.load %arg5[%c0_11, %c0_12, %c0_13] : memref<2x128x384xbf16, #tpu.memory_space<vmem>>, vector<1x128x384xbf16>
    %30 = vector.shape_cast %29 : vector<1x128x384xbf16> to vector<128x384xbf16>
    %cst_14 = arith.constant dense<0.000000e+00> : vector<16x384xf32>
    %31 = tpu.matmul %28, %30, %cst_14 {dimension_numbers = #tpu.dot_dimension_numbers<[1], [0], [0], [1], [0, 0, 1, 1], [], []>} : vector<16x128xbf16>, vector<128x384xbf16>, vector<16x384xf32> -> vector<16x384xf32>
    %c0_15 = arith.constant 0 : index
    %c0_16 = arith.constant 0 : index
    %c0_17 = arith.constant 0 : index
    %32 = vector.load %arg6[%c0_15, %c0_16, %c0_17] : memref<2x1x384xf32, #tpu.memory_space<vmem>>, vector<1x1x384xf32>
    %33 = vector.shape_cast %32 : vector<1x1x384xf32> to vector<1x384xf32>
    %34 = vector.broadcast %33 : vector<1x384xf32> to vector<16x384xf32>
    %35 = arith.addf %31, %34 : vector<16x384xf32>
    %36 = vector.extract_strided_slice %35 {offsets = [0, 0], sizes = [16, 128], strides = [1, 1]} : vector<16x384xf32> to vector<16x128xf32>
    %37 = vector.shape_cast %36 : vector<16x128xf32> to vector<2x8x128xf32>
    %38 = arith.truncf %37 : vector<2x8x128xf32> to vector<2x8x128xbf16>
    %39 = vector.extract_strided_slice %35 {offsets = [0, 128], sizes = [16, 128], strides = [1, 1]} : vector<16x384xf32> to vector<16x128xf32>
    %40 = vector.shape_cast %39 : vector<16x128xf32> to vector<2x8x128xf32>
    %41 = arith.truncf %40 : vector<2x8x128xf32> to vector<2x8x128xbf16>
    %42 = vector.extract_strided_slice %35 {offsets = [0, 256], sizes = [16, 128], strides = [1, 1]} : vector<16x384xf32> to vector<16x128xf32>
    %43 = vector.shape_cast %42 : vector<16x128xf32> to vector<2x8x128xf32>
    %44 = arith.truncf %43 : vector<2x8x128xf32> to vector<2x8x128xbf16>
    %45 = vector.extract_strided_slice %38 {offsets = [0, 0, 0], sizes = [2, 8, 32], strides = [1, 1, 1]} : vector<2x8x128xbf16> to vector<2x8x32xbf16>
    %46 = vector.extract_strided_slice %38 {offsets = [0, 0, 32], sizes = [2, 8, 32], strides = [1, 1, 1]} : vector<2x8x128xbf16> to vector<2x8x32xbf16>
    %47 = vector.extract_strided_slice %38 {offsets = [0, 0, 64], sizes = [2, 8, 32], strides = [1, 1, 1]} : vector<2x8x128xbf16> to vector<2x8x32xbf16>
    %48 = vector.extract_strided_slice %38 {offsets = [0, 0, 96], sizes = [2, 8, 32], strides = [1, 1, 1]} : vector<2x8x128xbf16> to vector<2x8x32xbf16>
    %49 = tpu.concatenate %45, %46, %47, %48 in 0 : vector<2x8x32xbf16>, vector<2x8x32xbf16>, vector<2x8x32xbf16>, vector<2x8x32xbf16> -> vector<8x8x32xbf16>
    %50 = vector.extract_strided_slice %41 {offsets = [0, 0, 0], sizes = [2, 8, 32], strides = [1, 1, 1]} : vector<2x8x128xbf16> to vector<2x8x32xbf16>
    %51 = vector.extract_strided_slice %41 {offsets = [0, 0, 32], sizes = [2, 8, 32], strides = [1, 1, 1]} : vector<2x8x128xbf16> to vector<2x8x32xbf16>
    %52 = vector.extract_strided_slice %41 {offsets = [0, 0, 64], sizes = [2, 8, 32], strides = [1, 1, 1]} : vector<2x8x128xbf16> to vector<2x8x32xbf16>
    %53 = vector.extract_strided_slice %41 {offsets = [0, 0, 96], sizes = [2, 8, 32], strides = [1, 1, 1]} : vector<2x8x128xbf16> to vector<2x8x32xbf16>
    %54 = tpu.concatenate %50, %51, %52, %53 in 0 : vector<2x8x32xbf16>, vector<2x8x32xbf16>, vector<2x8x32xbf16>, vector<2x8x32xbf16> -> vector<8x8x32xbf16>
    %55 = vector.extract_strided_slice %44 {offsets = [0, 0, 0], sizes = [2, 8, 32], strides = [1, 1, 1]} : vector<2x8x128xbf16> to vector<2x8x32xbf16>
    %56 = vector.extract_strided_slice %44 {offsets = [0, 0, 32], sizes = [2, 8, 32], strides = [1, 1, 1]} : vector<2x8x128xbf16> to vector<2x8x32xbf16>
    %57 = vector.extract_strided_slice %44 {offsets = [0, 0, 64], sizes = [2, 8, 32], strides = [1, 1, 1]} : vector<2x8x128xbf16> to vector<2x8x32xbf16>
    %58 = vector.extract_strided_slice %44 {offsets = [0, 0, 96], sizes = [2, 8, 32], strides = [1, 1, 1]} : vector<2x8x128xbf16> to vector<2x8x32xbf16>
    %59 = tpu.concatenate %55, %56, %57, %58 in 0 : vector<2x8x32xbf16>, vector<2x8x32xbf16>, vector<2x8x32xbf16>, vector<2x8x32xbf16> -> vector<8x8x32xbf16>
    "tpu.trace_start"() <{level = 10 : i32, message = "bqd,bkd->bqk"}> : () -> ()
    %cst_18 = arith.constant dense<0.000000e+00> : vector<8x8x8xf32>
    %60 = tpu.matmul %49, %54, %cst_18 {dimension_numbers = #tpu.dot_dimension_numbers<[2], [2], [1], [1], [0, 0, 0, 1, 1, 1], [0], [0]>} : vector<8x8x32xbf16>, vector<8x8x32xbf16>, vector<8x8x8xf32> -> vector<8x8x8xf32>
    "tpu.trace_stop"() : () -> ()
    %cst_19 = arith.constant 0.176776692 : f32
    %61 = vector.broadcast %cst_19 : f32 to vector<8x8x8xf32>
    %62 = arith.mulf %60, %61 : vector<8x8x8xf32>
    %63 = vector.broadcast %27 : vector<8x1x8xf32> to vector<8x8x8xf32>
    %64 = arith.addf %62, %63 : vector<8x8x8xf32>
    %cst_20 = arith.constant dense<0xFF800000> : vector<8x8xf32>
    %65 = vector.multi_reduction <maximumf>, %64, %cst_20 [2] : vector<8x8x8xf32> to vector<8x8xf32>
    %66 = vector.shape_cast %65 : vector<8x8xf32> to vector<8x8x1xf32>
    %67 = vector.broadcast %66 : vector<8x8x1xf32> to vector<8x8x8xf32>
    %68 = arith.subf %64, %67 : vector<8x8x8xf32>
    %69 = math.exp %68 : vector<8x8x8xf32>
    %cst_21 = arith.constant dense<0.000000e+00> : vector<8x8xf32>
    %70 = vector.multi_reduction <add>, %69, %cst_21 [2] : vector<8x8x8xf32> to vector<8x8xf32>
    %71 = vector.shape_cast %70 : vector<8x8xf32> to vector<8x8x1xf32>
    %72 = tpu.reciprocal %71 {approx = true} : vector<8x8x1xf32> -> vector<8x8x1xf32>
    %73 = vector.broadcast %72 : vector<8x8x1xf32> to vector<8x8x8xf32>
    %74 = arith.mulf %69, %73 : vector<8x8x8xf32>
    %75 = arith.truncf %74 : vector<8x8x8xf32> to vector<8x8x8xbf16>
    "tpu.trace_start"() <{level = 10 : i32, message = "bqk,bkd->bqd"}> : () -> ()
    %cst_22 = arith.constant dense<0.000000e+00> : vector<8x8x32xf32>
    %76 = tpu.matmul %75, %59, %cst_22 {dimension_numbers = #tpu.dot_dimension_numbers<[2], [1], [1], [2], [0, 0, 0, 1, 1, 2], [0], [0]>} : vector<8x8x8xbf16>, vector<8x8x32xbf16>, vector<8x8x32xf32> -> vector<8x8x32xf32>
    "tpu.trace_stop"() : () -> ()
    %77 = vector.extract_strided_slice %76 {offsets = [0, 0, 0], sizes = [2, 8, 32], strides = [1, 1, 1]} : vector<8x8x32xf32> to vector<2x8x32xf32>
    %78 = vector.extract_strided_slice %76 {offsets = [2, 0, 0], sizes = [2, 8, 32], strides = [1, 1, 1]} : vector<8x8x32xf32> to vector<2x8x32xf32>
    %79 = vector.extract_strided_slice %76 {offsets = [4, 0, 0], sizes = [2, 8, 32], strides = [1, 1, 1]} : vector<8x8x32xf32> to vector<2x8x32xf32>
    %80 = vector.extract_strided_slice %76 {offsets = [6, 0, 0], sizes = [2, 8, 32], strides = [1, 1, 1]} : vector<8x8x32xf32> to vector<2x8x32xf32>
    %81 = tpu.concatenate %77, %78, %79, %80 in 2 : vector<2x8x32xf32>, vector<2x8x32xf32>, vector<2x8x32xf32>, vector<2x8x32xf32> -> vector<2x8x128xf32>
    %82 = vector.shape_cast %81 : vector<2x8x128xf32> to vector<16x128xf32>
    %83 = arith.truncf %82 : vector<16x128xf32> to vector<16x128xbf16>
    %c0_23 = arith.constant 0 : index
    %c0_24 = arith.constant 0 : index
    %c0_25 = arith.constant 0 : index
    %84 = vector.load %arg7[%c0_23, %c0_24, %c0_25] : memref<2x128x128xbf16, #tpu.memory_space<vmem>>, vector<1x128x128xbf16>
    %85 = vector.shape_cast %84 : vector<1x128x128xbf16> to vector<128x128xbf16>
    %cst_26 = arith.constant dense<0.000000e+00> : vector<16x128xf32>
    %86 = tpu.matmul %83, %85, %cst_26 {dimension_numbers = #tpu.dot_dimension_numbers<[1], [0], [0], [1], [0, 0, 1, 1], [], []>} : vector<16x128xbf16>, vector<128x128xbf16>, vector<16x128xf32> -> vector<16x128xf32>
    %c0_27 = arith.constant 0 : index
    %c0_28 = arith.constant 0 : index
    %c0_29 = arith.constant 0 : index
    %87 = vector.load %arg8[%c0_27, %c0_28, %c0_29] : memref<2x1x128xf32, #tpu.memory_space<vmem>>, vector<1x1x128xf32>
    %88 = vector.shape_cast %87 : vector<1x1x128xf32> to vector<1x128xf32>
    %89 = vector.broadcast %88 : vector<1x128xf32> to vector<16x128xf32>
    %90 = arith.addf %86, %89 : vector<16x128xf32>
    %91 = arith.addf %24, %90 : vector<16x128xf32>
    %c0_30 = arith.constant 0 : index
    %c0_31 = arith.constant 0 : index
    %c0_32 = arith.constant 0 : index
    %92 = vector.load %arg9[%c0_30, %c0_31, %c0_32] : memref<2x1x128xf32, #tpu.memory_space<vmem>>, vector<1x1x128xf32>
    %93 = vector.shape_cast %92 : vector<1x1x128xf32> to vector<1x128xf32>
    %c0_33 = arith.constant 0 : index
    %c0_34 = arith.constant 0 : index
    %c0_35 = arith.constant 0 : index
    %94 = vector.load %arg10[%c0_33, %c0_34, %c0_35] : memref<2x1x128xf32, #tpu.memory_space<vmem>>, vector<1x1x128xf32>
    %95 = vector.shape_cast %94 : vector<1x1x128xf32> to vector<1x128xf32>
    %cst_36 = arith.constant dense<0.000000e+00> : vector<16xf32>
    %96 = vector.multi_reduction <add>, %91, %cst_36 [1] : vector<16x128xf32> to vector<16xf32>
    %97 = vector.shape_cast %96 : vector<16xf32> to vector<16x1xf32>
    %cst_37 = arith.constant 1.280000e+02 : f32
    %98 = vector.broadcast %cst_37 : f32 to vector<16x1xf32>
    %99 = arith.divf %97, %98 : vector<16x1xf32>
    %100 = vector.broadcast %99 : vector<16x1xf32> to vector<16x128xf32>
    %101 = arith.subf %91, %100 : vector<16x128xf32>
    %102 = arith.mulf %101, %101 : vector<16x128xf32>
    %cst_38 = arith.constant dense<0.000000e+00> : vector<16xf32>
    %103 = vector.multi_reduction <add>, %102, %cst_38 [1] : vector<16x128xf32> to vector<16xf32>
    %104 = vector.shape_cast %103 : vector<16xf32> to vector<16x1xf32>
    %cst_39 = arith.constant 1.280000e+02 : f32
    %105 = vector.broadcast %cst_39 : f32 to vector<16x1xf32>
    %106 = arith.divf %104, %105 : vector<16x1xf32>
    %107 = vector.broadcast %99 : vector<16x1xf32> to vector<16x128xf32>
    %108 = arith.subf %91, %107 : vector<16x128xf32>
    %cst_40 = arith.constant 9.99999974E-6 : f32
    %109 = vector.broadcast %cst_40 : f32 to vector<16x1xf32>
    %110 = arith.addf %106, %109 : vector<16x1xf32>
    %111 = math.rsqrt %110 : vector<16x1xf32>
    %112 = vector.broadcast %111 : vector<16x1xf32> to vector<16x128xf32>
    %113 = arith.mulf %108, %112 : vector<16x128xf32>
    %114 = vector.broadcast %93 : vector<1x128xf32> to vector<16x128xf32>
    %115 = arith.mulf %113, %114 : vector<16x128xf32>
    %116 = vector.broadcast %95 : vector<1x128xf32> to vector<16x128xf32>
    %117 = arith.addf %115, %116 : vector<16x128xf32>
    %118 = arith.truncf %117 : vector<16x128xf32> to vector<16x128xbf16>
    %c0_41 = arith.constant 0 : index
    %c0_42 = arith.constant 0 : index
    %c0_43 = arith.constant 0 : index
    %119 = vector.load %arg11[%c0_41, %c0_42, %c0_43] : memref<2x128x256xbf16, #tpu.memory_space<vmem>>, vector<1x128x256xbf16>
    %120 = vector.shape_cast %119 : vector<1x128x256xbf16> to vector<128x256xbf16>
    %cst_44 = arith.constant dense<0.000000e+00> : vector<16x256xf32>
    %121 = tpu.matmul %118, %120, %cst_44 {dimension_numbers = #tpu.dot_dimension_numbers<[1], [0], [0], [1], [0, 0, 1, 1], [], []>} : vector<16x128xbf16>, vector<128x256xbf16>, vector<16x256xf32> -> vector<16x256xf32>
    %c0_45 = arith.constant 0 : index
    %c0_46 = arith.constant 0 : index
    %c0_47 = arith.constant 0 : index
    %122 = vector.load %arg12[%c0_45, %c0_46, %c0_47] : memref<2x1x256xf32, #tpu.memory_space<vmem>>, vector<1x1x256xf32>
    %123 = vector.shape_cast %122 : vector<1x1x256xf32> to vector<1x256xf32>
    %124 = vector.broadcast %123 : vector<1x256xf32> to vector<16x256xf32>
    %125 = arith.addf %121, %124 : vector<16x256xf32>
    %126 = arith.mulf %125, %125 : vector<16x256xf32>
    %127 = arith.mulf %125, %126 : vector<16x256xf32>
    %cst_48 = arith.constant 4.471500e-02 : f32
    %128 = vector.broadcast %cst_48 : f32 to vector<16x256xf32>
    %129 = arith.mulf %128, %127 : vector<16x256xf32>
    %130 = arith.addf %125, %129 : vector<16x256xf32>
    %cst_49 = arith.constant 0.797884583 : f32
    %131 = vector.broadcast %cst_49 : f32 to vector<16x256xf32>
    %132 = arith.mulf %131, %130 : vector<16x256xf32>
    %133 = math.tanh %132 : vector<16x256xf32>
    %cst_50 = arith.constant 1.000000e+00 : f32
    %134 = vector.broadcast %cst_50 : f32 to vector<16x256xf32>
    %135 = arith.addf %134, %133 : vector<16x256xf32>
    %cst_51 = arith.constant 5.000000e-01 : f32
    %136 = vector.broadcast %cst_51 : f32 to vector<16x256xf32>
    %137 = arith.mulf %136, %135 : vector<16x256xf32>
    %138 = arith.mulf %125, %137 : vector<16x256xf32>
    %139 = arith.truncf %138 : vector<16x256xf32> to vector<16x256xbf16>
    %c0_52 = arith.constant 0 : index
    %c0_53 = arith.constant 0 : index
    %c0_54 = arith.constant 0 : index
    %140 = vector.load %arg13[%c0_52, %c0_53, %c0_54] : memref<2x256x128xbf16, #tpu.memory_space<vmem>>, vector<1x256x128xbf16>
    %141 = vector.shape_cast %140 : vector<1x256x128xbf16> to vector<256x128xbf16>
    %cst_55 = arith.constant dense<0.000000e+00> : vector<16x128xf32>
    %142 = tpu.matmul %139, %141, %cst_55 {dimension_numbers = #tpu.dot_dimension_numbers<[1], [0], [0], [1], [0, 0, 1, 1], [], []>} : vector<16x256xbf16>, vector<256x128xbf16>, vector<16x128xf32> -> vector<16x128xf32>
    %c0_56 = arith.constant 0 : index
    %c0_57 = arith.constant 0 : index
    %c0_58 = arith.constant 0 : index
    %143 = vector.load %arg14[%c0_56, %c0_57, %c0_58] : memref<2x1x128xf32, #tpu.memory_space<vmem>>, vector<1x1x128xf32>
    %144 = vector.shape_cast %143 : vector<1x1x128xf32> to vector<1x128xf32>
    %145 = vector.broadcast %144 : vector<1x128xf32> to vector<16x128xf32>
    %146 = arith.addf %142, %145 : vector<16x128xf32>
    %147 = arith.addf %117, %146 : vector<16x128xf32>
    %c0_59 = arith.constant 0 : index
    %c0_60 = arith.constant 0 : index
    %c0_61 = arith.constant 0 : index
    %148 = vector.load %arg15[%c0_59, %c0_60, %c0_61] : memref<2x1x128xf32, #tpu.memory_space<vmem>>, vector<1x1x128xf32>
    %149 = vector.shape_cast %148 : vector<1x1x128xf32> to vector<1x128xf32>
    %c0_62 = arith.constant 0 : index
    %c0_63 = arith.constant 0 : index
    %c0_64 = arith.constant 0 : index
    %150 = vector.load %arg16[%c0_62, %c0_63, %c0_64] : memref<2x1x128xf32, #tpu.memory_space<vmem>>, vector<1x1x128xf32>
    %151 = vector.shape_cast %150 : vector<1x1x128xf32> to vector<1x128xf32>
    %cst_65 = arith.constant dense<0.000000e+00> : vector<16xf32>
    %152 = vector.multi_reduction <add>, %147, %cst_65 [1] : vector<16x128xf32> to vector<16xf32>
    %153 = vector.shape_cast %152 : vector<16xf32> to vector<16x1xf32>
    %cst_66 = arith.constant 1.280000e+02 : f32
    %154 = vector.broadcast %cst_66 : f32 to vector<16x1xf32>
    %155 = arith.divf %153, %154 : vector<16x1xf32>
    %156 = vector.broadcast %155 : vector<16x1xf32> to vector<16x128xf32>
    %157 = arith.subf %147, %156 : vector<16x128xf32>
    %158 = arith.mulf %157, %157 : vector<16x128xf32>
    %cst_67 = arith.constant dense<0.000000e+00> : vector<16xf32>
    %159 = vector.multi_reduction <add>, %158, %cst_67 [1] : vector<16x128xf32> to vector<16xf32>
    %160 = vector.shape_cast %159 : vector<16xf32> to vector<16x1xf32>
    %cst_68 = arith.constant 1.280000e+02 : f32
    %161 = vector.broadcast %cst_68 : f32 to vector<16x1xf32>
    %162 = arith.divf %160, %161 : vector<16x1xf32>
    %163 = vector.broadcast %155 : vector<16x1xf32> to vector<16x128xf32>
    %164 = arith.subf %147, %163 : vector<16x128xf32>
    %cst_69 = arith.constant 9.99999974E-6 : f32
    %165 = vector.broadcast %cst_69 : f32 to vector<16x1xf32>
    %166 = arith.addf %162, %165 : vector<16x1xf32>
    %167 = math.rsqrt %166 : vector<16x1xf32>
    %168 = vector.broadcast %167 : vector<16x1xf32> to vector<16x128xf32>
    %169 = arith.mulf %164, %168 : vector<16x128xf32>
    %170 = vector.broadcast %149 : vector<1x128xf32> to vector<16x128xf32>
    %171 = arith.mulf %169, %170 : vector<16x128xf32>
    %172 = vector.broadcast %151 : vector<1x128xf32> to vector<16x128xf32>
    %173 = arith.addf %171, %172 : vector<16x128xf32>
    %174 = arith.truncf %173 : vector<16x128xf32> to vector<16x128xbf16>
    %c1 = arith.constant 1 : index
    %c0_70 = arith.constant 0 : index
    %c0_71 = arith.constant 0 : index
    %175 = vector.load %arg5[%c1, %c0_70, %c0_71] : memref<2x128x384xbf16, #tpu.memory_space<vmem>>, vector<1x128x384xbf16>
    %176 = vector.shape_cast %175 : vector<1x128x384xbf16> to vector<128x384xbf16>
    %cst_72 = arith.constant dense<0.000000e+00> : vector<16x384xf32>
    %177 = tpu.matmul %174, %176, %cst_72 {dimension_numbers = #tpu.dot_dimension_numbers<[1], [0], [0], [1], [0, 0, 1, 1], [], []>} : vector<16x128xbf16>, vector<128x384xbf16>, vector<16x384xf32> -> vector<16x384xf32>
    %c1_73 = arith.constant 1 : index
    %c0_74 = arith.constant 0 : index
    %c0_75 = arith.constant 0 : index
    %178 = vector.load %arg6[%c1_73, %c0_74, %c0_75] : memref<2x1x384xf32, #tpu.memory_space<vmem>>, vector<1x1x384xf32>
    %179 = vector.shape_cast %178 : vector<1x1x384xf32> to vector<1x384xf32>
    %180 = vector.broadcast %179 : vector<1x384xf32> to vector<16x384xf32>
    %181 = arith.addf %177, %180 : vector<16x384xf32>
    %182 = vector.extract_strided_slice %181 {offsets = [0, 0], sizes = [16, 128], strides = [1, 1]} : vector<16x384xf32> to vector<16x128xf32>
    %183 = vector.shape_cast %182 : vector<16x128xf32> to vector<2x8x128xf32>
    %184 = arith.truncf %183 : vector<2x8x128xf32> to vector<2x8x128xbf16>
    %185 = vector.extract_strided_slice %181 {offsets = [0, 128], sizes = [16, 128], strides = [1, 1]} : vector<16x384xf32> to vector<16x128xf32>
    %186 = vector.shape_cast %185 : vector<16x128xf32> to vector<2x8x128xf32>
    %187 = arith.truncf %186 : vector<2x8x128xf32> to vector<2x8x128xbf16>
    %188 = vector.extract_strided_slice %181 {offsets = [0, 256], sizes = [16, 128], strides = [1, 1]} : vector<16x384xf32> to vector<16x128xf32>
    %189 = vector.shape_cast %188 : vector<16x128xf32> to vector<2x8x128xf32>
    %190 = arith.truncf %189 : vector<2x8x128xf32> to vector<2x8x128xbf16>
    %191 = vector.extract_strided_slice %184 {offsets = [0, 0, 0], sizes = [2, 8, 32], strides = [1, 1, 1]} : vector<2x8x128xbf16> to vector<2x8x32xbf16>
    %192 = vector.extract_strided_slice %184 {offsets = [0, 0, 32], sizes = [2, 8, 32], strides = [1, 1, 1]} : vector<2x8x128xbf16> to vector<2x8x32xbf16>
    %193 = vector.extract_strided_slice %184 {offsets = [0, 0, 64], sizes = [2, 8, 32], strides = [1, 1, 1]} : vector<2x8x128xbf16> to vector<2x8x32xbf16>
    %194 = vector.extract_strided_slice %184 {offsets = [0, 0, 96], sizes = [2, 8, 32], strides = [1, 1, 1]} : vector<2x8x128xbf16> to vector<2x8x32xbf16>
    %195 = tpu.concatenate %191, %192, %193, %194 in 0 : vector<2x8x32xbf16>, vector<2x8x32xbf16>, vector<2x8x32xbf16>, vector<2x8x32xbf16> -> vector<8x8x32xbf16>
    %196 = vector.extract_strided_slice %187 {offsets = [0, 0, 0], sizes = [2, 8, 32], strides = [1, 1, 1]} : vector<2x8x128xbf16> to vector<2x8x32xbf16>
    %197 = vector.extract_strided_slice %187 {offsets = [0, 0, 32], sizes = [2, 8, 32], strides = [1, 1, 1]} : vector<2x8x128xbf16> to vector<2x8x32xbf16>
    %198 = vector.extract_strided_slice %187 {offsets = [0, 0, 64], sizes = [2, 8, 32], strides = [1, 1, 1]} : vector<2x8x128xbf16> to vector<2x8x32xbf16>
    %199 = vector.extract_strided_slice %187 {offsets = [0, 0, 96], sizes = [2, 8, 32], strides = [1, 1, 1]} : vector<2x8x128xbf16> to vector<2x8x32xbf16>
    %200 = tpu.concatenate %196, %197, %198, %199 in 0 : vector<2x8x32xbf16>, vector<2x8x32xbf16>, vector<2x8x32xbf16>, vector<2x8x32xbf16> -> vector<8x8x32xbf16>
    %201 = vector.extract_strided_slice %190 {offsets = [0, 0, 0], sizes = [2, 8, 32], strides = [1, 1, 1]} : vector<2x8x128xbf16> to vector<2x8x32xbf16>
    %202 = vector.extract_strided_slice %190 {offsets = [0, 0, 32], sizes = [2, 8, 32], strides = [1, 1, 1]} : vector<2x8x128xbf16> to vector<2x8x32xbf16>
    %203 = vector.extract_strided_slice %190 {offsets = [0, 0, 64], sizes = [2, 8, 32], strides = [1, 1, 1]} : vector<2x8x128xbf16> to vector<2x8x32xbf16>
    %204 = vector.extract_strided_slice %190 {offsets = [0, 0, 96], sizes = [2, 8, 32], strides = [1, 1, 1]} : vector<2x8x128xbf16> to vector<2x8x32xbf16>
    %205 = tpu.concatenate %201, %202, %203, %204 in 0 : vector<2x8x32xbf16>, vector<2x8x32xbf16>, vector<2x8x32xbf16>, vector<2x8x32xbf16> -> vector<8x8x32xbf16>
    "tpu.trace_start"() <{level = 10 : i32, message = "bqd,bkd->bqk"}> : () -> ()
    %cst_76 = arith.constant dense<0.000000e+00> : vector<8x8x8xf32>
    %206 = tpu.matmul %195, %200, %cst_76 {dimension_numbers = #tpu.dot_dimension_numbers<[2], [2], [1], [1], [0, 0, 0, 1, 1, 1], [0], [0]>} : vector<8x8x32xbf16>, vector<8x8x32xbf16>, vector<8x8x8xf32> -> vector<8x8x8xf32>
    "tpu.trace_stop"() : () -> ()
    %cst_77 = arith.constant 0.176776692 : f32
    %207 = vector.broadcast %cst_77 : f32 to vector<8x8x8xf32>
    %208 = arith.mulf %206, %207 : vector<8x8x8xf32>
    %209 = vector.broadcast %27 : vector<8x1x8xf32> to vector<8x8x8xf32>
    %210 = arith.addf %208, %209 : vector<8x8x8xf32>
    %cst_78 = arith.constant dense<0xFF800000> : vector<8x8xf32>
    %211 = vector.multi_reduction <maximumf>, %210, %cst_78 [2] : vector<8x8x8xf32> to vector<8x8xf32>
    %212 = vector.shape_cast %211 : vector<8x8xf32> to vector<8x8x1xf32>
    %213 = vector.broadcast %212 : vector<8x8x1xf32> to vector<8x8x8xf32>
    %214 = arith.subf %210, %213 : vector<8x8x8xf32>
    %215 = math.exp %214 : vector<8x8x8xf32>
    %cst_79 = arith.constant dense<0.000000e+00> : vector<8x8xf32>
    %216 = vector.multi_reduction <add>, %215, %cst_79 [2] : vector<8x8x8xf32> to vector<8x8xf32>
    %217 = vector.shape_cast %216 : vector<8x8xf32> to vector<8x8x1xf32>
    %218 = tpu.reciprocal %217 {approx = true} : vector<8x8x1xf32> -> vector<8x8x1xf32>
    %219 = vector.broadcast %218 : vector<8x8x1xf32> to vector<8x8x8xf32>
    %220 = arith.mulf %215, %219 : vector<8x8x8xf32>
    %221 = arith.truncf %220 : vector<8x8x8xf32> to vector<8x8x8xbf16>
    "tpu.trace_start"() <{level = 10 : i32, message = "bqk,bkd->bqd"}> : () -> ()
    %cst_80 = arith.constant dense<0.000000e+00> : vector<8x8x32xf32>
    %222 = tpu.matmul %221, %205, %cst_80 {dimension_numbers = #tpu.dot_dimension_numbers<[2], [1], [1], [2], [0, 0, 0, 1, 1, 2], [0], [0]>} : vector<8x8x8xbf16>, vector<8x8x32xbf16>, vector<8x8x32xf32> -> vector<8x8x32xf32>
    "tpu.trace_stop"() : () -> ()
    %223 = vector.extract_strided_slice %222 {offsets = [0, 0, 0], sizes = [2, 8, 32], strides = [1, 1, 1]} : vector<8x8x32xf32> to vector<2x8x32xf32>
    %224 = vector.extract_strided_slice %222 {offsets = [2, 0, 0], sizes = [2, 8, 32], strides = [1, 1, 1]} : vector<8x8x32xf32> to vector<2x8x32xf32>
    %225 = vector.extract_strided_slice %222 {offsets = [4, 0, 0], sizes = [2, 8, 32], strides = [1, 1, 1]} : vector<8x8x32xf32> to vector<2x8x32xf32>
    %226 = vector.extract_strided_slice %222 {offsets = [6, 0, 0], sizes = [2, 8, 32], strides = [1, 1, 1]} : vector<8x8x32xf32> to vector<2x8x32xf32>
    %227 = tpu.concatenate %223, %224, %225, %226 in 2 : vector<2x8x32xf32>, vector<2x8x32xf32>, vector<2x8x32xf32>, vector<2x8x32xf32> -> vector<2x8x128xf32>
    %228 = vector.shape_cast %227 : vector<2x8x128xf32> to vector<16x128xf32>
    %229 = arith.truncf %228 : vector<16x128xf32> to vector<16x128xbf16>
    %c1_81 = arith.constant 1 : index
    %c0_82 = arith.constant 0 : index
    %c0_83 = arith.constant 0 : index
    %230 = vector.load %arg7[%c1_81, %c0_82, %c0_83] : memref<2x128x128xbf16, #tpu.memory_space<vmem>>, vector<1x128x128xbf16>
    %231 = vector.shape_cast %230 : vector<1x128x128xbf16> to vector<128x128xbf16>
    %cst_84 = arith.constant dense<0.000000e+00> : vector<16x128xf32>
    %232 = tpu.matmul %229, %231, %cst_84 {dimension_numbers = #tpu.dot_dimension_numbers<[1], [0], [0], [1], [0, 0, 1, 1], [], []>} : vector<16x128xbf16>, vector<128x128xbf16>, vector<16x128xf32> -> vector<16x128xf32>
    %c1_85 = arith.constant 1 : index
    %c0_86 = arith.constant 0 : index
    %c0_87 = arith.constant 0 : index
    %233 = vector.load %arg8[%c1_85, %c0_86, %c0_87] : memref<2x1x128xf32, #tpu.memory_space<vmem>>, vector<1x1x128xf32>
    %234 = vector.shape_cast %233 : vector<1x1x128xf32> to vector<1x128xf32>
    %235 = vector.broadcast %234 : vector<1x128xf32> to vector<16x128xf32>
    %236 = arith.addf %232, %235 : vector<16x128xf32>
    %237 = arith.addf %173, %236 : vector<16x128xf32>
    %c1_88 = arith.constant 1 : index
    %c0_89 = arith.constant 0 : index
    %c0_90 = arith.constant 0 : index
    %238 = vector.load %arg9[%c1_88, %c0_89, %c0_90] : memref<2x1x128xf32, #tpu.memory_space<vmem>>, vector<1x1x128xf32>
    %239 = vector.shape_cast %238 : vector<1x1x128xf32> to vector<1x128xf32>
    %c1_91 = arith.constant 1 : index
    %c0_92 = arith.constant 0 : index
    %c0_93 = arith.constant 0 : index
    %240 = vector.load %arg10[%c1_91, %c0_92, %c0_93] : memref<2x1x128xf32, #tpu.memory_space<vmem>>, vector<1x1x128xf32>
    %241 = vector.shape_cast %240 : vector<1x1x128xf32> to vector<1x128xf32>
    %cst_94 = arith.constant dense<0.000000e+00> : vector<16xf32>
    %242 = vector.multi_reduction <add>, %237, %cst_94 [1] : vector<16x128xf32> to vector<16xf32>
    %243 = vector.shape_cast %242 : vector<16xf32> to vector<16x1xf32>
    %cst_95 = arith.constant 1.280000e+02 : f32
    %244 = vector.broadcast %cst_95 : f32 to vector<16x1xf32>
    %245 = arith.divf %243, %244 : vector<16x1xf32>
    %246 = vector.broadcast %245 : vector<16x1xf32> to vector<16x128xf32>
    %247 = arith.subf %237, %246 : vector<16x128xf32>
    %248 = arith.mulf %247, %247 : vector<16x128xf32>
    %cst_96 = arith.constant dense<0.000000e+00> : vector<16xf32>
    %249 = vector.multi_reduction <add>, %248, %cst_96 [1] : vector<16x128xf32> to vector<16xf32>
    %250 = vector.shape_cast %249 : vector<16xf32> to vector<16x1xf32>
    %cst_97 = arith.constant 1.280000e+02 : f32
    %251 = vector.broadcast %cst_97 : f32 to vector<16x1xf32>
    %252 = arith.divf %250, %251 : vector<16x1xf32>
    %253 = vector.broadcast %245 : vector<16x1xf32> to vector<16x128xf32>
    %254 = arith.subf %237, %253 : vector<16x128xf32>
    %cst_98 = arith.constant 9.99999974E-6 : f32
    %255 = vector.broadcast %cst_98 : f32 to vector<16x1xf32>
    %256 = arith.addf %252, %255 : vector<16x1xf32>
    %257 = math.rsqrt %256 : vector<16x1xf32>
    %258 = vector.broadcast %257 : vector<16x1xf32> to vector<16x128xf32>
    %259 = arith.mulf %254, %258 : vector<16x128xf32>
    %260 = vector.broadcast %239 : vector<1x128xf32> to vector<16x128xf32>
    %261 = arith.mulf %259, %260 : vector<16x128xf32>
    %262 = vector.broadcast %241 : vector<1x128xf32> to vector<16x128xf32>
    %263 = arith.addf %261, %262 : vector<16x128xf32>
    %264 = arith.truncf %263 : vector<16x128xf32> to vector<16x128xbf16>
    %c1_99 = arith.constant 1 : index
    %c0_100 = arith.constant 0 : index
    %c0_101 = arith.constant 0 : index
    %265 = vector.load %arg11[%c1_99, %c0_100, %c0_101] : memref<2x128x256xbf16, #tpu.memory_space<vmem>>, vector<1x128x256xbf16>
    %266 = vector.shape_cast %265 : vector<1x128x256xbf16> to vector<128x256xbf16>
    %cst_102 = arith.constant dense<0.000000e+00> : vector<16x256xf32>
    %267 = tpu.matmul %264, %266, %cst_102 {dimension_numbers = #tpu.dot_dimension_numbers<[1], [0], [0], [1], [0, 0, 1, 1], [], []>} : vector<16x128xbf16>, vector<128x256xbf16>, vector<16x256xf32> -> vector<16x256xf32>
    %c1_103 = arith.constant 1 : index
    %c0_104 = arith.constant 0 : index
    %c0_105 = arith.constant 0 : index
    %268 = vector.load %arg12[%c1_103, %c0_104, %c0_105] : memref<2x1x256xf32, #tpu.memory_space<vmem>>, vector<1x1x256xf32>
    %269 = vector.shape_cast %268 : vector<1x1x256xf32> to vector<1x256xf32>
    %270 = vector.broadcast %269 : vector<1x256xf32> to vector<16x256xf32>
    %271 = arith.addf %267, %270 : vector<16x256xf32>
    %272 = arith.mulf %271, %271 : vector<16x256xf32>
    %273 = arith.mulf %271, %272 : vector<16x256xf32>
    %cst_106 = arith.constant 4.471500e-02 : f32
    %274 = vector.broadcast %cst_106 : f32 to vector<16x256xf32>
    %275 = arith.mulf %274, %273 : vector<16x256xf32>
    %276 = arith.addf %271, %275 : vector<16x256xf32>
    %cst_107 = arith.constant 0.797884583 : f32
    %277 = vector.broadcast %cst_107 : f32 to vector<16x256xf32>
    %278 = arith.mulf %277, %276 : vector<16x256xf32>
    %279 = math.tanh %278 : vector<16x256xf32>
    %cst_108 = arith.constant 1.000000e+00 : f32
    %280 = vector.broadcast %cst_108 : f32 to vector<16x256xf32>
    %281 = arith.addf %280, %279 : vector<16x256xf32>
    %cst_109 = arith.constant 5.000000e-01 : f32
    %282 = vector.broadcast %cst_109 : f32 to vector<16x256xf32>
    %283 = arith.mulf %282, %281 : vector<16x256xf32>
    %284 = arith.mulf %271, %283 : vector<16x256xf32>
    %285 = arith.truncf %284 : vector<16x256xf32> to vector<16x256xbf16>
    %c1_110 = arith.constant 1 : index
    %c0_111 = arith.constant 0 : index
    %c0_112 = arith.constant 0 : index
    %286 = vector.load %arg13[%c1_110, %c0_111, %c0_112] : memref<2x256x128xbf16, #tpu.memory_space<vmem>>, vector<1x256x128xbf16>
    %287 = vector.shape_cast %286 : vector<1x256x128xbf16> to vector<256x128xbf16>
    %cst_113 = arith.constant dense<0.000000e+00> : vector<16x128xf32>
    %288 = tpu.matmul %285, %287, %cst_113 {dimension_numbers = #tpu.dot_dimension_numbers<[1], [0], [0], [1], [0, 0, 1, 1], [], []>} : vector<16x256xbf16>, vector<256x128xbf16>, vector<16x128xf32> -> vector<16x128xf32>
    %c1_114 = arith.constant 1 : index
    %c0_115 = arith.constant 0 : index
    %c0_116 = arith.constant 0 : index
    %289 = vector.load %arg14[%c1_114, %c0_115, %c0_116] : memref<2x1x128xf32, #tpu.memory_space<vmem>>, vector<1x1x128xf32>
    %290 = vector.shape_cast %289 : vector<1x1x128xf32> to vector<1x128xf32>
    %291 = vector.broadcast %290 : vector<1x128xf32> to vector<16x128xf32>
    %292 = arith.addf %288, %291 : vector<16x128xf32>
    %293 = arith.addf %263, %292 : vector<16x128xf32>
    %c1_117 = arith.constant 1 : index
    %c0_118 = arith.constant 0 : index
    %c0_119 = arith.constant 0 : index
    %294 = vector.load %arg15[%c1_117, %c0_118, %c0_119] : memref<2x1x128xf32, #tpu.memory_space<vmem>>, vector<1x1x128xf32>
    %295 = vector.shape_cast %294 : vector<1x1x128xf32> to vector<1x128xf32>
    %c1_120 = arith.constant 1 : index
    %c0_121 = arith.constant 0 : index
    %c0_122 = arith.constant 0 : index
    %296 = vector.load %arg16[%c1_120, %c0_121, %c0_122] : memref<2x1x128xf32, #tpu.memory_space<vmem>>, vector<1x1x128xf32>
    %297 = vector.shape_cast %296 : vector<1x1x128xf32> to vector<1x128xf32>
    %cst_123 = arith.constant dense<0.000000e+00> : vector<16xf32>
    %298 = vector.multi_reduction <add>, %293, %cst_123 [1] : vector<16x128xf32> to vector<16xf32>
    %299 = vector.shape_cast %298 : vector<16xf32> to vector<16x1xf32>
    %cst_124 = arith.constant 1.280000e+02 : f32
    %300 = vector.broadcast %cst_124 : f32 to vector<16x1xf32>
    %301 = arith.divf %299, %300 : vector<16x1xf32>
    %302 = vector.broadcast %301 : vector<16x1xf32> to vector<16x128xf32>
    %303 = arith.subf %293, %302 : vector<16x128xf32>
    %304 = arith.mulf %303, %303 : vector<16x128xf32>
    %cst_125 = arith.constant dense<0.000000e+00> : vector<16xf32>
    %305 = vector.multi_reduction <add>, %304, %cst_125 [1] : vector<16x128xf32> to vector<16xf32>
    %306 = vector.shape_cast %305 : vector<16xf32> to vector<16x1xf32>
    %cst_126 = arith.constant 1.280000e+02 : f32
    %307 = vector.broadcast %cst_126 : f32 to vector<16x1xf32>
    %308 = arith.divf %306, %307 : vector<16x1xf32>
    %309 = vector.broadcast %301 : vector<16x1xf32> to vector<16x128xf32>
    %310 = arith.subf %293, %309 : vector<16x128xf32>
    %cst_127 = arith.constant 9.99999974E-6 : f32
    %311 = vector.broadcast %cst_127 : f32 to vector<16x1xf32>
    %312 = arith.addf %308, %311 : vector<16x1xf32>
    %313 = math.rsqrt %312 : vector<16x1xf32>
    %314 = vector.broadcast %313 : vector<16x1xf32> to vector<16x128xf32>
    %315 = arith.mulf %310, %314 : vector<16x128xf32>
    %316 = vector.broadcast %295 : vector<1x128xf32> to vector<16x128xf32>
    %317 = arith.mulf %315, %316 : vector<16x128xf32>
    %318 = vector.broadcast %297 : vector<1x128xf32> to vector<16x128xf32>
    %319 = arith.addf %317, %318 : vector<16x128xf32>
    %320 = vector.shape_cast %319 : vector<16x128xf32> to vector<2x8x128xf32>
    %321 = vector.extract_strided_slice %320 {offsets = [0, 0, 0], sizes = [2, 1, 128], strides = [1, 1, 1]} : vector<2x8x128xf32> to vector<2x1x128xf32>
    %322 = vector.shape_cast %321 : vector<2x1x128xf32> to vector<2x128xf32>
    %323 = arith.truncf %322 : vector<2x128xf32> to vector<2x128xbf16>
    %c0_128 = arith.constant 0 : index
    %c0_129 = arith.constant 0 : index
    %324 = vector.load %arg17[%c0_128, %c0_129] : memref<128x128xbf16, #tpu.memory_space<vmem>>, vector<128x128xbf16>
    %cst_130 = arith.constant dense<0.000000e+00> : vector<2x128xf32>
    %325 = tpu.matmul %323, %324, %cst_130 {dimension_numbers = #tpu.dot_dimension_numbers<[1], [0], [0], [1], [0, 0, 1, 1], [], []>} : vector<2x128xbf16>, vector<128x128xbf16>, vector<2x128xf32> -> vector<2x128xf32>
    %c0_131 = arith.constant 0 : index
    %c0_132 = arith.constant 0 : index
    %326 = vector.load %arg18[%c0_131, %c0_132] : memref<1x128xf32, #tpu.memory_space<vmem>>, vector<1x128xf32>
    %327 = vector.broadcast %326 : vector<1x128xf32> to vector<2x128xf32>
    %328 = arith.addf %325, %327 : vector<2x128xf32>
    %329 = math.tanh %328 : vector<2x128xf32>
    %330 = arith.truncf %329 : vector<2x128xf32> to vector<2x128xbf16>
    %c0_133 = arith.constant 0 : index
    %c0_134 = arith.constant 0 : index
    %331 = vector.load %arg19[%c0_133, %c0_134] : memref<128x128xbf16, #tpu.memory_space<vmem>>, vector<128x128xbf16>
    %cst_135 = arith.constant dense<0.000000e+00> : vector<2x128xf32>
    %332 = tpu.matmul %330, %331, %cst_135 {dimension_numbers = #tpu.dot_dimension_numbers<[1], [0], [0], [1], [0, 0, 1, 1], [], []>} : vector<2x128xbf16>, vector<128x128xbf16>, vector<2x128xf32> -> vector<2x128xf32>
    %c0_136 = arith.constant 0 : index
    %c0_137 = arith.constant 0 : index
    %333 = vector.load %arg20[%c0_136, %c0_137] : memref<1x128xf32, #tpu.memory_space<vmem>>, vector<1x128xf32>
    %334 = vector.broadcast %333 : vector<1x128xf32> to vector<2x128xf32>
    %335 = arith.addf %332, %334 : vector<2x128xf32>
    %c0_138 = arith.constant 0 : index
    %c0_139 = arith.constant 0 : index
    %336 = vector.load %arg21[%c0_138, %c0_139] : memref<2x128xf32, #tpu.memory_space<vmem>>, vector<2x128xf32>
    tpu.vector_store %arg21[%c0_138, %c0_139], %335 {strides = array<i32>} : memref<2x128xf32, #tpu.memory_space<vmem>>, vector<2x128xf32>,
    return
  }
  func.func @transform_0(%arg0: i32) -> (i32, i32) {
    %c0_i32 = arith.constant 0 : i32
    %c0_i32_0 = arith.constant 0 : i32
    %c0_i32_1 = arith.constant 0 : i32
    return %c0_i32, %c0_i32_0 : i32, i32
  }
  func.func @transform_1(%arg0: i32) -> (i32, i32) {
    %c0_i32 = arith.constant 0 : i32
    %c0_i32_0 = arith.constant 0 : i32
    %c0_i32_1 = arith.constant 0 : i32
    return %c0_i32, %c0_i32_0 : i32, i32
  }
  func.func @transform_2(%arg0: i32) -> (i32, i32) {
    %c0_i32 = arith.constant 0 : i32
    %c0_i32_0 = arith.constant 0 : i32
    %c0_i32_1 = arith.constant 0 : i32
    return %c0_i32, %c0_i32_0 : i32, i32
  }
  func.func @transform_3(%arg0: i32) -> (i32, i32) {
    %c0_i32 = arith.constant 0 : i32
    %c0_i32_0 = arith.constant 0 : i32
    %c0_i32_1 = arith.constant 0 : i32
    return %c0_i32, %c0_i32_0 : i32, i32
  }
  func.func @transform_4(%arg0: i32) -> (i32, i32, i32) {
    %c0_i32 = arith.constant 0 : i32
    %c0_i32_0 = arith.constant 0 : i32
    %c0_i32_1 = arith.constant 0 : i32
    %c0_i32_2 = arith.constant 0 : i32
    return %c0_i32, %c0_i32_0, %c0_i32_1 : i32, i32, i32
  }
  func.func @transform_5(%arg0: i32) -> (i32, i32, i32) {
    %c0_i32 = arith.constant 0 : i32
    %c0_i32_0 = arith.constant 0 : i32
    %c0_i32_1 = arith.constant 0 : i32
    %c0_i32_2 = arith.constant 0 : i32
    return %c0_i32, %c0_i32_0, %c0_i32_1 : i32, i32, i32
  }
  func.func @transform_6(%arg0: i32) -> (i32, i32, i32) {
    %c0_i32 = arith.constant 0 : i32
    %c0_i32_0 = arith.constant 0 : i32
    %c0_i32_1 = arith.constant 0 : i32
    %c0_i32_2 = arith.constant 0 : i32
    return %c0_i32, %c0_i32_0, %c0_i32_1 : i32, i32, i32
  }
  func.func @transform_7(%arg0: i32) -> (i32, i32, i32) {
    %c0_i32 = arith.constant 0 : i32
    %c0_i32_0 = arith.constant 0 : i32
    %c0_i32_1 = arith.constant 0 : i32
    %c0_i32_2 = arith.constant 0 : i32
    return %c0_i32, %c0_i32_0, %c0_i32_1 : i32, i32, i32
  }
  func.func @transform_8(%arg0: i32) -> (i32, i32, i32) {
    %c0_i32 = arith.constant 0 : i32
    %c0_i32_0 = arith.constant 0 : i32
    %c0_i32_1 = arith.constant 0 : i32
    %c0_i32_2 = arith.constant 0 : i32
    return %c0_i32, %c0_i32_0, %c0_i32_1 : i32, i32, i32
  }
  func.func @transform_9(%arg0: i32) -> (i32, i32, i32) {
    %c0_i32 = arith.constant 0 : i32
    %c0_i32_0 = arith.constant 0 : i32
    %c0_i32_1 = arith.constant 0 : i32
    %c0_i32_2 = arith.constant 0 : i32
    return %c0_i32, %c0_i32_0, %c0_i32_1 : i32, i32, i32
  }
  func.func @transform_10(%arg0: i32) -> (i32, i32, i32) {
    %c0_i32 = arith.constant 0 : i32
    %c0_i32_0 = arith.constant 0 : i32
    %c0_i32_1 = arith.constant 0 : i32
    %c0_i32_2 = arith.constant 0 : i32
    return %c0_i32, %c0_i32_0, %c0_i32_1 : i32, i32, i32
  }
  func.func @transform_11(%arg0: i32) -> (i32, i32, i32) {
    %c0_i32 = arith.constant 0 : i32
    %c0_i32_0 = arith.constant 0 : i32
    %c0_i32_1 = arith.constant 0 : i32
    %c0_i32_2 = arith.constant 0 : i32
    return %c0_i32, %c0_i32_0, %c0_i32_1 : i32, i32, i32
  }
  func.func @transform_12(%arg0: i32) -> (i32, i32, i32) {
    %c0_i32 = arith.constant 0 : i32
    %c0_i32_0 = arith.constant 0 : i32
    %c0_i32_1 = arith.constant 0 : i32
    %c0_i32_2 = arith.constant 0 : i32
    return %c0_i32, %c0_i32_0, %c0_i32_1 : i32, i32, i32
  }
  func.func @transform_13(%arg0: i32) -> (i32, i32, i32) {
    %c0_i32 = arith.constant 0 : i32
    %c0_i32_0 = arith.constant 0 : i32
    %c0_i32_1 = arith.constant 0 : i32
    %c0_i32_2 = arith.constant 0 : i32
    return %c0_i32, %c0_i32_0, %c0_i32_1 : i32, i32, i32
  }
  func.func @transform_14(%arg0: i32) -> (i32, i32, i32) {
    %c0_i32 = arith.constant 0 : i32
    %c0_i32_0 = arith.constant 0 : i32
    %c0_i32_1 = arith.constant 0 : i32
    %c0_i32_2 = arith.constant 0 : i32
    return %c0_i32, %c0_i32_0, %c0_i32_1 : i32, i32, i32
  }
  func.func @transform_15(%arg0: i32) -> (i32, i32, i32) {
    %c0_i32 = arith.constant 0 : i32
    %c0_i32_0 = arith.constant 0 : i32
    %c0_i32_1 = arith.constant 0 : i32
    %c0_i32_2 = arith.constant 0 : i32
    return %c0_i32, %c0_i32_0, %c0_i32_1 : i32, i32, i32
  }
  func.func @transform_16(%arg0: i32) -> (i32, i32) {
    %c0_i32 = arith.constant 0 : i32
    %c0_i32_0 = arith.constant 0 : i32
    %c0_i32_1 = arith.constant 0 : i32
    return %c0_i32, %c0_i32_0 : i32, i32
  }
  func.func @transform_17(%arg0: i32) -> (i32, i32) {
    %c0_i32 = arith.constant 0 : i32
    %c0_i32_0 = arith.constant 0 : i32
    %c0_i32_1 = arith.constant 0 : i32
    return %c0_i32, %c0_i32_0 : i32, i32
  }
  func.func @transform_18(%arg0: i32) -> (i32, i32) {
    %c0_i32 = arith.constant 0 : i32
    %c0_i32_0 = arith.constant 0 : i32
    %c0_i32_1 = arith.constant 0 : i32
    return %c0_i32, %c0_i32_0 : i32, i32
  }
  func.func @transform_19(%arg0: i32) -> (i32, i32) {
    %c0_i32 = arith.constant 0 : i32
    %c0_i32_0 = arith.constant 0 : i32
    %c0_i32_1 = arith.constant 0 : i32
    return %c0_i32, %c0_i32_0 : i32, i32
  }
  func.func @transform_20(%arg0: i32) -> (i32, i32) {
    %c0_i32 = arith.constant 0 : i32
    %c0_i32_0 = arith.constant 0 : i32
    %c0_i32_1 = arith.constant 0 : i32
    return %c0_i32, %c0_i32_0 : i32, i32
  }
}

</mosaic_0001>

<bundles_post_ra>
// kernel: my_bertweet_forward.1
= control target key start
LH: loop header
LB: loop body
LE: loop exit
PB: predicated region body
PF: predicated region fallthrough
CT: control target
= control target key end

     0   :  { %s6383_s0 = inlined_call_operand.vmem [shape: f32[16,128], index: 0, kind: input, shape index: {}]   ;;  %s6384_s1 = inlined_call_operand.vmem [shape: f32[2,8], index: 1, kind: input, shape index: {}]   ;;  %s6385_s2 = inlined_call_operand.hbm [shape: f32[1,128], index: 2, kind: input, shape index: {}]   ;;  %s6386_s3 = inlined_call_operand.hbm [shape: f32[1,128], index: 3, kind: input, shape index: {}]   ;;  %s6387_s4 = inlined_call_operand.vmem [shape: bf16[2,128,384], index: 4, kind: input, shape index: {}]   ;;  %s6388_s5 = inlined_call_operand.vmem [shape: f32[2,1,384], index: 5, kind: input, shape index: {}]   ;;  %s6389_s6 = inlined_call_operand.hbm [shape: bf16[2,128,128], index: 6, kind: input, shape index: {}]   ;;  %s6390_s7 = inlined_call_operand.vmem [shape: f32[2,1,128], index: 7, kind: input, shape index: {}]   ;;  %s6391_s8 = inlined_call_operand.hbm [shape: f32[2,1,128], index: 8, kind: input, shape index: {}]   ;;  %s6392_s9 = inlined_call_operand.hbm [shape: f32[2,1,128], index: 9, kind: input, shape index: {}]   ;;  %s6393_s10 = inlined_call_operand.hbm [shape: bf16[2,128,256], index: 10, kind: input, shape index: {}]   ;;  %s6394_s11 = inlined_call_operand.hbm [shape: f32[2,1,256], index: 11, kind: input, shape index: {}]   ;;  %s6395_s12 = inlined_call_operand.hbm [shape: bf16[2,256,128], index: 12, kind: input, shape index: {}]   ;;  %s6396_s13 = inlined_call_operand.hbm [shape: f32[2,1,128], index: 13, kind: input, shape index: {}]   ;;  %s6397_s14 = inlined_call_operand.hbm [shape: f32[2,1,128], index: 14, kind: input, shape index: {}]   ;;  %s6398_s15 = inlined_call_operand.hbm [shape: f32[2,1,128], index: 15, kind: input, shape index: {}]   ;;  %s6399_s16 = inlined_call_operand.hbm [shape: bf16[128,128], index: 16, kind: input, shape index: {}]   ;;  %s6400_s17 = inlined_call_operand.hbm [shape: f32[1,128], index: 17, kind: input, shape index: {}]   ;;  %s6401_s18 = inlined_call_operand.hbm [shape: bf16[128,128], index: 18, kind: input, shape index: {}]   ;;  %s6402_s19 = inlined_call_operand.hbm [shape: f32[1,128], index: 19, kind: input, shape index: {}]   ;;  %s6403_s20 = inlined_call_operand.hbm [shape: f32[2,128], index: 20, kind: output, shape index: {}]  }
   0x1   :  { %6406 = sst [smem:[#allocation36_spill]] %s6383_s0 }
   0x2   :  { %6407 = sst [smem:[#allocation37_spill]] %s6384_s1 }
   0x3   :  { %6408 = sst [smem:[#allocation38_spill]] %s6385_s2 }
   0x4   :  { %6409 = sst [smem:[#allocation39_spill]] %s6386_s3 }
   0x5   :  { %6410 = sst [smem:[#allocation40_spill]] %s6387_s4 }
   0x6   :  { %25 = vsyncpa [#allocation3], 0 }
   0x7   :  { %26 = vsyncpa [#allocation6], 0 }
   0x8   :  { %27 = vsyncpa [#allocation9], 0 }
   0x9   :  { %28 = vsyncpa [#allocation12], 0 }
   0xa   :  { %29 = vsyncpa [#allocation15], 0 }
   0xb   :  { %30 = vsyncpa [#allocation18], 0 }
   0xc   :  { %31 = vsyncpa [#allocation21], 0 }
   0xd   :  { %32 = vsyncpa [#allocation24], 0 }
   0xe   :  { %33 = vsyncpa [#allocation4], 0  ;;  %s5492_s1 = smov [#allocation5]   ;;  %s5493_s23 = smov [#allocation8]  }
   0xf   :  { %s54_s22 = sshll.u32 %s5492_s1, 4  ;;  %s81_s24 = sshll.u32 %s5493_s23, 4  ;;  %s55_s22 = int_to_ptr.vmem [resolvable:$true] %s54_s22  ;;  %s82_s24 = int_to_ptr.vmem [resolvable:$true] %s81_s24 }
  0x10   :  { %s5162_s2 = scalar_lea.vmem %s55_s22, 16  ;;  %s5166_s25 = scalar_lea.vmem %s55_s22, 32 }
  0x11   :  { %p5163_p0 = scmp.ne.s32.totalorder %s55_s22, %s5162_s2  ;;  %p5167_p1 = scmp.lt.s32.totalorder %s55_s22, %s55_s22 }
  0x12   :  { %p5168_p2 = scmp.lt.s32.totalorder %s5166_s25, %s5162_s2 }
  0x14   :  { %p5169_p3 = por %p5168_p2, %p5167_p1 }
  0x16   :  { %p5170_p4 = pnand %p5169_p3, %p5163_p0 }
  0x18   :  { %5173 = shalt.err (!%p5170_p4)
}
  0x19   :  { %s6411_s27 = sld [smem:[#allocation39_spill]]  ;;  %s5182_s28 = scalar_lea.vmem %s82_s24, 32 }
  0x1a   :  { %p5183_p5 = scmp.ne.s32.totalorder %s82_s24, %s5182_s28  ;;  %p5187_p6 = scmp.lt.s32.totalorder %s82_s24, %s82_s24 }
  0x1b   :  { %p5188_p7 = scmp.lt.s32.totalorder %s5182_s28, %s5182_s28 }
  0x1d   :  { %p5189_p8 = por %p5188_p7, %p5187_p6 }
  0x1f   :  { %57 = dma.hbm_to_vmem [thread:$0]  %s6411_s27, 16, %s55_s22, [#allocation6]  }
  0x20   :  { %p5190_p9 = pnand %p5189_p8, %p5183_p5 }
  0x22   :  { %5193 = shalt.err (!%p5190_p9)
}
  0x23   :  { %s5494_s4 = smov 16   ;;  %s5495_s29 = smov 1  }
  0x24   :  { %87 = dma.hbm_to_vmem [thread:$0]  %s6391_s8, 32, %s82_s24, [#allocation9], %s5494_s4, %s5494_s4, %s5495_s29  }
  0x25   :  { %s5496_s21 = smov [#allocation11]  }
  0x26   :  { %s105_s1 = sshll.u32 %s5496_s21, 4  ;;  %s106_s1 = int_to_ptr.vmem [resolvable:$true] %s105_s1 }
  0x27   :  { %s5202_s22 = scalar_lea.vmem %s106_s1, 4096  ;;  %p5207_p11 = scmp.lt.s32.totalorder %s106_s1, %s106_s1 }
  0x28   :  { %p5203_p10 = scmp.ne.s32.totalorder %s106_s1, %s5202_s22  ;;  %p5208_p12 = scmp.lt.s32.totalorder %s5202_s22, %s5202_s22 }
  0x2a   :  { %p5209_p13 = por %p5208_p12, %p5207_p11 }
  0x2c   :  { %p5210_p0 = pnand %p5209_p13, %p5203_p10 }
  0x2e   :  { %5213 = shalt.err (!%p5210_p0)
}
  0x2f   :  { %s5497_s23 = smov 128   ;;  %s5498_s2 = smov 8  }
  0x30   :  { %111 = dma.hbm_to_vmem [thread:$0]  %s6393_s10, 4096, %s106_s1, [#allocation12], %s5497_s23, %s5497_s23, %s5498_s2  }
  0x31   :  { %s5499_s26 = smov [#allocation14]   ;;  %s5500_s8 = smov [#allocation17]  }
  0x32   :  { %s129_s27 = sshll.u32 %s5499_s26, 4  ;;  %s153_s24 = sshll.u32 %s5500_s8, 4  ;;  %s130_s27 = int_to_ptr.vmem [resolvable:$true] %s129_s27  ;;  %s154_s24 = int_to_ptr.vmem [resolvable:$true] %s153_s24 }
  0x33   :  { %s5222_s28 = scalar_lea.vmem %s130_s27, 4096  ;;  %p5227_p2 = scmp.lt.s32.totalorder %s130_s27, %s130_s27 }
  0x34   :  { %p5223_p1 = scmp.ne.s32.totalorder %s130_s27, %s5222_s28  ;;  %p5228_p3 = scmp.lt.s32.totalorder %s5222_s28, %s5222_s28 }
  0x36   :  { %p5229_p4 = por %p5228_p3, %p5227_p2 }
  0x38   :  { %p5230_p5 = pnand %p5229_p4, %p5223_p1 }
  0x3a   :  { %5233 = shalt.err (!%p5230_p5)
}
  0x3b   :  { %s5501_s30 = smov 64   ;;  %s5502_s0 = smov 4  }
  0x3c   :  { %135 = dma.hbm_to_vmem [thread:$0]  %s6395_s12, 4096, %s130_s27, [#allocation15], %s5501_s30, %s5501_s30, %s5502_s0  }
  0x3d   :  { %s5242_s10 = scalar_lea.vmem %s154_s24, 32  ;;  %p5247_p7 = scmp.lt.s32.totalorder %s154_s24, %s154_s24 }
  0x3e   :  { %p5243_p6 = scmp.ne.s32.totalorder %s154_s24, %s5242_s10  ;;  %p5248_p8 = scmp.lt.s32.totalorder %s5242_s10, %s5242_s10 }
  0x40   :  { %p5249_p9 = por %p5248_p8, %p5247_p7 }
  0x42   :  { %p5250_p10 = pnand %p5249_p9, %p5243_p6 }
  0x44   :  { %5253 = shalt.err (!%p5250_p10)
}
  0x45   :  { %159 = dma.hbm_to_vmem [thread:$0]  %s6397_s14, 32, %s154_s24, [#allocation18], %s5494_s4, %s5494_s4, %s5495_s29  }
  0x46   :  { %s5503_s2 = smov [#allocation20]   ;;  %s5504_s3 = smov [#allocation23]  }
  0x47   :  { %s177_s25 = sshll.u32 %s5503_s2, 4  ;;  %s199_s12 = sshll.u32 %s5504_s3, 4  ;;  %s178_s25 = int_to_ptr.vmem [resolvable:$true] %s177_s25  ;;  %s200_s12 = int_to_ptr.vmem [resolvable:$true] %s199_s12 }
  0x48   :  { %s5262_s26 = scalar_lea.vmem %s178_s25, 1024  ;;  %p5267_p12 = scmp.lt.s32.totalorder %s178_s25, %s178_s25 }
  0x49   :  { %p5263_p11 = scmp.ne.s32.totalorder %s178_s25, %s5262_s26  ;;  %p5268_p13 = scmp.lt.s32.totalorder %s5262_s26, %s5262_s26 }
  0x4b   :  { %p5269_p0 = por %p5268_p13, %p5267_p12 }
  0x4d   :  { %p5270_p1 = pnand %p5269_p0, %p5263_p11 }
  0x4f   :  { %5273 = shalt.err (!%p5270_p1)
}
  0x50   :  { %183 = dma.hbm_to_vmem [thread:$0]  %s6399_s16, 1024, %s178_s25, [#allocation21], %s5501_s30, %s5501_s30, %s5502_s0  }
  0x51   :  { %s5282_s14 = scalar_lea.vmem %s200_s12, 1024  ;;  %p5287_p3 = scmp.lt.s32.totalorder %s200_s12, %s200_s12 }
  0x52   :  { %p5283_p2 = scmp.ne.s32.totalorder %s200_s12, %s5282_s14  ;;  %p5288_p4 = scmp.lt.s32.totalorder %s5282_s14, %s5282_s14 }
  0x54   :  { %p5289_p5 = por %p5288_p4, %p5287_p3 }
  0x56   :  { %p5290_p6 = pnand %p5289_p5, %p5283_p2 }
  0x58   :  { %5293 = shalt.err (!%p5290_p6)
}
  0x59   :  { %205 = dma.hbm_to_vmem [thread:$0]  %s6401_s18, 1024, %s200_s12, [#allocation24], %s5501_s30, %s5501_s30, %s5502_s0  }
  0x5a   :  { %s5505_s21 = smov [#allocation2]   ;;  %s5506_s10 = smov [#allocation7]  }
  0x5b   :  { %s44_s22 = sshll.u32 %s5505_s21, 4  ;;  %s67_s16 = sshll.u32 %s5506_s10, 4  ;;  %s45_s22 = int_to_ptr.vmem [resolvable:$true] %s44_s22  ;;  %s68_s16 = int_to_ptr.vmem [resolvable:$true] %s67_s16 }
  0x5c   :  { %s5302_s1 = scalar_lea.vmem %s45_s22, 16  ;;  %s5306_s23 = scalar_lea.vmem %s45_s22, 32 }
  0x5d   :  { %p5303_p7 = scmp.ne.s32.totalorder %s45_s22, %s5302_s1  ;;  %p5307_p8 = scmp.lt.s32.totalorder %s45_s22, %s45_s22 }
  0x5e   :  { %p5308_p9 = scmp.lt.s32.totalorder %s5306_s23, %s5302_s1 }
  0x60   :  { %p5309_p10 = por %p5308_p9, %p5307_p8 }
  0x62   :  { %p5310_p11 = pnand %p5309_p10, %p5303_p7 }
  0x64   :  { %5313 = shalt.err (!%p5310_p11)
}
  0x65   :  { %s6412_s3 = sld [smem:[#allocation38_spill]]  ;;  %s5322_s26 = scalar_lea.vmem %s68_s16, 2048 }
  0x66   :  { %p5323_p12 = scmp.ne.s32.totalorder %s68_s16, %s5322_s26  ;;  %p5327_p13 = scmp.lt.s32.totalorder %s68_s16, %s68_s16 }
  0x67   :  { %p5328_p0 = scmp.lt.s32.totalorder %s5322_s26, %s5322_s26 }
  0x69   :  { %p5329_p1 = por %p5328_p0, %p5327_p13 }
  0x6b   :  { %47 = dma.hbm_to_vmem [thread:$0]  %s6412_s3, 16, %s45_s22, [#allocation3]  }
  0x6c   :  { %p5330_p2 = pnand %p5329_p1, %p5323_p12 }
  0x6e   :  { %5333 = shalt.err (!%p5330_p2)
}
  0x6f   :  { %73 = dma.hbm_to_vmem [thread:$0]  %s6389_s6, 2048, %s68_s16, [#allocation6], %s5501_s30, %s5501_s30, %s5502_s0  }
  0x70   :  { %s5507_s27 = smov [#allocation10]   ;;  %s5508_s14 = smov [#allocation13]  }
  0x71   :  { %s93_s8 = sshll.u32 %s5507_s27, 4  ;;  %s117_s24 = sshll.u32 %s5508_s14, 4  ;;  %s94_s8 = int_to_ptr.vmem [resolvable:$true] %s93_s8  ;;  %s118_s24 = int_to_ptr.vmem [resolvable:$true] %s117_s24 }
  0x72   :  { %s5342_s28 = scalar_lea.vmem %s94_s8, 32  ;;  %p5347_p4 = scmp.lt.s32.totalorder %s94_s8, %s94_s8 }
  0x73   :  { %p5343_p3 = scmp.ne.s32.totalorder %s94_s8, %s5342_s28  ;;  %p5348_p5 = scmp.lt.s32.totalorder %s5342_s28, %s5342_s28 }
  0x75   :  { %p5349_p6 = por %p5348_p5, %p5347_p4 }
  0x77   :  { %p5350_p7 = pnand %p5349_p6, %p5343_p3 }
  0x79   :  { %5353 = shalt.err (!%p5350_p7)
}
  0x7a   :  { %99 = dma.hbm_to_vmem [thread:$0]  %s6392_s9, 32, %s94_s8, [#allocation9], %s5494_s4, %s5494_s4, %s5495_s29  }
  0x7b   :  { %s5362_s6 = scalar_lea.vmem %s118_s24, 64  ;;  %p5367_p9 = scmp.lt.s32.totalorder %s118_s24, %s118_s24 }
  0x7c   :  { %p5363_p8 = scmp.ne.s32.totalorder %s118_s24, %s5362_s6  ;;  %p5368_p10 = scmp.lt.s32.totalorder %s5362_s6, %s5362_s6 }
  0x7e   :  { %p5369_p11 = por %p5368_p10, %p5367_p9 }
  0x80   :  { %p5370_p12 = pnand %p5369_p11, %p5363_p8 }
  0x82   :  { %5373 = shalt.err (!%p5370_p12)
}
  0x83   :  { %s5509_s0 = smov 32   ;;  %s5510_s10 = smov 2  }
  0x84   :  { %123 = dma.hbm_to_vmem [thread:$0]  %s6394_s11, 64, %s118_s24, [#allocation12], %s5509_s0, %s5509_s0, %s5510_s10  }
  0x85   :  { %s5511_s23 = smov [#allocation16]   ;;  %s5512_s9 = smov [#allocation19]  }
  0x86   :  { %s141_s2 = sshll.u32 %s5511_s23, 4  ;;  %s165_s25 = sshll.u32 %s5512_s9, 4  ;;  %s142_s2 = int_to_ptr.vmem [resolvable:$true] %s141_s2  ;;  %s166_s25 = int_to_ptr.vmem [resolvable:$true] %s165_s25 }
  0x87   :  { %s5382_s3 = scalar_lea.vmem %s142_s2, 32  ;;  %p5387_p0 = scmp.lt.s32.totalorder %s142_s2, %s142_s2 }
  0x88   :  { %p5383_p13 = scmp.ne.s32.totalorder %s142_s2, %s5382_s3  ;;  %p5388_p1 = scmp.lt.s32.totalorder %s5382_s3, %s5382_s3 }
  0x8a   :  { %p5389_p2 = por %p5388_p1, %p5387_p0 }
  0x8c   :  { %p5390_p3 = pnand %p5389_p2, %p5383_p13 }
  0x8e   :  { %5393 = shalt.err (!%p5390_p3)
}
  0x8f   :  { %147 = dma.hbm_to_vmem [thread:$0]  %s6396_s13, 32, %s142_s2, [#allocation15], %s5494_s4, %s5494_s4, %s5495_s29  }
  0x90   :  { %s5402_s11 = scalar_lea.vmem %s166_s25, 32  ;;  %p5407_p5 = scmp.lt.s32.totalorder %s166_s25, %s166_s25 }
  0x91   :  { %p5403_p4 = scmp.ne.s32.totalorder %s166_s25, %s5402_s11  ;;  %p5408_p6 = scmp.lt.s32.totalorder %s5402_s11, %s5402_s11 }
  0x93   :  { %p5409_p7 = por %p5408_p6, %p5407_p5 }
  0x95   :  { %p5410_p8 = pnand %p5409_p7, %p5403_p4 }
  0x97   :  { %5413 = shalt.err (!%p5410_p8)
}
  0x98   :  { %171 = dma.hbm_to_vmem [thread:$0]  %s6398_s15, 32, %s166_s25, [#allocation18], %s5494_s4, %s5494_s4, %s5495_s29  }
  0x99   :  { %s5513_s8 = smov [#allocation22]   ;;  %s5514_s24 = smov [#allocation25]  }
  0x9a   :  { %s190_s14 = sshll.u32 %s5513_s8, 4  ;;  %s212_s13 = sshll.u32 %s5514_s24, 4  ;;  %s191_s14 = int_to_ptr.vmem [resolvable:$true] %s190_s14  ;;  %s213_s13 = int_to_ptr.vmem [resolvable:$true] %s212_s13 }
  0x9b   :  { %s5422_s28 = scalar_lea.vmem %s191_s14, 16  ;;  %s5426_s21 = scalar_lea.vmem %s191_s14, 32 }
  0x9c   :  { %p5423_p9 = scmp.ne.s32.totalorder %s191_s14, %s5422_s28  ;;  %p5427_p10 = scmp.lt.s32.totalorder %s191_s14, %s191_s14 }
  0x9d   :  { %p5428_p11 = scmp.lt.s32.totalorder %s5426_s21, %s5422_s28 }
  0x9f   :  { %p5429_p12 = por %p5428_p11, %p5427_p10 }
  0xa1   :  { %p5430_p13 = pnand %p5429_p12, %p5423_p9 }
  0xa3   :  { %5433 = shalt.err (!%p5430_p13)
}
  0xa4   :  { %193 = dma.hbm_to_vmem [thread:$0]  %s6400_s17, 16, %s191_s14, [#allocation21]  }
  0xa5   :  { %s5442_s10 = scalar_lea.vmem %s213_s13, 16  ;;  %s5446_s15 = scalar_lea.vmem %s213_s13, 32 }
  0xa6   :  { %p5443_p0 = scmp.ne.s32.totalorder %s213_s13, %s5442_s10  ;;  %p5447_p1 = scmp.lt.s32.totalorder %s213_s13, %s213_s13 }
  0xa7   :  { %p5448_p2 = scmp.lt.s32.totalorder %s5446_s15, %s5442_s10 }
  0xa9   :  { %p5449_p3 = por %p5448_p2, %p5447_p1 }
  0xab   :  { %p5450_p4 = pnand %p5449_p3, %p5443_p0 }
  0xad   :  { %5453 = shalt.err (!%p5450_p4)
}
  0xae   :  { %215 = dma.hbm_to_vmem [thread:$0]  %s6402_s19, 16, %s213_s13, [#allocation24]  }
  0xaf   :  { %5474 = dma.done.wait [#allocation3], 16  }
  0xb0   :  { %5475 = vsyncadd [#allocation3], 4294967280 }
  0xb1   :  { %5476 = dma.done.wait [#allocation6], 2064  }
  0xb2   :  { %5477 = vsyncadd [#allocation6], 4294965232 }
  0xb3   :  { %5478 = dma.done.wait [#allocation9], 64  }
  0xb4   :  { %5479 = vsyncadd [#allocation9], 4294967232 }
  0xb5   :  { %5480 = dma.done.wait [#allocation12], 4160  }
  0xb6   :  { %5481 = vsyncadd [#allocation12], 4294963136 }
  0xb7   :  { %5482 = dma.done.wait [#allocation15], 4128  }
  0xb8   :  { %5483 = vsyncadd [#allocation15], 4294963168 }
  0xb9   :  { %5484 = dma.done.wait [#allocation18], 64  }
  0xba   :  { %5485 = vsyncadd [#allocation18], 4294967232 }
  0xbb   :  { %5486 = dma.done.wait [#allocation21], 1040  }
  0xbc   :  { %5487 = vsyncadd [#allocation21], 4294966256 }
  0xbd   :  { %5488 = dma.done.wait [#allocation24], 1040  }
  0xbe   :  { %5489 = vsyncadd [#allocation24], 4294966256  ;;  %s6413_s1 = sld [smem:[#allocation36_spill]]  ;;  %v5515_v4 = vmov 0.0   ;;  %v5516_v27 = vmov 0   ;;  %vm5517_vm0 = vmmov 0   ;;  %v318_v53 = vlaneseq }
  0xbf   :  { %s6414_s25 = sld [smem:[#allocation40_spill]]  ;;  %4505 = vmatprep.subr.bf16.mxu1 %v5515_v4  ;;  %539 = vmatprep.mubr.bf16.mxu0 %v5516_v27  ;;  %v4116_v44 = vld [vmem:[#allocation2] ss:$0 sm:$0xff]  ;;  %v4117_v48 = vld [vmem:[#allocation5] ss:$0 sm:$0xff]  ;;  %vm639_vm1 = vcmask 261120  }
  0xc0   :  { %4521 = vmatprep.mubr.msk.bf16.mxu1 %vm5517_vm0, %v5515_v4  ;;  %v5811_v54 = vshrl.u32 %v318_v53, 7  ;;  %v362_v56 = vld [vmem:[%s6388_s5] sm:$0x7]  ;;  %s5518_s2 = smov 96   ;;  %vm1134_vm2 = vcmask 1043456   ;;  %s6415_s26 = sld [smem:[#allocation37_spill]] }
  0xc1   :  { %vm1034_vm3 = vcmask 64512   ;;  %vm1526_vm4 = vcmask 523264   ;;  %vm1529_vm5 = vcmask 785408   ;;  %vm3888_vm6 = vcmask 1041409  }
  0xc2   :  { %v5814_v55 = vsub.s32 0, %v5811_v54  ;;  %v5820_v57 = vsub.s32 1, %v5811_v54 }
  0xc4   :  { %v262_v0 = vld [vmem:[%s6413_s1] sm:$0xff]  ;;  %v263_v1 = vld [vmem:[%s6413_s1 + $0x8] sm:$0xff]  ;;  %v367_v58 = vrot.slane %v362_v56, %v5814_v55  ;;  %v371_v59 = vrot.slane %v362_v56, %v5820_v57 }
  0xc5   :  { %266 = vadd.xlane.f32.xlu0 %v262_v0  ;;  %v4876_v2 = vld [vmem:[%s6414_s25 + $0xac] ss:$12 sps:$4 sm:$0xff]   ;;  %v4878_v3 = vld [vmem:[%s6414_s25 + $0xa8] ss:$12 sps:$4 sm:$0xff]   ;;  %v4879_v5 = vld [vmem:[%s6414_s25 + $0xb0] ss:$12 sps:$4 sm:$0xff]  }
  0xc6   :  { %507 = vmatprep.subr.bf16.mxu0 %v4876_v2  ;;  %4506 = vmatpush3.bf16.msra.mxu1 %v4879_v5  ;;  %v4880_v14 = vld [vmem:[%s6414_s25 + $0x94] ss:$12 sps:$4 sm:$0xff]   ;;  %v4882_v15 = vld [vmem:[%s6414_s25 + $0x90] ss:$12 sps:$4 sm:$0xff]   ;;  %v4883_v16 = vld [vmem:[%s6414_s25 + $0x98] ss:$12 sps:$4 sm:$0xff]  }
  0xc7   :  { %508 = vmatpush1.bf16.msra.mxu0 %v4878_v3  ;;  %4507 = vmatprep.subr.bf16.mxu1 %v5515_v4  ;;  %v4884_v17 = vld [vmem:[%s6414_s25 + $0x7c] ss:$12 sps:$4 sm:$0xff]   ;;  %v4886_v18 = vld [vmem:[%s6414_s25 + $0x78] ss:$12 sps:$4 sm:$0xff]   ;;  %v4887_v19 = vld [vmem:[%s6414_s25 + $0x80] ss:$12 sps:$4 sm:$0xff]  }
  0xc8   :  { %509 = vmatprep.subr.bf16.mxu0 %v4880_v14  ;;  %v4888_v20 = vld [vmem:[%s6414_s25 + $0x64] ss:$12 sps:$4 sm:$0xff]   ;;  %v4890_v21 = vld [vmem:[%s6414_s25 + $0x60] ss:$12 sps:$4 sm:$0xff]   ;;  %v4891_v22 = vld [vmem:[%s6414_s25 + $0x68] ss:$12 sps:$4 sm:$0xff]  }
  0xc9   :  { %268 = vadd.xlane.f32.xlu0 %v263_v1  ;;  %v4892_v23 = vld [vmem:[%s6414_s25 + $0x4c] ss:$12 sps:$4 sm:$0xff]   ;;  %v4894_v24 = vld [vmem:[%s6414_s25 + $0x48] ss:$12 sps:$4 sm:$0xff]   ;;  %v4895_v25 = vld [vmem:[%s6414_s25 + $0x50] ss:$12 sps:$4 sm:$0xff]  }
  0xca   :  { %4508 = vmatpush3.bf16.msra.mxu1 %v4883_v16  ;;  %v4896_v26 = vld [vmem:[%s6414_s25 + $0x34] ss:$12 sps:$4 sm:$0xff]   ;;  %v4898_v28 = vld [vmem:[%s6414_s25 + $0x30] ss:$12 sps:$4 sm:$0xff]   ;;  %v4899_v29 = vld [vmem:[%s6414_s25 + $0x38] ss:$12 sps:$4 sm:$0xff]  }
  0xcb   :  { %510 = vmatpush1.bf16.msra.mxu0 %v4882_v15  ;;  %4509 = vmatprep.subr.bf16.mxu1 %v5515_v4  ;;  %v4900_v30 = vld [vmem:[%s6414_s25 + $0x1c] ss:$12 sps:$4 sm:$0xff]   ;;  %v4902_v31 = vld [vmem:[%s6414_s25 + $0x18] ss:$12 sps:$4 sm:$0xff]   ;;  %v4903_v32 = vld [vmem:[%s6414_s25 + $0x20] ss:$12 sps:$4 sm:$0xff]  }
  0xcc   :  { %511 = vmatprep.subr.bf16.mxu0 %v4884_v17  ;;  %v4904_v33 = vld [vmem:[%s6414_s25 + $0x4] ss:$12 sps:$4 sm:$0xff]   ;;  %v4906_v34 = vld [vmem:[%s6414_s25] ss:$12 sps:$4 sm:$0xff]   ;;  %v4907_v35 = vld [vmem:[%s6414_s25 + $0x8] ss:$12 sps:$4 sm:$0xff]  }
  0xce   :  { %4510 = vmatpush3.bf16.msra.mxu1 %v4887_v19 }
  0xcf   :  { %512 = vmatpush1.bf16.msra.mxu0 %v4886_v18  ;;  %4511 = vmatprep.subr.bf16.mxu1 %v5515_v4 }
  0xd0   :  { %513 = vmatprep.subr.bf16.mxu0 %v4888_v20  ;;  %v374_v20 = vsub.s32 2, %v5811_v54 }
  0xd2   :  { %4512 = vmatpush3.bf16.msra.mxu1 %v4891_v22 }
  0xd3   :  { %514 = vmatpush1.bf16.msra.mxu0 %v4890_v21  ;;  %4513 = vmatprep.subr.bf16.mxu1 %v5515_v4 }
  0xd4   :  { %515 = vmatprep.subr.bf16.mxu0 %v4892_v23 }
  0xd6   :  { %4514 = vmatpush3.bf16.msra.mxu1 %v4895_v25 }
  0xd7   :  { %516 = vmatpush1.bf16.msra.mxu0 %v4894_v24  ;;  %4515 = vmatprep.subr.bf16.mxu1 %v5515_v4  ;;  %v375_v24 = vrot.slane %v362_v56, %v374_v20 }
  0xd8   :  { %517 = vmatprep.subr.bf16.mxu0 %v4896_v26 }
  0xda   :  { %4516 = vmatpush3.bf16.msra.mxu1 %v4899_v29 }
  0xdb   :  { %518 = vmatpush1.bf16.msra.mxu0 %v4898_v28  ;;  %4517 = vmatprep.subr.bf16.mxu1 %v5515_v4 }
  0xdc   :  { %519 = vmatprep.subr.bf16.mxu0 %v4900_v30 }
  0xde   :  { %4518 = vmatpush3.bf16.msra.mxu1 %v4903_v32 }
  0xdf   :  { %520 = vmatpush1.bf16.msra.mxu0 %v4902_v31  ;;  %4519 = vmatprep.subr.bf16.mxu1 %v5515_v4 }
  0xe0   :  { %521 = vmatprep.subr.bf16.mxu0 %v4904_v33 }
  0xe2   :  { %4520 = vmatpush3.bf16.msra.mxu1 %v4907_v35 }
  0xe3   :  { %522 = vmatpush1.bf16.msra.mxu0 %v4906_v34  ;;  %4525 = vmatprep.subr.bf16.mxu1 %v5515_v4 }
  0xe4   :  { %4549 = vmatprep.subr.bf16.mxu0 %v5515_v4 }
 0x14e   :  { %v267_v6 = vpop.xlane.xlu0 %266 }
 0x14f   :  { %v271_v7 = vmul.f32 0.0078125, %v267_v6 }
 0x151   :  { %v5717_v8 = vsub.f32 %v262_v0, %v271_v7 }
 0x152   :  { %v269_v9 = vpop.xlane.xlu0 %268 }
 0x153   :  { %v272_v10 = vmul.f32 0.0078125, %v269_v9  ;;  %v275_v11 = vmul.f32 %v5717_v8, %v5717_v8 }
 0x155   :  { %v5721_v12 = vsub.f32 %v263_v1, %v272_v10  ;;  %277 = vadd.xlane.f32.xlu1 %v275_v11 }
 0x157   :  { %v276_v13 = vmul.f32 %v5721_v12, %v5721_v12 }
 0x159   :  { %279 = vadd.xlane.f32.xlu1 %v276_v13 }
 0x1de   :  { %v278_v36 = vpop.xlane.xlu1 %277 }
 0x1df   :  { %v281_v37 = vmul.f32 0.0078125, %v278_v36 }
 0x1e1   :  { %v283_v38 = vadd.f32 1e-05, %v281_v37 }
 0x1e2   :  { %v280_v39 = vpop.xlane.xlu1 %279 }
 0x1e3   :  { %5052 = vrsqrt.f32 %v283_v38  ;;  %v282_v40 = vmul.f32 0.0078125, %v280_v39 }
 0x1e5   :  { %v284_v41 = vadd.f32 1e-05, %v282_v40 }
 0x1e7   :  { %5054 = vrsqrt.f32 %v284_v41 }
 0x1f0   :  { %v5053_v42 = vpop.eup %5052 }
 0x1f1   :  { %v287_v43 = vmul.f32 %v5053_v42, %v5717_v8  ;;  %v5519_v42 = vmov 1966171168  }
 0x1f3   :  { %v295_v47 = vmul.f32 %v4116_v44, %v287_v43  ;;  %v316_v43 = vunpack.c.l.s4 %v5519_v42 }
 0x1f4   :  { %v5055_v45 = vpop.eup %5054 }
 0x1f5   :  { %v288_v46 = vmul.f32 %v5055_v45, %v5721_v12  ;;  %v5801_v50 = vadd.f32 %v4117_v48, %v295_v47 }
 0x1f7   :  { %v296_v49 = vmul.f32 %v4116_v44, %v288_v46  ;;  %v317_v44 = vunpack.c.0.s8 %v316_v43  ;;  %v4118_v46 = vld.sshfl [vmem:[%s6415_s26] sm:$0x11 pattern:$0x75316420] }
 0x1f9   :  { %v5803_v51 = vadd.f32 %v4117_v48, %v296_v49  ;;  %v320_v45 = vsub.s32 %v317_v44, %v5811_v54  ;;  %v314_v49 = vcombine.high %v4118_v46, %v4118_v46 }
 0x1fb   :  { %v329_v52 = vpack.c.bf16 %v5803_v51, %v5801_v50  ;;  %v321_v47 = vrot.slane %v4118_v46, %v320_v45 }
 0x1fd   :  { %540 = vmatmul.mubr.bf16.vlgmr.msra.gmra.mxu0 %v329_v52  ;;  %4522 = vmatmul.mubr.bf16.vlgmr.msra.gmra.mxu1 %v329_v52  ;;  %v5897_v48 = vrot.slane %v321_v47, %v5814_v55 }
 0x1fe   :  { %4527 = vmatprep.mubr.msk.bf16.mxu1 %vm5517_vm0, %v5515_v4  ;;  %4551 = vmatprep.mubr.msk.bf16.mxu0 %vm5517_vm0, %v5515_v4 }
 0x2bd   :  { %v541_v60 = vpop.f32.mrf.mxu0  ;;  %v584_v61 = vpop.f32.mrf.mxu1 }
 0x2be   :  { %v542_v62 = vadd.f32 %v541_v60, %v367_v58  ;;  %v585_v29 = vadd.f32 %v584_v61, %v375_v24 }
 0x2bf   :  { %v543_v63 = vpop.f32.mrf.mxu0  ;;  %v4523_v0 = vpop.f32.mrf.mxu1 }
 0x2c0   :  { %v591_v1 = vpack.c.bf16 %v542_v62, %v542_v62  ;;  %v544_v2 = vadd.f32 %v543_v63, %v371_v59  ;;  %v5865_v32 = vpack.c.bf16 %v585_v29, %v585_v29 }
 0x2c1   :  { %v545_v3 = vpop.f32.mrf.mxu0  ;;  %v5824_v5 = vpop.f32.mrf.mxu1 }
 0x2c2   :  { %v593_v6 = vpack.c.bf16 %v544_v2, %v544_v2  ;;  %599 = vrot.lane.b32.xlu1 %v591_v1, %s5518_s2  ;;  %v546_v11 = vadd.f32 %v545_v3, %v367_v58  ;;  %v1136_v35 = vsel %vm1134_vm2, %v5865_v32, 0  ;;  %v588_v37 = vadd.f32 %v5824_v5, %v375_v24 }
 0x2c3   :  { %v547_v7 = vpop.f32.mrf.mxu0  ;;  %v4524_v8 = vpop.f32.mrf.mxu1 }
 0x2c4   :  { %v548_v9 = vadd.f32 %v547_v7, %v371_v59  ;;  %613 = vrot.lane.b32.xlu0 %v593_v6, %s5518_s2  ;;  %v644_v10 = vsel %vm639_vm1, %v593_v6, 0  ;;  %v592_v13 = vpack.c.bf16 %v546_v11, %v546_v11  ;;  %v5884_v39 = vpack.c.bf16 %v588_v37, %v588_v37 }
 0x2c5   :  { %4526 = vmatpush3.bf16.xpose.msra.mxu1 %v644_v10  ;;  %v328_v59 = vrot.slane %v314_v49, %v320_v45 }
 0x2c6   :  { %v594_v12 = vpack.c.bf16 %v548_v9, %v548_v9  ;;  %4531 = vmatprep.subr.bf16.mxu1 %v5515_v4  ;;  %v1182_v41 = vsel %vm1134_vm2, %v5884_v39, 0 }
 0x2c7   :  { %v5905_v63 = vrot.slane %v328_v59, %v5814_v55 }
 0x2c8   :  { %617 = vrot.lane.b32.xlu0 %v593_v6, %s5501_s30  ;;  %615 = vrot.lane.b32.xlu1 %v594_v12, %s5518_s2  ;;  %v690_v14 = vsel %vm639_vm1, %v594_v12, 0 }
 0x2cc   :  { %603 = vrot.lane.b32.xlu0 %v591_v1, %s5501_s30  ;;  %601 = vrot.lane.b32.xlu1 %v592_v13, %s5518_s2 }
 0x2cd   :  { %4528 = vmatmul.mubr.msk.bf16.vlgmr.msra.gmra.mxu1 %vm639_vm1, %v591_v1 }
 0x2ce   :  { %4532 = vmatpush3.bf16.xpose.msra.mxu1 %v690_v14  ;;  %4533 = vmatprep.mubr.msk.bf16.mxu1 %vm5517_vm0, %v5515_v4 }
 0x2cf   :  { %4537 = vmatprep.subr.bf16.mxu1 %v5515_v4 }
 0x2d0   :  { %621 = vrot.lane.b32.xlu0 %v593_v6, %s5509_s0  ;;  %619 = vrot.lane.b32.xlu1 %v594_v12, %s5501_s30 }
 0x2d4   :  { %607 = vrot.lane.b32.xlu0 %v591_v1, %s5509_s0  ;;  %605 = vrot.lane.b32.xlu1 %v592_v13, %s5501_s30 }
 0x2d5   :  { %4534 = vmatmul.mubr.msk.bf16.vlgmr.msra.gmra.mxu1 %vm639_vm1, %v592_v13 }
 0x2d6   :  { %4539 = vmatprep.mubr.msk.bf16.mxu1 %vm5517_vm0, %v5515_v4 }
 0x2d8   :  { %623 = vrot.lane.b32.xlu1 %v594_v12, %s5509_s0 }
 0x2dc   :  { %609 = vrot.lane.b32.xlu1 %v592_v13, %s5509_s0 }
 0x334   :  { %v600_v15 = vpop.permute.xlu1 %599 }
 0x336   :  { %v614_v16 = vpop.permute.xlu0 %613 }
 0x337   :  { %v736_v17 = vsel %vm639_vm1, %v614_v16, 0 }
 0x338   :  { %4538 = vmatpush3.bf16.xpose.msra.mxu1 %v736_v17 }
 0x339   :  { %4543 = vmatprep.subr.bf16.mxu1 %v5515_v4 }
 0x33a   :  { %v618_v18 = vpop.permute.xlu0 %617  ;;  %v616_v19 = vpop.permute.xlu1 %615 }
 0x33b   :  { %v828_v21 = vsel %vm639_vm1, %v618_v18, 0  ;;  %v782_v25 = vsel %vm639_vm1, %v616_v19, 0 }
 0x33c   :  { %4550 = vmatpush3.bf16.xpose.msra.mxu0 %v828_v21 }
 0x33d   :  { %4561 = vmatprep.subr.bf16.mxu0 %v5515_v4 }
 0x33e   :  { %v604_v22 = vpop.permute.xlu0 %603  ;;  %v602_v23 = vpop.permute.xlu1 %601 }
 0x33f   :  { %4540 = vmatmul.mubr.msk.bf16.vlgmr.msra.gmra.mxu1 %vm639_vm1, %v600_v15 }
 0x340   :  { %4544 = vmatpush3.bf16.xpose.msra.mxu1 %v782_v25  ;;  %4545 = vmatprep.mubr.msk.bf16.mxu1 %vm5517_vm0, %v5515_v4 }
 0x341   :  { %4555 = vmatprep.subr.bf16.mxu1 %v5515_v4 }
 0x342   :  { %v622_v26 = vpop.permute.xlu0 %621  ;;  %v620_v28 = vpop.permute.xlu1 %619 }
 0x343   :  { %v920_v30 = vsel %vm639_vm1, %v622_v26, 0  ;;  %4552 = vmatmul.mubr.msk.bf16.vlgmr.msra.gmra.mxu0 %vm639_vm1, %v604_v22  ;;  %v874_v33 = vsel %vm639_vm1, %v620_v28, 0 }
 0x344   :  { %4562 = vmatpush3.bf16.xpose.msra.mxu0 %v920_v30  ;;  %4563 = vmatprep.mubr.msk.bf16.mxu0 %vm5517_vm0, %v5515_v4 }
 0x345   :  { %4573 = vmatprep.subr.bf16.mxu0 %v5515_v4 }
 0x346   :  { %v606_v31 = vpop.permute.xlu1 %605  ;;  %v608_v34 = vpop.permute.xlu0 %607 }
 0x347   :  { %4546 = vmatmul.mubr.msk.bf16.vlgmr.msra.gmra.mxu1 %vm639_vm1, %v602_v23 }
 0x348   :  { %4556 = vmatpush3.bf16.xpose.msra.mxu1 %v874_v33  ;;  %4557 = vmatprep.mubr.msk.bf16.mxu1 %vm5517_vm0, %v5515_v4 }
 0x349   :  { %4567 = vmatprep.subr.bf16.mxu1 %v5515_v4 }
 0x34a   :  { %v624_v36 = vpop.permute.xlu1 %623 }
 0x34b   :  { %4564 = vmatmul.mubr.msk.bf16.vlgmr.msra.gmra.mxu0 %vm639_vm1, %v608_v34  ;;  %v966_v38 = vsel %vm639_vm1, %v624_v36, 0 }
 0x34c   :  { %4574 = vmatpush3.bf16.msra.mxu0 %v1136_v35  ;;  %4575 = vmatprep.mubr.msk.bf16.mxu0 %vm5517_vm0, %v5515_v4 }
 0x34d   :  { %4585 = vmatprep.subr.bf16.mxu0 %v5515_v4 }
 0x34e   :  { %v610_v40 = vpop.permute.xlu1 %609 }
 0x34f   :  { %4558 = vmatmul.mubr.msk.bf16.vlgmr.msra.gmra.mxu1 %vm639_vm1, %v606_v31 }
 0x350   :  { %4568 = vmatpush3.bf16.xpose.msra.mxu1 %v966_v38  ;;  %4569 = vmatprep.mubr.msk.bf16.mxu1 %vm5517_vm0, %v5515_v4 }
 0x351   :  { %4579 = vmatprep.subr.bf16.mxu1 %v5515_v4 }
 0x357   :  { %4570 = vmatmul.mubr.msk.bf16.vlgmr.msra.gmra.mxu1 %vm639_vm1, %v610_v40 }
 0x358   :  { %4580 = vmatpush3.bf16.msra.mxu1 %v1182_v41  ;;  %4581 = vmatprep.mubr.msk.bf16.mxu1 %vm5517_vm0, %v5515_v4 }
 0x359   :  { %4591 = vmatprep.subr.bf16.mxu1 %v5515_v4 }
 0x38d   :  { %v680_v52 = vpop.f32.mrf.mxu1 }
 0x38e   :  { %v1008_v53 = vmul.f32 0.17677669, %v680_v52 }
 0x38f   :  { %v4529_v56 = vpop.f32.mrf.mxu1 }
 0x390   :  { %v5900_v58 = vadd.f32 %v5897_v48, %v1008_v53 }
 0x391   :  { %v683_v60 = vpop.f32.mrf.mxu1 }
 0x392   :  { %v1035_v61 = vsel %vm1034_vm3, %v5900_v58, -inf }
 0x393   :  { %1036 = vmax.xlane.f32.xlu0 %v1035_v61  ;;  %v4530_v62 = vpop.f32.mrf.mxu1 }
 0x395   :  { %v726_v0 = vpop.f32.mrf.mxu1 }
 0x396   :  { %v1009_v1 = vmul.f32 0.17677669, %v726_v0 }
 0x397   :  { %v4535_v2 = vpop.f32.mrf.mxu1 }
 0x398   :  { %v1027_v3 = vadd.f32 %v5905_v63, %v1009_v1 }
 0x399   :  { %v729_v5 = vpop.f32.mrf.mxu1 }
 0x39a   :  { %v1038_v6 = vsel %vm1034_vm3, %v1027_v3, -inf }
 0x39b   :  { %1039 = vmax.xlane.f32.xlu1 %v1038_v6  ;;  %v4536_v7 = vpop.f32.mrf.mxu1 }
 0x3ff   :  { %v772_v8 = vpop.f32.mrf.mxu1 }
 0x400   :  { %v1010_v9 = vmul.f32 0.17677669, %v772_v8 }
 0x401   :  { %v4541_v10 = vpop.f32.mrf.mxu1 }
 0x402   :  { %v5910_v11 = vadd.f32 %v5897_v48, %v1010_v9 }
 0x403   :  { %v775_v12 = vpop.f32.mrf.mxu1  ;;  %v864_v13 = vpop.f32.mrf.mxu0 }
 0x404   :  { %v1041_v14 = vsel %vm1034_vm3, %v5910_v11, -inf  ;;  %v1012_v19 = vmul.f32 0.17677669, %v864_v13 }
 0x405   :  { %v4553_v15 = vpop.f32.mrf.mxu0  ;;  %1042 = vmax.xlane.f32.xlu0 %v1041_v14  ;;  %v4542_v16 = vpop.f32.mrf.mxu1 }
 0x406   :  { %v5917_v30 = vadd.f32 %v5897_v48, %v1012_v19 }
 0x407   :  { %v818_v17 = vpop.f32.mrf.mxu1  ;;  %v867_v18 = vpop.f32.mrf.mxu0 }
 0x408   :  { %v1011_v21 = vmul.f32 0.17677669, %v818_v17  ;;  %v1047_v37 = vsel %vm1034_vm3, %v5917_v30, -inf }
 0x409   :  { %v4547_v22 = vpop.f32.mrf.mxu1  ;;  %v4554_v23 = vpop.f32.mrf.mxu0 }
 0x40a   :  { %v1029_v24 = vadd.f32 %v5905_v63, %v1011_v21 }
 0x40b   :  { %v821_v25 = vpop.f32.mrf.mxu1  ;;  %v956_v26 = vpop.f32.mrf.mxu0 }
 0x40c   :  { %v1014_v28 = vmul.f32 0.17677669, %v956_v26  ;;  %v1044_v29 = vsel %vm1034_vm3, %v1029_v24, -inf }
 0x40d   :  { %v4565_v31 = vpop.f32.mrf.mxu0  ;;  %1045 = vmax.xlane.f32.xlu0 %v1044_v29  ;;  %v4548_v33 = vpop.f32.mrf.mxu1 }
 0x40e   :  { %v5922_v38 = vadd.f32 %v5897_v48, %v1014_v28 }
 0x40f   :  { %v910_v34 = vpop.f32.mrf.mxu1  ;;  %v959_v35 = vpop.f32.mrf.mxu0 }
 0x410   :  { %v1013_v36 = vmul.f32 0.17677669, %v910_v34  ;;  %v1053_v44 = vsel %vm1034_vm3, %v5922_v38, -inf }
 0x411   :  { %v4566_v40 = vpop.f32.mrf.mxu0  ;;  %1048 = vmax.xlane.f32.xlu0 %v1047_v37  ;;  %v4559_v41 = vpop.f32.mrf.mxu1 }
 0x412   :  { %v1031_v42 = vadd.f32 %v5905_v63, %v1013_v36 }
 0x413   :  { %v913_v43 = vpop.f32.mrf.mxu1 }
 0x414   :  { %v1050_v45 = vsel %vm1034_vm3, %v1031_v42, -inf }
 0x415   :  { %1054 = vmax.xlane.f32.xlu0 %v1053_v44  ;;  %1051 = vmax.xlane.f32.xlu1 %v1050_v45  ;;  %v4560_v46 = vpop.f32.mrf.mxu1 }
 0x417   :  { %v1002_v47 = vpop.f32.mrf.mxu1 }
 0x418   :  { %v1015_v49 = vmul.f32 0.17677669, %v1002_v47 }
 0x419   :  { %v4571_v52 = vpop.f32.mrf.mxu1 }
 0x41a   :  { %v1033_v53 = vadd.f32 %v5905_v63, %v1015_v49 }
 0x41b   :  { %v1005_v56 = vpop.f32.mrf.mxu1 }
 0x41c   :  { %v1037_v59 = vpop.xlane.xlu0 %1036  ;;  %v1056_v60 = vsel %vm1034_vm3, %v1033_v53, -inf }
 0x41d   :  { %v1059_v61 = vsub.f32 %v5900_v58, %v1037_v59  ;;  %1057 = vmax.xlane.f32.xlu1 %v1056_v60  ;;  %v4572_v62 = vpop.f32.mrf.mxu1 }
 0x41f   :  { %v1067_v0 = vmul.f32 1.442695, %v1059_v61 }
 0x421   :  { %5056 = vpow2.f32 %v1067_v0 }
 0x424   :  { %v1040_v1 = vpop.xlane.xlu1 %1039 }
 0x425   :  { %v1060_v2 = vsub.f32 %v1027_v3, %v1040_v1 }
 0x427   :  { %v1069_v5 = vmul.f32 1.442695, %v1060_v2 }
 0x429   :  { %5058 = vpow2.f32 %v1069_v5 }
 0x42e   :  { %v5057_v6 = vpop.eup %5056 }
 0x42f   :  { %v1083_v7 = vsel %vm1034_vm3, %v5057_v6, 0.0 }
 0x430   :  { %1084 = vadd.xlane.f32.xlu0 %v1083_v7 }
 0x436   :  { %v5059_v8 = vpop.eup %5058 }
 0x437   :  { %v1086_v9 = vsel %vm1034_vm3, %v5059_v8, 0.0 }
 0x438   :  { %1087 = vadd.xlane.f32.xlu1 %v1086_v9 }
 0x449   :  { %629 = vrot.lane.b32.xlu1 %v5884_v39, %s5518_s2 }
 0x44d   :  { %631 = vrot.lane.b32.xlu1 %v5865_v32, %s5501_s30 }
 0x451   :  { %633 = vrot.lane.b32.xlu1 %v5884_v39, %s5501_s30 }
 0x48e   :  { %v1043_v58 = vpop.xlane.xlu0 %1042 }
 0x48f   :  { %v1061_v3 = vsub.f32 %v5910_v11, %v1043_v58 }
 0x491   :  { %v1071_v10 = vmul.f32 1.442695, %v1061_v3 }
 0x493   :  { %5060 = vpow2.f32 %v1071_v10 }
 0x496   :  { %v1046_v12 = vpop.xlane.xlu0 %1045 }
 0x497   :  { %v1062_v13 = vsub.f32 %v1029_v24, %v1046_v12 }
 0x499   :  { %v1073_v14 = vmul.f32 1.442695, %v1062_v13 }
 0x49a   :  { %v1049_v25 = vpop.xlane.xlu0 %1048 }
 0x49b   :  { %5062 = vpow2.f32 %v1073_v14  ;;  %v1063_v35 = vsub.f32 %v5917_v30, %v1049_v25 }
 0x49d   :  { %v1075_v37 = vmul.f32 1.442695, %v1063_v35 }
 0x49e   :  { %v1052_v15 = vpop.xlane.xlu1 %1051  ;;  %v1055_v29 = vpop.xlane.xlu0 %1054 }
 0x49f   :  { %v1064_v16 = vsub.f32 %v1031_v42, %v1052_v15  ;;  %v1065_v40 = vsub.f32 %v5922_v38, %v1055_v29 }
 0x4a0   :  { %v5940_v17 = vpop.eup %5060 }
 0x4a1   :  { %v1077_v18 = vmul.f32 1.442695, %v1064_v16  ;;  %v1089_v19 = vsel %vm1034_vm3, %v5940_v17, 0.0  ;;  %v1079_v41 = vmul.f32 1.442695, %v1065_v40 }
 0x4a2   :  { %1090 = vadd.xlane.f32.xlu0 %v1089_v19 }
 0x4a3   :  { %5064 = vpow2.f32 %v1077_v18 }
 0x4a6   :  { %v1058_v21 = vpop.xlane.xlu1 %1057 }
 0x4a7   :  { %v1066_v22 = vsub.f32 %v1033_v53, %v1058_v21 }
 0x4a8   :  { %v5944_v23 = vpop.eup %5062 }
 0x4a9   :  { %v1081_v11 = vmul.f32 1.442695, %v1066_v22  ;;  %v1092_v24 = vsel %vm1034_vm3, %v5944_v23, 0.0 }
 0x4aa   :  { %1093 = vadd.xlane.f32.xlu1 %v1092_v24 }
 0x4ab   :  { %5066 = vpow2.f32 %v1081_v11 }
 0x4b0   :  { %v5948_v26 = vpop.eup %5064 }
 0x4b1   :  { %v1098_v28 = vsel %vm1034_vm3, %v5948_v26, 0.0 }
 0x4b2   :  { %1099 = vadd.xlane.f32.xlu1 %v1098_v28 }
 0x4b8   :  { %v5952_v31 = vpop.eup %5066  ;;  %627 = vrot.lane.b32.xlu0 %v5865_v32, %s5518_s2 }
 0x4b9   :  { %v1085_v33 = vpop.xlane.xlu0 %1084  ;;  %v1104_v34 = vsel %vm1034_vm3, %v5952_v31, 0.0 }
 0x4ba   :  { %5068 = vrcp.f32 %v1085_v33  ;;  %1105 = vadd.xlane.f32.xlu1 %v1104_v34 }
 0x4c1   :  { %v1088_v36 = vpop.xlane.xlu1 %1087 }
 0x4c2   :  { %5070 = vrcp.f32 %v1088_v36 }
 0x4c3   :  { %5072 = vpow2.f32 %v1075_v37 }
 0x4c4   :  { %5074 = vpow2.f32 %v1079_v41 }
 0x4c5   :  { %v630_v46 = vpop.permute.xlu1 %629 }
 0x4c6   :  { %v1274_v49 = vsel %vm1134_vm2, %v630_v46, 0 }
 0x4c7   :  { %v5069_v42 = vpop.eup %5068 }
 0x4c8   :  { %v1115_v43 = vmul.f32 %v5069_v42, %v5057_v6 }
 0x4c9   :  { %v632_v56 = vpop.permute.xlu1 %631 }
 0x4ca   :  { %v1123_v44 = vpack.c.bf16 %v1115_v43, %v1115_v43  ;;  %v4908_v43 = vld [vmem:[#allocation7 + $0x38] sm:$0xff]  }
 0x4cb   :  { %637 = vrot.lane.b32.xlu1 %v5884_v39, %s5509_s0 }
 0x4cc   :  { %4576 = vmatmul.mubr.msk.bf16.vlgmr.msra.gmra.mxu0 %vm1034_vm3, %v1123_v44 }
 0x4cd   :  { %4587 = vmatprep.mubr.msk.bf16.mxu0 %vm5517_vm0, %v5515_v4  ;;  %v634_v60 = vpop.permute.xlu1 %633 }
 0x4ce   :  { %v1366_v3 = vsel %vm1134_vm2, %v634_v60, 0 }
 0x4cf   :  { %v5071_v30 = vpop.eup %5070 }
 0x4d0   :  { %v1116_v45 = vmul.f32 %v5071_v30, %v5059_v8  ;;  %v5073_v38 = vpop.eup %5072  ;;  %v4909_v30 = vld [vmem:[#allocation7 + $0x30] sm:$0xff]  }
 0x4d1   :  { %v1095_v39 = vsel %vm1034_vm3, %v5073_v38, 0.0  ;;  %v5075_v52 = vpop.eup %5074 }
 0x4d2   :  { %v1124_v47 = vpack.c.bf16 %v1116_v45, %v1116_v45  ;;  %v1101_v53 = vsel %vm1034_vm3, %v5075_v52, 0.0 }
 0x4d4   :  { %4582 = vmatmul.mubr.msk.bf16.vlgmr.msra.gmra.mxu1 %vm1034_vm3, %v1124_v47  ;;  %v4910_v47 = vld [vmem:[#allocation7 + $0x28] sm:$0xff]  }
 0x4d5   :  { %4592 = vmatpush3.bf16.msra.mxu1 %v1274_v49  ;;  %4593 = vmatprep.mubr.msk.bf16.mxu1 %vm5517_vm0, %v5515_v4 }
 0x4d6   :  { %4603 = vmatprep.subr.bf16.mxu1 %v5515_v4 }
 0x4d7   :  { %1096 = vadd.xlane.f32.xlu0 %v1095_v39 }
 0x4db   :  { %1102 = vadd.xlane.f32.xlu0 %v1101_v53 }
 0x4f1   :  { %635 = vrot.lane.b32.xlu0 %v5865_v32, %s5509_s0  ;;  %v1320_v32 = vsel %vm1134_vm2, %v632_v56, 0 }
 0x52b   :  { %v1091_v59 = vpop.xlane.xlu0 %1090 }
 0x52c   :  { %5076 = vrcp.f32 %v1091_v59  ;;  %v4912_v59 = vld [vmem:[#allocation7 + $0x18] sm:$0xff]  }
 0x52f   :  { %v628_v61 = vpop.permute.xlu0 %627 }
 0x530   :  { %v1228_v62 = vsel %vm1134_vm2, %v628_v61, 0 }
 0x531   :  { %4586 = vmatpush3.bf16.msra.mxu0 %v1228_v62 }
 0x532   :  { %4597 = vmatprep.subr.bf16.mxu0 %v5515_v4 }
 0x533   :  { %v1094_v0 = vpop.xlane.xlu1 %1093 }
 0x534   :  { %5078 = vrcp.f32 %v1094_v0 }
 0x539   :  { %v5077_v1 = vpop.eup %5076 }
 0x53a   :  { %v1117_v2 = vmul.f32 %v5077_v1, %v5940_v17 }
 0x53b   :  { %v1100_v5 = vpop.xlane.xlu1 %1099 }
 0x53c   :  { %v1125_v6 = vpack.c.bf16 %v1117_v2, %v1117_v2  ;;  %5080 = vrcp.f32 %v1100_v5 }
 0x53e   :  { %4588 = vmatmul.mubr.msk.bf16.vlgmr.msra.gmra.mxu0 %vm1034_vm3, %v1125_v6 }
 0x53f   :  { %4598 = vmatpush3.bf16.msra.mxu0 %v1320_v32  ;;  %4599 = vmatprep.mubr.msk.bf16.mxu0 %vm5517_vm0, %v5515_v4  ;;  %v4913_v32 = vld [vmem:[#allocation7 + $0x10] sm:$0xff]  }
 0x540   :  { %4609 = vmatprep.subr.bf16.mxu0 %v5515_v4 }
 0x541   :  { %v5079_v7 = vpop.eup %5078 }
 0x542   :  { %v1118_v8 = vmul.f32 %v5079_v7, %v5944_v23  ;;  %v4914_v7 = vld [vmem:[#allocation7 + $0x8] sm:$0xff]  }
 0x543   :  { %v1106_v9 = vpop.xlane.xlu1 %1105 }
 0x544   :  { %5082 = vrcp.f32 %v1106_v9  ;;  %v1126_v58 = vpack.c.bf16 %v1118_v8, %v1118_v8  ;;  %v4915_v9 = vld [vmem:[#allocation7] sm:$0xff]  }
 0x546   :  { %4594 = vmatmul.mubr.msk.bf16.vlgmr.msra.gmra.mxu1 %vm1034_vm3, %v1126_v58 }
 0x547   :  { %4604 = vmatpush3.bf16.msra.mxu1 %v1366_v3  ;;  %4605 = vmatprep.mubr.msk.bf16.mxu1 %vm5517_vm0, %v5515_v4  ;;  %v638_v13 = vpop.permute.xlu1 %637 }
 0x548   :  { %4615 = vmatprep.subr.bf16.mxu1 %v5515_v4  ;;  %v1458_v15 = vsel %vm1134_vm2, %v638_v13, 0 }
 0x549   :  { %v5081_v10 = vpop.eup %5080 }
 0x54a   :  { %v1120_v12 = vmul.f32 %v5081_v10, %v5948_v26 }
 0x54c   :  { %v1128_v14 = vpack.c.bf16 %v1120_v12, %v1120_v12 }
 0x54e   :  { %4606 = vmatmul.mubr.msk.bf16.vlgmr.msra.gmra.mxu1 %vm1034_vm3, %v1128_v14 }
 0x54f   :  { %4616 = vmatpush3.bf16.msra.mxu1 %v1458_v15  ;;  %4617 = vmatprep.mubr.msk.bf16.mxu1 %vm5517_vm0, %v5515_v4 }
 0x551   :  { %v5083_v16 = vpop.eup %5082 }
 0x552   :  { %v1122_v17 = vmul.f32 %v5083_v16, %v5952_v31 }
 0x554   :  { %v1130_v18 = vpack.c.bf16 %v1122_v17, %v1122_v17 }
 0x556   :  { %4618 = vmatmul.mubr.msk.bf16.vlgmr.msra.gmra.mxu1 %vm1034_vm3, %v1130_v18 }
 0x557   :  { %1828 = vmatprep.mubr.bf16.mxu1 %v5516_v27 }
 0x560   :  { %v1097_v19 = vpop.xlane.xlu0 %1096 }
 0x561   :  { %5084 = vrcp.f32 %v1097_v19 }
 0x564   :  { %v1103_v21 = vpop.xlane.xlu0 %1102 }
 0x565   :  { %5086 = vrcp.f32 %v1103_v21 }
 0x568   :  { %v636_v11 = vpop.permute.xlu0 %635 }
 0x569   :  { %v1412_v26 = vsel %vm1134_vm2, %v636_v11, 0 }
 0x56e   :  { %v5085_v22 = vpop.eup %5084 }
 0x56f   :  { %v1119_v23 = vmul.f32 %v5085_v22, %v5073_v38 }
 0x571   :  { %v1127_v24 = vpack.c.bf16 %v1119_v23, %v1119_v23 }
 0x572   :  { %v5087_v25 = vpop.eup %5086 }
 0x573   :  { %4600 = vmatmul.mubr.msk.bf16.vlgmr.msra.gmra.mxu0 %vm1034_vm3, %v1127_v24  ;;  %v1121_v28 = vmul.f32 %v5087_v25, %v5075_v52  ;;  %v4911_v52 = vld [vmem:[#allocation7 + $0x20] sm:$0xff]  }
 0x574   :  { %4610 = vmatpush3.bf16.msra.mxu0 %v1412_v26  ;;  %4611 = vmatprep.mubr.msk.bf16.mxu0 %vm5517_vm0, %v5515_v4 }
 0x575   :  { %4621 = vmatprep.subr.bf16.mxu0 %v5515_v4  ;;  %v1129_v29 = vpack.c.bf16 %v1121_v28, %v1121_v28 }
 0x57b   :  { %4612 = vmatmul.mubr.msk.bf16.vlgmr.msra.gmra.mxu0 %vm1034_vm3, %v1129_v29 }
 0x57c   :  { %4637 = vmatprep.mubr.msk.bf16.mxu0 %vm5517_vm0, %v5515_v4  ;;  %4622 = vmatpush3.bf16.msra.mxu0 %v4908_v43 }
 0x57d   :  { %4623 = vmatprep.subr.bf16.mxu0 %v5515_v4 }
 0x580   :  { %4624 = vmatpush3.bf16.msra.mxu0 %v4909_v30 }
 0x581   :  { %4625 = vmatprep.subr.bf16.mxu0 %v5515_v4 }
 0x584   :  { %4626 = vmatpush3.bf16.msra.mxu0 %v4910_v47  ;;  %v4916_v47 = vld [vmem:[#allocation11 + $0x70] ss:$8 sps:$4 sm:$0xff]  }
 0x585   :  { %4627 = vmatprep.subr.bf16.mxu0 %v5515_v4 }
 0x588   :  { %4628 = vmatpush3.bf16.msra.mxu0 %v4911_v52 }
 0x589   :  { %4629 = vmatprep.subr.bf16.mxu0 %v5515_v4 }
 0x58c   :  { %v6004_v31 = vpop.f32.mrf.mxu0  ;;  %4630 = vmatpush3.bf16.msra.mxu0 %v4912_v59 }
 0x58d   :  { %4631 = vmatprep.subr.bf16.mxu0 %v5515_v4 }
 0x58e   :  { %v4577_v33 = vpop.f32.mrf.mxu0 }
 0x590   :  { %v1175_v34 = vpop.f32.mrf.mxu0  ;;  %4632 = vmatpush3.bf16.msra.mxu0 %v4913_v32  ;;  %v4933_v32 = vld [vmem:[#allocation11 + $0x24] ss:$8 sps:$4 sm:$0xff]  }
 0x591   :  { %4633 = vmatprep.subr.bf16.mxu0 %v5515_v4 }
 0x592   :  { %v4578_v35 = vpop.f32.mrf.mxu0 }
 0x594   :  { %v6006_v36 = vpop.f32.mrf.mxu1  ;;  %4634 = vmatpush3.bf16.msra.mxu0 %v4914_v7  ;;  %v4931_v7 = vld [vmem:[#allocation11 + $0x20] ss:$8 sps:$4 sm:$0xff]  }
 0x595   :  { %4635 = vmatprep.subr.bf16.mxu0 %v5515_v4 }
 0x596   :  { %v4583_v37 = vpop.f32.mrf.mxu1 }
 0x598   :  { %v1221_v40 = vpop.f32.mrf.mxu1  ;;  %4636 = vmatpush3.bf16.msra.mxu0 %v4915_v9  ;;  %v4934_v9 = vld [vmem:[#allocation11 + $0x10] ss:$8 sps:$4 sm:$0xff]  }
 0x59a   :  { %v4584_v41 = vpop.f32.mrf.mxu1 }
 0x59b   :  { %v4159_v41 = vld [vmem:[%s6390_s7] ss:$0 sm:$0xff] }
 0x5fe   :  { %v1264_v42 = vpop.f32.mrf.mxu0 }
 0x600   :  { %v4589_v44 = vpop.f32.mrf.mxu0 }
 0x602   :  { %v1267_v45 = vpop.f32.mrf.mxu0 }
 0x604   :  { %v4590_v46 = vpop.f32.mrf.mxu0 }
 0x606   :  { %v1310_v38 = vpop.f32.mrf.mxu1 }
 0x607   :  { %v4846_v49 = vpack.i.bf16 %v1310_v38, %v1264_v42  ;;  %v4918_v38 = vld [vmem:[#allocation11 + $0x74] ss:$8 sps:$4 sm:$0xff]  }
 0x608   :  { %v4595_v39 = vpop.f32.mrf.mxu1  ;;  %1796 = vmatprep.subr.bf16.mxu1 %v4918_v38  ;;  %v1704_v38 = vld [vmem:[#allocation13] sm:$0x3] }
 0x609   :  { %4847 = vrot.lane.b32.xlu0 %v4846_v49, %s5509_s0  ;;  %1797 = vmatpush1.bf16.msra.mxu1 %v4916_v47  ;;  %v4955_v47 = vld [vmem:[#allocation14] sm:$0xff]  }
 0x60a   :  { %v1313_v53 = vpop.f32.mrf.mxu1 }
 0x60c   :  { %v4596_v56 = vpop.f32.mrf.mxu1 }
 0x60e   :  { %v1402_v60 = vpop.f32.mrf.mxu1 }
 0x610   :  { %v4607_v61 = vpop.f32.mrf.mxu1 }
 0x611   :  { %v4921_v61 = vld [vmem:[#allocation11 + $0x64] ss:$8 sps:$4 sm:$0xff]  }
 0x612   :  { %v1405_v62 = vpop.f32.mrf.mxu1  ;;  %1798 = vmatprep.subr.bf16.mxu1 %v4921_v61 }
 0x613   :  { %v4919_v62 = vld [vmem:[#allocation11 + $0x60] ss:$8 sps:$4 sm:$0xff]  }
 0x614   :  { %v4608_v0 = vpop.f32.mrf.mxu1  ;;  %1799 = vmatpush1.bf16.msra.mxu1 %v4919_v62 }
 0x615   :  { %v4922_v0 = vld [vmem:[#allocation11 + $0x50] ss:$8 sps:$4 sm:$0xff]  }
 0x616   :  { %v1494_v1 = vpop.f32.mrf.mxu1 }
 0x618   :  { %v4619_v2 = vpop.f32.mrf.mxu1 }
 0x619   :  { %v4925_v2 = vld [vmem:[#allocation11 + $0x40] ss:$8 sps:$4 sm:$0xff]  }
 0x61a   :  { %v1497_v5 = vpop.f32.mrf.mxu1 }
 0x61b   :  { %v4930_v5 = vld [vmem:[#allocation11 + $0x34] ss:$8 sps:$4 sm:$0xff]  }
 0x61c   :  { %v4620_v6 = vpop.f32.mrf.mxu1 }
 0x61d   :  { %v4928_v6 = vld [vmem:[#allocation11 + $0x30] ss:$8 sps:$4 sm:$0xff]  }
 0x633   :  { %v1356_v8 = vpop.f32.mrf.mxu0 }
 0x634   :  { %v4851_v58 = vpack.i.bf16 %v1402_v60, %v1356_v8  ;;  %v4936_v8 = vld [vmem:[#allocation11 + $0x14] ss:$8 sps:$4 sm:$0xff]  }
 0x635   :  { %v4601_v3 = vpop.f32.mrf.mxu0 }
 0x636   :  { %4852 = vrot.lane.b32.xlu1 %v4851_v58, %s5501_s30  ;;  %v4939_v58 = vld [vmem:[#allocation11 + $0x4] ss:$8 sps:$4 sm:$0xff]   ;;  %v4937_v3 = vld [vmem:[#allocation11] ss:$8 sps:$4 sm:$0xff]  }
 0x637   :  { %v1359_v10 = vpop.f32.mrf.mxu0 }
 0x639   :  { %v4602_v12 = vpop.f32.mrf.mxu0 }
 0x63b   :  { %v1448_v13 = vpop.f32.mrf.mxu0 }
 0x63c   :  { %v4856_v14 = vpack.i.bf16 %v1494_v1, %v1448_v13  ;;  %v4927_v1 = vld [vmem:[#allocation11 + $0x44] ss:$8 sps:$4 sm:$0xff]  }
 0x63d   :  { %v4613_v15 = vpop.f32.mrf.mxu0 }
 0x63e   :  { %4857 = vrot.lane.b32.xlu0 %v4856_v14, %s5518_s2 }
 0x63f   :  { %v1451_v16 = vpop.f32.mrf.mxu0 }
 0x641   :  { %v4614_v17 = vpop.f32.mrf.mxu0 }
 0x67b   :  { %v4848_v18 = vpop.permute.xlu0 %4847 }
 0x67c   :  { %v4850_v21 = vunpack.i.h.bf16 %v4848_v18  ;;  %v4849_v22 = vunpack.i.l.bf16 %v4848_v18 }
 0x67e   :  { %v1525_v25 = vsel %vm639_vm1, %v6006_v36, %v4850_v21  ;;  %v1524_v26 = vsel %vm639_vm1, %v6004_v31, %v4849_v22 }
 0x6a8   :  { %v4853_v19 = vpop.permute.xlu1 %4852 }
 0x6a9   :  { %v4855_v23 = vunpack.i.h.bf16 %v4853_v19  ;;  %v4854_v11 = vunpack.i.l.bf16 %v4853_v19  ;;  %v4168_v19 = vld [vmem:[#allocation8] ss:$0 sm:$0xff] }
 0x6ab   :  { %v1528_v33 = vsel %vm1526_vm4, %v1525_v25, %v4855_v23  ;;  %v1527_v34 = vsel %vm1526_vm4, %v1524_v26, %v4854_v11  ;;  %v4169_v11 = vld [vmem:[#allocation10] ss:$0 sm:$0xff] }
 0x6b0   :  { %v4858_v24 = vpop.permute.xlu0 %4857 }
 0x6b1   :  { %v4860_v28 = vunpack.i.h.bf16 %v4858_v24  ;;  %v4859_v29 = vunpack.i.l.bf16 %v4858_v24 }
 0x6b3   :  { %v1531_v35 = vsel %vm1529_vm5, %v1528_v33, %v4860_v28  ;;  %v1530_v37 = vsel %vm1529_vm5, %v1527_v34, %v4859_v29  ;;  %v4940_v29 = vld [vmem:[#allocation14 + $0x78] sm:$0xff]   ;;  %v4942_v34 = vld [vmem:[#allocation14 + $0x70] sm:$0xff]  }
 0x6b4   :  { %v1532_v40 = vpack.c.bf16 %v1531_v35, %v1530_v37  ;;  %v4941_v33 = vld [vmem:[#allocation14 + $0x38] sm:$0xff]   ;;  %4393 = vmatprep.subr.bf16.mxu0 %v4940_v29  ;;  %v4943_v35 = vld [vmem:[#allocation14 + $0x30] sm:$0xff]   ;;  %v4944_v37 = vld [vmem:[#allocation14 + $0x68] sm:$0xff]  }
 0x6b6   :  { %4638 = vmatmul.mubr.bf16.vlgmr.msra.gmra.mxu0 %v1532_v40  ;;  %v4945_v40 = vld [vmem:[#allocation14 + $0x28] sm:$0xff]  }
 0x6b7   :  { %4394 = vmatpush3.bf16.msra.mxu0 %v4941_v33 }
 0x6b8   :  { %4395 = vmatprep.subr.bf16.mxu0 %v4942_v34 }
 0x6bb   :  { %4396 = vmatpush3.bf16.msra.mxu0 %v4943_v35 }
 0x6bc   :  { %4397 = vmatprep.subr.bf16.mxu0 %v4944_v37 }
 0x6bf   :  { %4398 = vmatpush3.bf16.msra.mxu0 %v4945_v40 }
 0x776   :  { %v1638_v36 = vpop.f32.mrf.mxu0 }
 0x777   :  { %v1639_v42 = vadd.f32 %v4159_v41, %v1638_v36  ;;  %v4947_v36 = vld [vmem:[#allocation14 + $0x20] sm:$0xff]  }
 0x778   :  { %v4639_v43 = vpop.f32.mrf.mxu0 }
 0x779   :  { %v1645_v31 = vadd.f32 %v1639_v42, %v5801_v50  ;;  %v4948_v42 = vld [vmem:[#allocation14 + $0x58] sm:$0xff]  }
 0x77a   :  { %v1641_v44 = vpop.f32.mrf.mxu0  ;;  %v4949_v43 = vld [vmem:[#allocation14 + $0x18] sm:$0xff]  }
 0x77b   :  { %v1642_v30 = vadd.f32 %v4159_v41, %v1641_v44  ;;  %1649 = vadd.xlane.f32.xlu1 %v1645_v31  ;;  %v4946_v41 = vld [vmem:[#allocation14 + $0x60] sm:$0xff]   ;;  %v4951_v44 = vld [vmem:[#allocation14 + $0x10] sm:$0xff]  }
 0x77c   :  { %v4640_v45 = vpop.f32.mrf.mxu0  ;;  %4399 = vmatprep.subr.bf16.mxu0 %v4946_v41 }
 0x77d   :  { %v1646_v46 = vadd.f32 %v1642_v30, %v5803_v51  ;;  %v4924_v51 = vld [vmem:[#allocation11 + $0x54] ss:$8 sps:$4 sm:$0xff]   ;;  %4400 = vmatpush3.bf16.msra.mxu0 %v4947_v36  ;;  %v4952_v30 = vld [vmem:[#allocation14 + $0x48] sm:$0xff]  }
 0x77e   :  { %1800 = vmatprep.subr.bf16.mxu1 %v4924_v51  ;;  %4401 = vmatprep.subr.bf16.mxu0 %v4948_v42  ;;  %v4953_v45 = vld [vmem:[#allocation14 + $0x8] sm:$0xff]  }
 0x77f   :  { %1651 = vadd.xlane.f32.xlu0 %v1646_v46  ;;  %1801 = vmatpush1.bf16.msra.mxu1 %v4922_v0 }
 0x780   :  { %1802 = vmatprep.subr.bf16.mxu1 %v4927_v1 }
 0x781   :  { %4402 = vmatpush3.bf16.msra.mxu0 %v4949_v43 }
 0x783   :  { %1803 = vmatpush1.bf16.msra.mxu1 %v4925_v2 }
 0x784   :  { %1804 = vmatprep.subr.bf16.mxu1 %v4930_v5 }
 0x787   :  { %1805 = vmatpush1.bf16.msra.mxu1 %v4928_v6 }
 0x788   :  { %1806 = vmatprep.subr.bf16.mxu1 %v4933_v32 }
 0x78b   :  { %1807 = vmatpush1.bf16.msra.mxu1 %v4931_v7 }
 0x78c   :  { %1808 = vmatprep.subr.bf16.mxu1 %v4936_v8 }
 0x78f   :  { %1809 = vmatpush1.bf16.msra.mxu1 %v4934_v9 }
 0x790   :  { %1810 = vmatprep.subr.bf16.mxu1 %v4939_v58 }
 0x793   :  { %1811 = vmatpush1.bf16.msra.mxu1 %v4937_v3 }
 0x804   :  { %v1650_v49 = vpop.xlane.xlu1 %1649 }
 0x805   :  { %v1653_v39 = vmul.f32 0.0078125, %v1650_v49  ;;  %v1709_v49 = vrot.slane %v1704_v38, %v5814_v55 }
 0x807   :  { %v1655_v52 = vsub.f32 %v1645_v31, %v1653_v39  ;;  %v4950_v31 = vld [vmem:[#allocation14 + $0x50] sm:$0xff]   ;;  %v1713_v39 = vrot.slane %v1704_v38, %v5820_v57 }
 0x808   :  { %v1652_v53 = vpop.xlane.xlu0 %1651  ;;  %4403 = vmatprep.subr.bf16.mxu0 %v4950_v31 }
 0x809   :  { %v1654_v56 = vmul.f32 0.0078125, %v1652_v53  ;;  %v1657_v59 = vmul.f32 %v1655_v52, %v1655_v52  ;;  %4404 = vmatpush3.bf16.msra.mxu0 %v4951_v44 }
 0x80a   :  { %4405 = vmatprep.subr.bf16.mxu0 %v4952_v30  ;;  %v4186_v30 = vld [vmem:[#allocation16] ss:$0 sm:$0xff] }
 0x80b   :  { %v1656_v60 = vsub.f32 %v1646_v46, %v1654_v56  ;;  %1659 = vadd.xlane.f32.xlu0 %v1657_v59  ;;  %v4954_v46 = vld [vmem:[#allocation14 + $0x40] sm:$0xff]  }
 0x80d   :  { %v1658_v50 = vmul.f32 %v1656_v60, %v1656_v60  ;;  %4406 = vmatpush3.bf16.msra.mxu0 %v4953_v45 }
 0x80e   :  { %4407 = vmatprep.subr.bf16.mxu0 %v4954_v46 }
 0x80f   :  { %1661 = vadd.xlane.f32.xlu0 %v1658_v50 }
 0x811   :  { %4408 = vmatpush3.bf16.msra.mxu0 %v4955_v47 }
 0x812   :  { %4641 = vmatprep.subr.bf16.mxu0 %v5515_v4 }
 0x894   :  { %v1660_v10 = vpop.xlane.xlu0 %1659 }
 0x895   :  { %v1663_v12 = vmul.f32 0.0078125, %v1660_v10 }
 0x897   :  { %v1665_v13 = vadd.f32 1e-05, %v1663_v12 }
 0x898   :  { %v1662_v14 = vpop.xlane.xlu0 %1661 }
 0x899   :  { %5088 = vrsqrt.f32 %v1665_v13  ;;  %v1664_v15 = vmul.f32 0.0078125, %v1662_v14 }
 0x89b   :  { %v1666_v16 = vadd.f32 1e-05, %v1664_v15 }
 0x89d   :  { %5090 = vrsqrt.f32 %v1666_v16 }
 0x8a6   :  { %v5089_v17 = vpop.eup %5088 }
 0x8a7   :  { %v1669_v18 = vmul.f32 %v5089_v17, %v1655_v52 }
 0x8a9   :  { %v1677_v23 = vmul.f32 %v4168_v19, %v1669_v18 }
 0x8aa   :  { %v5091_v21 = vpop.eup %5090 }
 0x8ab   :  { %v1670_v22 = vmul.f32 %v5091_v21, %v1656_v60  ;;  %v6031_v25 = vadd.f32 %v4169_v11, %v1677_v23 }
 0x8ad   :  { %v1678_v24 = vmul.f32 %v4168_v19, %v1670_v22 }
 0x8af   :  { %v6033_v26 = vadd.f32 %v4169_v11, %v1678_v24 }
 0x8b1   :  { %v1687_v28 = vpack.c.bf16 %v6033_v26, %v6031_v25 }
 0x8b3   :  { %1829 = vmatmul.mubr.bf16.vlgmr.msra.gmra.mxu1 %v1687_v28 }
 0x8b4   :  { %2307 = vmatprep.mubr.bf16.mxu1 %v5516_v27 }
 0x973   :  { %v1830_v52 = vpop.f32.mrf.mxu1 }
 0x974   :  { %v1831_v53 = vadd.f32 %v1830_v52, %v1709_v49 }
 0x975   :  { %v1832_v56 = vpop.f32.mrf.mxu1 }
 0x976   :  { %v1839_v59 = vmul.f32 %v1831_v53, %v1831_v53  ;;  %v1833_v60 = vadd.f32 %v1832_v56, %v1713_v39 }
 0x977   :  { %v1834_v50 = vpop.f32.mrf.mxu1 }
 0x978   :  { %v1843_v61 = vmul.f32 %v1839_v59, %v1831_v53  ;;  %v1840_v62 = vmul.f32 %v1833_v60, %v1833_v60  ;;  %v1835_v51 = vadd.f32 %v1834_v50, %v1709_v49  ;;  %v4956_v59 = vld [vmem:[%s6414_s25 + $0x168] ss:$12 sps:$4 sm:$0xff]   ;;  %v4959_v50 = vld [vmem:[%s6414_s25 + $0x170] ss:$12 sps:$4 sm:$0xff]  }
 0x979   :  { %v1836_v0 = vpop.f32.mrf.mxu1 }
 0x97a   :  { %v1847_v1 = vmul.f32 0.044715, %v1843_v61  ;;  %v1844_v2 = vmul.f32 %v1840_v62, %v1833_v60  ;;  %v1841_v5 = vmul.f32 %v1835_v51, %v1835_v51  ;;  %v1837_v6 = vadd.f32 %v1836_v0, %v1713_v39 }
 0x97c   :  { %v1851_v32 = vadd.f32 %v1847_v1, %v1831_v53  ;;  %v1848_v7 = vmul.f32 0.044715, %v1844_v2  ;;  %v1845_v8 = vmul.f32 %v1841_v5, %v1835_v51  ;;  %v1842_v9 = vmul.f32 %v1837_v6, %v1837_v6  ;;  %v4962_v5 = vld [vmem:[%s6414_s25 + $0x154] ss:$12 sps:$4 sm:$0xff]  }
 0x97e   :  { %v1855_v58 = vmul.f32 0.7978846, %v1851_v32  ;;  %v1852_v3 = vadd.f32 %v1848_v7, %v1833_v60  ;;  %v1849_v10 = vmul.f32 0.044715, %v1845_v8  ;;  %v1846_v12 = vmul.f32 %v1842_v9, %v1837_v6  ;;  %v4963_v32 = vld [vmem:[%s6414_s25 + $0x158] ss:$12 sps:$4 sm:$0xff]  }
 0x97f   :  { %v4966_v7 = vld [vmem:[%s6414_s25 + $0x13c] ss:$12 sps:$4 sm:$0xff]   ;;  %v4964_v8 = vld [vmem:[%s6414_s25 + $0x138] ss:$12 sps:$4 sm:$0xff]   ;;  %v4967_v9 = vld [vmem:[%s6414_s25 + $0x140] ss:$12 sps:$4 sm:$0xff]  }
 0x980   :  { %v1856_v13 = vmul.f32 0.7978846, %v1852_v3  ;;  %v1853_v14 = vadd.f32 %v1849_v10, %v1835_v51  ;;  %v1850_v15 = vmul.f32 0.044715, %v1846_v12  ;;  %5092 = vtanh.f32 %v1855_v58  ;;  %v4970_v58 = vld [vmem:[%s6414_s25 + $0x124] ss:$12 sps:$4 sm:$0xff]  }
 0x981   :  { %v4968_v3 = vld [vmem:[%s6414_s25 + $0x120] ss:$12 sps:$4 sm:$0xff]   ;;  %v4971_v10 = vld [vmem:[%s6414_s25 + $0x128] ss:$12 sps:$4 sm:$0xff]  }
 0x982   :  { %5094 = vtanh.f32 %v1856_v13  ;;  %v1857_v16 = vmul.f32 0.7978846, %v1853_v14  ;;  %v1854_v17 = vadd.f32 %v1850_v15, %v1837_v6  ;;  %v4974_v12 = vld [vmem:[%s6414_s25 + $0x10c] ss:$12 sps:$4 sm:$0xff]   ;;  %v4972_v13 = vld [vmem:[%s6414_s25 + $0x108] ss:$12 sps:$4 sm:$0xff]  }
 0x983   :  { %v4975_v14 = vld [vmem:[%s6414_s25 + $0x110] ss:$12 sps:$4 sm:$0xff]   ;;  %v4978_v15 = vld [vmem:[%s6414_s25 + $0xf4] ss:$12 sps:$4 sm:$0xff]  }
 0x984   :  { %5096 = vtanh.f32 %v1857_v16  ;;  %v1858_v18 = vmul.f32 0.7978846, %v1854_v17  ;;  %v4976_v16 = vld [vmem:[%s6414_s25 + $0xf0] ss:$12 sps:$4 sm:$0xff]   ;;  %v4979_v17 = vld [vmem:[%s6414_s25 + $0xf8] ss:$12 sps:$4 sm:$0xff]  }
 0x986   :  { %5098 = vtanh.f32 %v1858_v18  ;;  %v4982_v18 = vld [vmem:[%s6414_s25 + $0xdc] ss:$12 sps:$4 sm:$0xff]  }
 0x98d   :  { %v5093_v19 = vpop.eup %5092 }
 0x98e   :  { %v1863_v11 = vadd.f32 1.0, %v5093_v19  ;;  %v4980_v19 = vld [vmem:[%s6414_s25 + $0xd8] ss:$12 sps:$4 sm:$0xff]  }
 0x98f   :  { %v5095_v21 = vpop.eup %5094 }
 0x990   :  { %v1864_v22 = vadd.f32 1.0, %v5095_v21  ;;  %v1867_v35 = vmul.f32 0.5, %v1863_v11  ;;  %v4983_v21 = vld [vmem:[%s6414_s25 + $0xe0] ss:$12 sps:$4 sm:$0xff]   ;;  %v4987_v11 = vld [vmem:[%s6414_s25 + $0xc8] ss:$12 sps:$4 sm:$0xff]  }
 0x991   :  { %v5097_v23 = vpop.eup %5096 }
 0x992   :  { %v1865_v24 = vadd.f32 1.0, %v5097_v23  ;;  %v1868_v34 = vmul.f32 0.5, %v1864_v22  ;;  %v1871_v42 = vmul.f32 %v1867_v35, %v1831_v53  ;;  %v4986_v22 = vld [vmem:[%s6414_s25 + $0xc4] ss:$12 sps:$4 sm:$0xff]   ;;  %v4984_v23 = vld [vmem:[%s6414_s25 + $0xc0] ss:$12 sps:$4 sm:$0xff]  }
 0x993   :  { %v5099_v28 = vpop.eup %5098 }
 0x994   :  { %v1869_v29 = vmul.f32 0.5, %v1865_v24  ;;  %v1866_v33 = vadd.f32 1.0, %v5099_v28  ;;  %v1872_v41 = vmul.f32 %v1868_v34, %v1833_v60  ;;  %v4958_v60 = vld [vmem:[%s6414_s25 + $0x16c] ss:$12 sps:$4 sm:$0xff]  }
 0x995   :  { %2275 = vmatprep.subr.bf16.mxu1 %v4958_v60 }
 0x996   :  { %v1870_v37 = vmul.f32 0.5, %v1866_v33  ;;  %v1873_v40 = vmul.f32 %v1869_v29, %v1835_v51  ;;  %2276 = vmatpush1.bf16.msra.mxu1 %v4956_v59 }
 0x997   :  { %2277 = vmatprep.subr.bf16.mxu1 %v4962_v5 }
 0x998   :  { %v1874_v36 = vmul.f32 %v1870_v37, %v1837_v6  ;;  %v1875_v31 = vpack.c.bf16 %v1873_v40, %v1871_v42  ;;  %v4960_v6 = vld [vmem:[%s6414_s25 + $0x150] ss:$12 sps:$4 sm:$0xff]  }
 0x99a   :  { %v1876_v43 = vpack.c.bf16 %v1874_v36, %v1872_v41  ;;  %2278 = vmatpush1.bf16.msra.mxu1 %v4960_v6  ;;  %v4203_v41 = vld [vmem:[#allocation17] ss:$0 sm:$0xff] }
 0x99b   :  { %2279 = vmatprep.subr.bf16.mxu1 %v4966_v7 }
 0x99c   :  { %2044 = vmatprep.mubr.bf16.mxu0 %v1876_v43 }
 0x99d   :  { %2045 = vmatmul.mubr.bf16.vlgmr.msra.gmra.mxu0 %v1875_v31  ;;  %v4204_v31 = vld [vmem:[#allocation19] ss:$0 sm:$0xff] }
 0x99e   :  { %4657 = vmatprep.mubr.msk.bf16.mxu0 %vm5517_vm0, %v5515_v4  ;;  %4642 = vmatpush3.bf16.msra.mxu0 %v4959_v50 }
 0x99f   :  { %4643 = vmatprep.subr.bf16.mxu0 %v5515_v4  ;;  %2280 = vmatpush1.bf16.msra.mxu1 %v4964_v8 }
 0x9a0   :  { %2281 = vmatprep.subr.bf16.mxu1 %v4970_v58 }
 0x9a2   :  { %4644 = vmatpush3.bf16.msra.mxu0 %v4963_v32 }
 0x9a3   :  { %4645 = vmatprep.subr.bf16.mxu0 %v5515_v4  ;;  %2282 = vmatpush1.bf16.msra.mxu1 %v4968_v3 }
 0x9a4   :  { %2283 = vmatprep.subr.bf16.mxu1 %v4974_v12 }
 0x9a6   :  { %4646 = vmatpush3.bf16.msra.mxu0 %v4967_v9 }
 0x9a7   :  { %4647 = vmatprep.subr.bf16.mxu0 %v5515_v4  ;;  %2284 = vmatpush1.bf16.msra.mxu1 %v4972_v13 }
 0x9a8   :  { %2285 = vmatprep.subr.bf16.mxu1 %v4978_v15 }
 0x9aa   :  { %4648 = vmatpush3.bf16.msra.mxu0 %v4971_v10 }
 0x9ab   :  { %4649 = vmatprep.subr.bf16.mxu0 %v5515_v4  ;;  %2286 = vmatpush1.bf16.msra.mxu1 %v4976_v16 }
 0x9ac   :  { %2287 = vmatprep.subr.bf16.mxu1 %v4982_v18 }
 0x9ae   :  { %4650 = vmatpush3.bf16.msra.mxu0 %v4975_v14 }
 0x9af   :  { %4651 = vmatprep.subr.bf16.mxu0 %v5515_v4  ;;  %2288 = vmatpush1.bf16.msra.mxu1 %v4980_v19 }
 0x9b0   :  { %2289 = vmatprep.subr.bf16.mxu1 %v4986_v22 }
 0x9b2   :  { %4652 = vmatpush3.bf16.msra.mxu0 %v4979_v17 }
 0x9b3   :  { %4653 = vmatprep.subr.bf16.mxu0 %v5515_v4  ;;  %2290 = vmatpush1.bf16.msra.mxu1 %v4984_v23 }
 0x9b4   :  { %4661 = vmatprep.subr.bf16.mxu1 %v5515_v4 }
 0x9b6   :  { %4654 = vmatpush3.bf16.msra.mxu0 %v4983_v21 }
 0x9b7   :  { %4655 = vmatprep.subr.bf16.mxu0 %v5515_v4 }
 0x9ba   :  { %4656 = vmatpush3.bf16.msra.mxu0 %v4987_v11 }
 0x9bb   :  { %4685 = vmatprep.subr.bf16.mxu0 %v5515_v4 }
 0xa5d   :  { %v4409_v44 = vpop.f32.mrf.mxu0 }
 0xa5f   :  { %v4410_v45 = vpop.f32.mrf.mxu0 }
 0xa60   :  { %v4411_v46 = vadd.f32 %v4410_v45, %v4409_v44 }
 0xa61   :  { %v4412_v47 = vpop.f32.mrf.mxu0 }
 0xa62   :  { %v2047_v38 = vadd.f32 %v4411_v46, %v4186_v30 }
 0xa63   :  { %v4413_v49 = vpop.f32.mrf.mxu0 }
 0xa64   :  { %v4414_v39 = vadd.f32 %v4413_v49, %v4412_v47  ;;  %v2053_v52 = vadd.f32 %v2047_v38, %v6031_v25  ;;  %v4237_v47 = vld [vmem:[%s6388_s5 + $0x3] sm:$0x7] }
 0xa65   :  { %v2135_v38 = vrot.slane %v4237_v47, %v5814_v55  ;;  %v2139_v49 = vrot.slane %v4237_v47, %v5820_v57  ;;  %v2143_v17 = vrot.slane %v4237_v47, %v374_v20 }
 0xa66   :  { %v2050_v56 = vadd.f32 %v4414_v39, %v4186_v30  ;;  %2057 = vadd.xlane.f32.xlu1 %v2053_v52 }
 0xa68   :  { %v2054_v53 = vadd.f32 %v2050_v56, %v6033_v26 }
 0xa6a   :  { %2059 = vadd.xlane.f32.xlu0 %v2054_v53 }
 0xaef   :  { %v2058_v25 = vpop.xlane.xlu1 %2057 }
 0xaf0   :  { %v2061_v26 = vmul.f32 0.0078125, %v2058_v25 }
 0xaf2   :  { %v6055_v61 = vsub.f32 %v2053_v52, %v2061_v26 }
 0xaf3   :  { %v2060_v62 = vpop.xlane.xlu0 %2059 }
 0xaf4   :  { %v2062_v51 = vmul.f32 0.0078125, %v2060_v62  ;;  %v2065_v0 = vmul.f32 %v6055_v61, %v6055_v61 }
 0xaf6   :  { %v6059_v1 = vsub.f32 %v2054_v53, %v2062_v51  ;;  %2067 = vadd.xlane.f32.xlu1 %v2065_v0 }
 0xaf8   :  { %v2066_v2 = vmul.f32 %v6059_v1, %v6059_v1 }
 0xafa   :  { %2069 = vadd.xlane.f32.xlu0 %v2066_v2 }
 0xb7f   :  { %v2068_v24 = vpop.xlane.xlu1 %2067 }
 0xb80   :  { %v2071_v28 = vmul.f32 0.0078125, %v2068_v24 }
 0xb82   :  { %v2073_v29 = vadd.f32 1e-05, %v2071_v28 }
 0xb83   :  { %v2070_v33 = vpop.xlane.xlu0 %2069 }
 0xb84   :  { %5100 = vrsqrt.f32 %v2073_v29  ;;  %v2072_v34 = vmul.f32 0.0078125, %v2070_v33 }
 0xb86   :  { %v2074_v35 = vadd.f32 1e-05, %v2072_v34 }
 0xb88   :  { %5102 = vrsqrt.f32 %v2074_v35 }
 0xb91   :  { %v5101_v37 = vpop.eup %5100 }
 0xb92   :  { %v2077_v40 = vmul.f32 %v5101_v37, %v6055_v61 }
 0xb94   :  { %v2085_v43 = vmul.f32 %v4203_v41, %v2077_v40 }
 0xb95   :  { %v5103_v36 = vpop.eup %5102 }
 0xb96   :  { %v2078_v42 = vmul.f32 %v5103_v36, %v6059_v1  ;;  %v6136_v30 = vadd.f32 %v4204_v31, %v2085_v43 }
 0xb98   :  { %v2086_v44 = vmul.f32 %v4203_v41, %v2078_v42 }
 0xb9a   :  { %v6138_v45 = vadd.f32 %v4204_v31, %v2086_v44 }
 0xb9c   :  { %v2095_v46 = vpack.c.bf16 %v6138_v45, %v6136_v30 }
 0xb9e   :  { %2308 = vmatmul.mubr.bf16.vlgmr.msra.gmra.mxu1 %v2095_v46  ;;  %4658 = vmatmul.mubr.bf16.vlgmr.msra.gmra.mxu0 %v2095_v46 }
 0xb9f   :  { %4663 = vmatprep.mubr.msk.bf16.mxu1 %vm5517_vm0, %v5515_v4  ;;  %4687 = vmatprep.mubr.msk.bf16.mxu0 %vm5517_vm0, %v5515_v4 }
 0xc5e   :  { %v2309_v39 = vpop.f32.mrf.mxu1  ;;  %v6151_v52 = vpop.f32.mrf.mxu0 }
 0xc5f   :  { %v2310_v56 = vadd.f32 %v2309_v39, %v2135_v38  ;;  %v2353_v21 = vadd.f32 %v6151_v52, %v2143_v17 }
 0xc60   :  { %v2311_v53 = vpop.f32.mrf.mxu1  ;;  %v4659_v59 = vpop.f32.mrf.mxu0 }
 0xc61   :  { %v2359_v60 = vpack.c.bf16 %v2310_v56, %v2310_v56  ;;  %v2312_v50 = vadd.f32 %v2311_v53, %v2139_v49  ;;  %v6199_v54 = vpack.c.bf16 %v2353_v21, %v2353_v21 }
 0xc62   :  { %v2313_v25 = vpop.f32.mrf.mxu1  ;;  %v6153_v26 = vpop.f32.mrf.mxu0 }
 0xc63   :  { %v2361_v61 = vpack.c.bf16 %v2312_v50, %v2312_v50  ;;  %2367 = vrot.lane.b32.xlu0 %v2359_v60, %s5518_s2  ;;  %v2314_v2 = vadd.f32 %v2313_v25, %v2135_v38  ;;  %v2356_v20 = vadd.f32 %v6153_v26, %v2143_v17  ;;  %v2891_v29 = vsel %vm1134_vm2, %v6199_v54, 0 }
 0xc64   :  { %v2315_v62 = vpop.f32.mrf.mxu1  ;;  %v4660_v51 = vpop.f32.mrf.mxu0 }
 0xc65   :  { %v2316_v0 = vadd.f32 %v2315_v62, %v2139_v49  ;;  %2381 = vrot.lane.b32.xlu1 %v2361_v61, %s5518_s2  ;;  %v2411_v1 = vsel %vm639_vm1, %v2361_v61, 0  ;;  %v2360_v6 = vpack.c.bf16 %v2314_v2, %v2314_v2  ;;  %v6207_v28 = vpack.c.bf16 %v2356_v20, %v2356_v20 }
 0xc66   :  { %4662 = vmatpush3.bf16.xpose.msra.mxu1 %v2411_v1 }
 0xc67   :  { %v2362_v5 = vpack.c.bf16 %v2316_v0, %v2316_v0  ;;  %4667 = vmatprep.subr.bf16.mxu1 %v5515_v4  ;;  %v2937_v34 = vsel %vm1134_vm2, %v6207_v28, 0 }
 0xc69   :  { %2383 = vrot.lane.b32.xlu1 %v2362_v5, %s5518_s2  ;;  %2387 = vrot.lane.b32.xlu0 %v2362_v5, %s5501_s30  ;;  %v2457_v32 = vsel %vm639_vm1, %v2362_v5, 0 }
 0xc6d   :  { %2369 = vrot.lane.b32.xlu1 %v2360_v6, %s5518_s2  ;;  %2373 = vrot.lane.b32.xlu0 %v2360_v6, %s5501_s30 }
 0xc6e   :  { %4664 = vmatmul.mubr.msk.bf16.vlgmr.msra.gmra.mxu1 %vm639_vm1, %v2359_v60 }
 0xc6f   :  { %4668 = vmatpush3.bf16.xpose.msra.mxu1 %v2457_v32  ;;  %4669 = vmatprep.mubr.msk.bf16.mxu1 %vm5517_vm0, %v5515_v4 }
 0xc70   :  { %4673 = vmatprep.subr.bf16.mxu1 %v5515_v4 }
 0xc71   :  { %2385 = vrot.lane.b32.xlu1 %v2361_v61, %s5501_s30  ;;  %2391 = vrot.lane.b32.xlu0 %v2362_v5, %s5509_s0 }
 0xc75   :  { %2371 = vrot.lane.b32.xlu1 %v2359_v60, %s5501_s30  ;;  %2377 = vrot.lane.b32.xlu0 %v2360_v6, %s5509_s0 }
 0xc76   :  { %4670 = vmatmul.mubr.msk.bf16.vlgmr.msra.gmra.mxu1 %vm639_vm1, %v2360_v6 }
 0xc77   :  { %4675 = vmatprep.mubr.msk.bf16.mxu1 %vm5517_vm0, %v5515_v4 }
 0xc79   :  { %2389 = vrot.lane.b32.xlu1 %v2361_v61, %s5509_s0 }
 0xc7d   :  { %2375 = vrot.lane.b32.xlu1 %v2359_v60, %s5509_s0 }
 0xcd5   :  { %v2368_v58 = vpop.permute.xlu0 %2367 }
 0xcd7   :  { %v2382_v7 = vpop.permute.xlu1 %2381 }
 0xcd8   :  { %v2503_v8 = vsel %vm639_vm1, %v2382_v7, 0 }
 0xcd9   :  { %4674 = vmatpush3.bf16.xpose.msra.mxu1 %v2503_v8 }
 0xcda   :  { %4679 = vmatprep.subr.bf16.mxu1 %v5515_v4 }
 0xcdb   :  { %v2384_v9 = vpop.permute.xlu1 %2383  ;;  %v2388_v12 = vpop.permute.xlu0 %2387 }
 0xcdc   :  { %v2549_v10 = vsel %vm639_vm1, %v2384_v9, 0  ;;  %v2641_v18 = vsel %vm639_vm1, %v2388_v12, 0 }
 0xcdf   :  { %v2370_v3 = vpop.permute.xlu1 %2369  ;;  %v2374_v15 = vpop.permute.xlu0 %2373 }
 0xce0   :  { %4676 = vmatmul.mubr.msk.bf16.vlgmr.msra.gmra.mxu1 %vm639_vm1, %v2368_v58 }
 0xce1   :  { %4680 = vmatpush3.bf16.xpose.msra.mxu1 %v2549_v10  ;;  %4681 = vmatprep.mubr.msk.bf16.mxu1 %vm5517_vm0, %v5515_v4 }
 0xce2   :  { %4691 = vmatprep.subr.bf16.mxu1 %v5515_v4 }
 0xce3   :  { %v2386_v13 = vpop.permute.xlu1 %2385  ;;  %v2392_v23 = vpop.permute.xlu0 %2391 }
 0xce4   :  { %v2595_v14 = vsel %vm639_vm1, %v2386_v13, 0  ;;  %v2733_v11 = vsel %vm639_vm1, %v2392_v23, 0 }
 0xce5   :  { %4686 = vmatpush3.bf16.xpose.msra.mxu0 %v2595_v14 }
 0xce6   :  { %4697 = vmatprep.subr.bf16.mxu0 %v5515_v4 }
 0xce7   :  { %v2372_v16 = vpop.permute.xlu1 %2371  ;;  %v2378_v33 = vpop.permute.xlu0 %2377 }
 0xce8   :  { %4682 = vmatmul.mubr.msk.bf16.vlgmr.msra.gmra.mxu1 %vm639_vm1, %v2370_v3 }
 0xce9   :  { %4692 = vmatpush3.bf16.xpose.msra.mxu1 %v2641_v18  ;;  %4693 = vmatprep.mubr.msk.bf16.mxu1 %vm5517_vm0, %v5515_v4 }
 0xcea   :  { %4703 = vmatprep.subr.bf16.mxu1 %v5515_v4 }
 0xceb   :  { %v2390_v19 = vpop.permute.xlu1 %2389 }
 0xcec   :  { %v2687_v22 = vsel %vm639_vm1, %v2390_v19, 0  ;;  %4688 = vmatmul.mubr.msk.bf16.vlgmr.msra.gmra.mxu0 %vm639_vm1, %v2372_v16 }
 0xced   :  { %4698 = vmatpush3.bf16.xpose.msra.mxu0 %v2687_v22  ;;  %4699 = vmatprep.mubr.msk.bf16.mxu0 %vm5517_vm0, %v5515_v4 }
 0xcee   :  { %4709 = vmatprep.subr.bf16.mxu0 %v5515_v4 }
 0xcef   :  { %v2376_v24 = vpop.permute.xlu1 %2375 }
 0xcf0   :  { %4694 = vmatmul.mubr.msk.bf16.vlgmr.msra.gmra.mxu1 %vm639_vm1, %v2374_v15 }
 0xcf1   :  { %4704 = vmatpush3.bf16.xpose.msra.mxu1 %v2733_v11  ;;  %4705 = vmatprep.mubr.msk.bf16.mxu1 %vm5517_vm0, %v5515_v4 }
 0xcf2   :  { %4715 = vmatprep.subr.bf16.mxu1 %v5515_v4 }
 0xcf4   :  { %4700 = vmatmul.mubr.msk.bf16.vlgmr.msra.gmra.mxu0 %vm639_vm1, %v2376_v24 }
 0xcf5   :  { %4710 = vmatpush3.bf16.msra.mxu0 %v2891_v29  ;;  %4711 = vmatprep.mubr.msk.bf16.mxu0 %vm5517_vm0, %v5515_v4 }
 0xcf6   :  { %4721 = vmatprep.subr.bf16.mxu0 %v5515_v4 }
 0xcf8   :  { %4706 = vmatmul.mubr.msk.bf16.vlgmr.msra.gmra.mxu1 %vm639_vm1, %v2378_v33 }
 0xcf9   :  { %4716 = vmatpush3.bf16.msra.mxu1 %v2937_v34  ;;  %4717 = vmatprep.mubr.msk.bf16.mxu1 %vm5517_vm0, %v5515_v4 }
 0xcfa   :  { %4727 = vmatprep.subr.bf16.mxu1 %v5515_v4 }
 0xd2e   :  { %v2447_v35 = vpop.f32.mrf.mxu1 }
 0xd2f   :  { %v2775_v37 = vmul.f32 0.17677669, %v2447_v35 }
 0xd30   :  { %v4665_v40 = vpop.f32.mrf.mxu1 }
 0xd31   :  { %v6222_v41 = vadd.f32 %v2775_v37, %v5897_v48 }
 0xd32   :  { %v2450_v36 = vpop.f32.mrf.mxu1 }
 0xd33   :  { %v2791_v42 = vsel %vm1034_vm3, %v6222_v41, -inf }
 0xd34   :  { %2792 = vmax.xlane.f32.xlu1 %v2791_v42  ;;  %v4666_v43 = vpop.f32.mrf.mxu1 }
 0xd36   :  { %v2493_v31 = vpop.f32.mrf.mxu1 }
 0xd37   :  { %v2776_v44 = vmul.f32 0.17677669, %v2493_v31 }
 0xd38   :  { %v4671_v46 = vpop.f32.mrf.mxu1 }
 0xd39   :  { %v2784_v47 = vadd.f32 %v2776_v44, %v5905_v63 }
 0xd3a   :  { %v2496_v38 = vpop.f32.mrf.mxu1 }
 0xd3b   :  { %v2794_v49 = vsel %vm1034_vm3, %v2784_v47, -inf }
 0xd3c   :  { %2795 = vmax.xlane.f32.xlu0 %v2794_v49  ;;  %v4672_v39 = vpop.f32.mrf.mxu1 }
 0xda0   :  { %v2539_v52 = vpop.f32.mrf.mxu1 }
 0xda1   :  { %v2777_v56 = vmul.f32 0.17677669, %v2539_v52 }
 0xda2   :  { %v4677_v53 = vpop.f32.mrf.mxu1 }
 0xda3   :  { %v2785_v59 = vadd.f32 %v2777_v56, %v5897_v48 }
 0xda4   :  { %v2542_v60 = vpop.f32.mrf.mxu1 }
 0xda5   :  { %v2797_v50 = vsel %vm1034_vm3, %v2785_v59, -inf }
 0xda6   :  { %2798 = vmax.xlane.f32.xlu0 %v2797_v50  ;;  %v4678_v25 = vpop.f32.mrf.mxu1 }
 0xda8   :  { %v2585_v26 = vpop.f32.mrf.mxu1 }
 0xda9   :  { %v2778_v61 = vmul.f32 0.17677669, %v2585_v26 }
 0xdaa   :  { %v4683_v62 = vpop.f32.mrf.mxu1 }
 0xdab   :  { %v2786_v51 = vadd.f32 %v2778_v61, %v5905_v63 }
 0xdac   :  { %v2588_v0 = vpop.f32.mrf.mxu1  ;;  %v2631_v1 = vpop.f32.mrf.mxu0 }
 0xdad   :  { %v2779_v2 = vmul.f32 0.17677669, %v2631_v1  ;;  %v2800_v5 = vsel %vm1034_vm3, %v2786_v51, -inf }
 0xdae   :  { %v4689_v6 = vpop.f32.mrf.mxu0  ;;  %2801 = vmax.xlane.f32.xlu0 %v2800_v5  ;;  %v4684_v32 = vpop.f32.mrf.mxu1 }
 0xdaf   :  { %v2787_v7 = vadd.f32 %v2779_v2, %v5897_v48 }
 0xdb0   :  { %v2634_v8 = vpop.f32.mrf.mxu0  ;;  %v2677_v9 = vpop.f32.mrf.mxu1 }
 0xdb1   :  { %v2780_v58 = vmul.f32 0.17677669, %v2677_v9  ;;  %v2803_v3 = vsel %vm1034_vm3, %v2787_v7, -inf }
 0xdb2   :  { %v4690_v10 = vpop.f32.mrf.mxu0  ;;  %2804 = vmax.xlane.f32.xlu1 %v2803_v3  ;;  %v4695_v12 = vpop.f32.mrf.mxu1 }
 0xdb3   :  { %v6235_v13 = vadd.f32 %v2780_v58, %v5905_v63 }
 0xdb4   :  { %v2680_v14 = vpop.f32.mrf.mxu1  ;;  %v2723_v15 = vpop.f32.mrf.mxu0 }
 0xdb5   :  { %v2781_v16 = vmul.f32 0.17677669, %v2723_v15  ;;  %v2806_v17 = vsel %vm1034_vm3, %v6235_v13, -inf }
 0xdb6   :  { %v4701_v18 = vpop.f32.mrf.mxu0  ;;  %2807 = vmax.xlane.f32.xlu0 %v2806_v17  ;;  %v4696_v19 = vpop.f32.mrf.mxu1 }
 0xdb7   :  { %v6240_v21 = vadd.f32 %v2781_v16, %v5897_v48 }
 0xdb8   :  { %v2726_v22 = vpop.f32.mrf.mxu0  ;;  %v2769_v23 = vpop.f32.mrf.mxu1 }
 0xdb9   :  { %v2782_v20 = vmul.f32 0.17677669, %v2769_v23  ;;  %v2809_v11 = vsel %vm1034_vm3, %v6240_v21, -inf }
 0xdba   :  { %v4702_v24 = vpop.f32.mrf.mxu0  ;;  %2810 = vmax.xlane.f32.xlu1 %v2809_v11  ;;  %v4707_v29 = vpop.f32.mrf.mxu1 }
 0xdbb   :  { %v2790_v33 = vadd.f32 %v2782_v20, %v5905_v63 }
 0xdbc   :  { %v2772_v34 = vpop.f32.mrf.mxu1 }
 0xdbd   :  { %v2812_v35 = vsel %vm1034_vm3, %v2790_v33, -inf  ;;  %v2793_v42 = vpop.xlane.xlu1 %2792 }
 0xdbe   :  { %2813 = vmax.xlane.f32.xlu0 %v2812_v35  ;;  %v4708_v37 = vpop.f32.mrf.mxu1  ;;  %v2815_v43 = vsub.f32 %v6222_v41, %v2793_v42 }
 0xdc0   :  { %v2823_v63 = vmul.f32 1.442695, %v2815_v43 }
 0xdc5   :  { %v2796_v40 = vpop.xlane.xlu0 %2795 }
 0xdc6   :  { %v2816_v36 = vsub.f32 %v2784_v47, %v2796_v40 }
 0xdc8   :  { %v2825_v48 = vmul.f32 1.442695, %v2816_v36 }
 0xdca   :  { %5104 = vpow2.f32 %v2825_v48 }
 0xdcb   :  { %2395 = vrot.lane.b32.xlu1 %v6199_v54, %s5518_s2  ;;  %5106 = vpow2.f32 %v2823_v63 }
 0xdd7   :  { %v5105_v31 = vpop.eup %5104 }
 0xdd8   :  { %v2842_v44 = vsel %vm1034_vm3, %v5105_v31, 0.0  ;;  %v5107_v46 = vpop.eup %5106 }
 0xdd9   :  { %2843 = vadd.xlane.f32.xlu0 %v2842_v44  ;;  %v2839_v38 = vsel %vm1034_vm3, %v5107_v46, 0.0 }
 0xdef   :  { %2840 = vadd.xlane.f32.xlu1 %v2839_v38 }
 0xe2f   :  { %v2799_v49 = vpop.xlane.xlu0 %2798 }
 0xe30   :  { %v2817_v47 = vsub.f32 %v2785_v59, %v2799_v49 }
 0xe32   :  { %v2827_v39 = vmul.f32 1.442695, %v2817_v47 }
 0xe34   :  { %5108 = vpow2.f32 %v2827_v39 }
 0xe37   :  { %v2802_v52 = vpop.xlane.xlu0 %2801 }
 0xe38   :  { %v2818_v56 = vsub.f32 %v2786_v51, %v2802_v52 }
 0xe3a   :  { %v2829_v53 = vmul.f32 1.442695, %v2818_v56 }
 0xe3b   :  { %v2805_v60 = vpop.xlane.xlu1 %2804 }
 0xe3c   :  { %5110 = vpow2.f32 %v2829_v53  ;;  %v2819_v41 = vsub.f32 %v2787_v7, %v2805_v60 }
 0xe3e   :  { %v2831_v50 = vmul.f32 1.442695, %v2819_v41 }
 0xe3f   :  { %v2808_v0 = vpop.xlane.xlu0 %2807 }
 0xe40   :  { %5112 = vpow2.f32 %v2831_v50  ;;  %v2820_v5 = vsub.f32 %v6235_v13, %v2808_v0 }
 0xe41   :  { %v6251_v25 = vpop.eup %5108 }
 0xe42   :  { %v2845_v26 = vsel %vm1034_vm3, %v6251_v25, 0.0  ;;  %v2833_v6 = vmul.f32 1.442695, %v2820_v5 }
 0xe43   :  { %2846 = vadd.xlane.f32.xlu1 %v2845_v26  ;;  %v2811_v7 = vpop.xlane.xlu1 %2810 }
 0xe44   :  { %v2821_v8 = vsub.f32 %v6240_v21, %v2811_v7 }
 0xe46   :  { %v2835_v10 = vmul.f32 1.442695, %v2821_v8 }
 0xe47   :  { %v2814_v1 = vpop.xlane.xlu0 %2813  ;;  %v2396_v14 = vpop.permute.xlu1 %2395 }
 0xe48   :  { %v2822_v32 = vsub.f32 %v2790_v33, %v2814_v1  ;;  %v2983_v11 = vsel %vm1134_vm2, %v2396_v14, 0 }
 0xe49   :  { %v6255_v61 = vpop.eup %5110 }
 0xe4a   :  { %v2848_v59 = vsel %vm1034_vm3, %v6255_v61, 0.0  ;;  %v2837_v9 = vmul.f32 1.442695, %v2822_v32 }
 0xe4b   :  { %2849 = vadd.xlane.f32.xlu0 %v2848_v59 }
 0xe4d   :  { %v6259_v62 = vpop.eup %5112 }
 0xe4e   :  { %v2851_v51 = vsel %vm1034_vm3, %v6259_v62, 0.0 }
 0xe4f   :  { %2852 = vadd.xlane.f32.xlu1 %v2851_v51 }
 0xe60   :  { %2399 = vrot.lane.b32.xlu1 %v6199_v54, %s5501_s30 }
 0xe61   :  { %2397 = vrot.lane.b32.xlu0 %v6207_v28, %s5518_s2 }
 0xe62   :  { %v2844_v2 = vpop.xlane.xlu0 %2843 }
 0xe63   :  { %5114 = vrcp.f32 %v2844_v2 }
 0xe64   :  { %2401 = vrot.lane.b32.xlu1 %v6207_v28, %s5501_s30  ;;  %5116 = vpow2.f32 %v2833_v6 }
 0xe65   :  { %5118 = vpow2.f32 %v2837_v9 }
 0xe66   :  { %5120 = vpow2.f32 %v2835_v10 }
 0xe70   :  { %v5115_v58 = vpop.eup %5114 }
 0xe71   :  { %v2872_v3 = vmul.f32 %v5115_v58, %v5105_v31  ;;  %v5117_v15 = vpop.eup %5116 }
 0xe72   :  { %v2854_v16 = vsel %vm1034_vm3, %v5117_v15, 0.0  ;;  %v6275_v17 = vpop.eup %5118 }
 0xe73   :  { %v2880_v12 = vpack.c.bf16 %v2872_v3, %v2872_v3  ;;  %v2860_v18 = vsel %vm1034_vm3, %v6275_v17, 0.0  ;;  %v6279_v19 = vpop.eup %5120  ;;  %v4988_v3 = vld [vmem:[#allocation7 + $0x78] sm:$0xff]  }
 0xe74   :  { %v2857_v22 = vsel %vm1034_vm3, %v6279_v19, 0.0 }
 0xe75   :  { %4718 = vmatmul.mubr.msk.bf16.vlgmr.msra.gmra.mxu1 %vm1034_vm3, %v2880_v12  ;;  %v4989_v12 = vld [vmem:[#allocation7 + $0x70] sm:$0xff]  }
 0xe76   :  { %4729 = vmatprep.mubr.msk.bf16.mxu1 %vm5517_vm0, %v5515_v4 }
 0xe78   :  { %v2841_v13 = vpop.xlane.xlu1 %2840 }
 0xe79   :  { %5122 = vrcp.f32 %v2841_v13 }
 0xe80   :  { %2855 = vadd.xlane.f32.xlu0 %v2854_v16 }
 0xe84   :  { %2861 = vadd.xlane.f32.xlu0 %v2860_v18  ;;  %v4991_v18 = vld [vmem:[#allocation7 + $0x60] sm:$0xff]  }
 0xe86   :  { %v5123_v21 = vpop.eup %5122 }
 0xe87   :  { %v2871_v23 = vmul.f32 %v5123_v21, %v5107_v46 }
 0xe88   :  { %2858 = vadd.xlane.f32.xlu1 %v2857_v22 }
 0xe89   :  { %v2879_v20 = vpack.c.bf16 %v2871_v23, %v2871_v23 }
 0xe8b   :  { %4712 = vmatmul.mubr.msk.bf16.vlgmr.msra.gmra.mxu0 %vm1034_vm3, %v2879_v20  ;;  %v4992_v20 = vld [vmem:[#allocation7 + $0x58] sm:$0xff]  }
 0xe8c   :  { %4722 = vmatpush3.bf16.msra.mxu0 %v2983_v11  ;;  %4723 = vmatprep.mubr.msk.bf16.mxu0 %vm5517_vm0, %v5515_v4 }
 0xe8d   :  { %4733 = vmatprep.subr.bf16.mxu0 %v5515_v4 }
 0xe99   :  { %2403 = vrot.lane.b32.xlu1 %v6199_v54, %s5509_s0 }
 0xe9a   :  { %2405 = vrot.lane.b32.xlu0 %v6207_v28, %s5509_s0 }
 0xecc   :  { %v2847_v24 = vpop.xlane.xlu1 %2846 }
 0xecd   :  { %5124 = vrcp.f32 %v2847_v24 }
 0xed4   :  { %v2850_v29 = vpop.xlane.xlu0 %2849 }
 0xed5   :  { %5126 = vrcp.f32 %v2850_v29  ;;  %v4993_v29 = vld [vmem:[#allocation7 + $0x50] sm:$0xff]  }
 0xed8   :  { %v2853_v33 = vpop.xlane.xlu1 %2852  ;;  %v2398_v34 = vpop.permute.xlu0 %2397 }
 0xed9   :  { %5128 = vrcp.f32 %v2853_v33  ;;  %v3029_v35 = vsel %vm1134_vm2, %v2398_v34, 0  ;;  %v4994_v33 = vld [vmem:[#allocation7 + $0x48] sm:$0xff]  }
 0xeda   :  { %v5125_v37 = vpop.eup %5124  ;;  %4728 = vmatpush3.bf16.msra.mxu1 %v3029_v35  ;;  %v4995_v35 = vld [vmem:[#allocation7 + $0x40] sm:$0xff]  }
 0xedb   :  { %v2873_v40 = vmul.f32 %v5125_v37, %v6251_v25  ;;  %4739 = vmatprep.subr.bf16.mxu1 %v5515_v4 }
 0xedc   :  { %v2400_v36 = vpop.permute.xlu1 %2399 }
 0xedd   :  { %v3075_v54 = vsel %vm1134_vm2, %v2400_v36, 0  ;;  %v2881_v48 = vpack.c.bf16 %v2873_v40, %v2873_v40 }
 0xedf   :  { %4724 = vmatmul.mubr.msk.bf16.vlgmr.msra.gmra.mxu0 %vm1034_vm3, %v2881_v48 }
 0xee0   :  { %4734 = vmatpush3.bf16.msra.mxu0 %v3075_v54  ;;  %4735 = vmatprep.mubr.msk.bf16.mxu0 %vm5517_vm0, %v5515_v4  ;;  %v2402_v43 = vpop.permute.xlu1 %2401 }
 0xee1   :  { %4745 = vmatprep.subr.bf16.mxu0 %v5515_v4  ;;  %v3121_v63 = vsel %vm1134_vm2, %v2402_v43, 0 }
 0xee2   :  { %v5127_v28 = vpop.eup %5126 }
 0xee3   :  { %v2874_v42 = vmul.f32 %v5127_v28, %v6255_v61 }
 0xee5   :  { %v2882_v31 = vpack.c.bf16 %v2874_v42, %v2874_v42 }
 0xee6   :  { %v5129_v44 = vpop.eup %5128 }
 0xee7   :  { %4730 = vmatmul.mubr.msk.bf16.vlgmr.msra.gmra.mxu1 %vm1034_vm3, %v2882_v31  ;;  %v2875_v46 = vmul.f32 %v5129_v44, %v6259_v62 }
 0xee8   :  { %4740 = vmatpush3.bf16.msra.mxu1 %v3121_v63  ;;  %4741 = vmatprep.mubr.msk.bf16.mxu1 %vm5517_vm0, %v5515_v4 }
 0xee9   :  { %v2883_v38 = vpack.c.bf16 %v2875_v46, %v2875_v46  ;;  %4751 = vmatprep.subr.bf16.mxu1 %v5515_v4 }
 0xeeb   :  { %4736 = vmatmul.mubr.msk.bf16.vlgmr.msra.gmra.mxu0 %vm1034_vm3, %v2883_v38 }
 0xeec   :  { %4747 = vmatprep.mubr.msk.bf16.mxu0 %vm5517_vm0, %v5515_v4 }
 0xf09   :  { %v2856_v49 = vpop.xlane.xlu0 %2855 }
 0xf0a   :  { %5130 = vrcp.f32 %v2856_v49 }
 0xf0d   :  { %v2862_v47 = vpop.xlane.xlu0 %2861 }
 0xf0e   :  { %5132 = vrcp.f32 %v2862_v47 }
 0xf11   :  { %v2859_v39 = vpop.xlane.xlu1 %2858  ;;  %v2406_v41 = vpop.permute.xlu0 %2405 }
 0xf12   :  { %5134 = vrcp.f32 %v2859_v39  ;;  %v3213_v26 = vsel %vm1134_vm2, %v2406_v41, 0 }
 0xf15   :  { %v2404_v52 = vpop.permute.xlu1 %2403 }
 0xf16   :  { %v3167_v56 = vsel %vm1134_vm2, %v2404_v52, 0 }
 0xf17   :  { %v5131_v53 = vpop.eup %5130  ;;  %4746 = vmatpush3.bf16.msra.mxu0 %v3167_v56 }
 0xf18   :  { %v2876_v60 = vmul.f32 %v5131_v53, %v5117_v15  ;;  %4757 = vmatprep.subr.bf16.mxu0 %v5515_v4 }
 0xf1a   :  { %v2884_v50 = vpack.c.bf16 %v2876_v60, %v2876_v60 }
 0xf1b   :  { %v5133_v25 = vpop.eup %5132 }
 0xf1c   :  { %4742 = vmatmul.mubr.msk.bf16.vlgmr.msra.gmra.mxu1 %vm1034_vm3, %v2884_v50  ;;  %v2878_v61 = vmul.f32 %v5133_v25, %v6275_v17 }
 0xf1d   :  { %4752 = vmatpush3.bf16.msra.mxu1 %v3213_v26  ;;  %4753 = vmatprep.mubr.msk.bf16.mxu1 %vm5517_vm0, %v5515_v4 }
 0xf1e   :  { %v2886_v0 = vpack.c.bf16 %v2878_v61, %v2878_v61 }
 0xf1f   :  { %v5135_v59 = vpop.eup %5134 }
 0xf20   :  { %v2877_v62 = vmul.f32 %v5135_v59, %v6279_v19 }
 0xf22   :  { %v2885_v51 = vpack.c.bf16 %v2877_v62, %v2877_v62 }
 0xf24   :  { %4748 = vmatmul.mubr.msk.bf16.vlgmr.msra.gmra.mxu0 %vm1034_vm3, %v2885_v51  ;;  %4754 = vmatmul.mubr.msk.bf16.vlgmr.msra.gmra.mxu1 %vm1034_vm3, %v2886_v0 }
 0xf25   :  { %4773 = vmatprep.mubr.msk.bf16.mxu0 %vm5517_vm0, %v5515_v4  ;;  %3587 = vmatprep.mubr.bf16.mxu1 %v5516_v27  ;;  %v4990_v27 = vld [vmem:[#allocation7 + $0x68] sm:$0xff]  }
 0xf26   :  { %4758 = vmatpush3.bf16.msra.mxu0 %v4988_v3  ;;  %v4996_v3 = vld [vmem:[#allocation11 + $0xf0] ss:$8 sps:$4 sm:$0xff]  }
 0xf27   :  { %4759 = vmatprep.subr.bf16.mxu0 %v5515_v4 }
 0xf2a   :  { %4760 = vmatpush3.bf16.msra.mxu0 %v4989_v12 }
 0xf2b   :  { %4761 = vmatprep.subr.bf16.mxu0 %v5515_v4 }
 0xf2e   :  { %4762 = vmatpush3.bf16.msra.mxu0 %v4990_v27 }
 0xf2f   :  { %4763 = vmatprep.subr.bf16.mxu0 %v5515_v4 }
 0xf32   :  { %4764 = vmatpush3.bf16.msra.mxu0 %v4991_v18  ;;  %v5001_v18 = vld [vmem:[#allocation11 + $0xe4] ss:$8 sps:$4 sm:$0xff]  }
 0xf33   :  { %4765 = vmatprep.subr.bf16.mxu0 %v5515_v4 }
 0xf35   :  { %v6323_v1 = vpop.f32.mrf.mxu1 }
 0xf36   :  { %4766 = vmatpush3.bf16.msra.mxu0 %v4992_v20  ;;  %v5010_v20 = vld [vmem:[#allocation11 + $0xb4] ss:$8 sps:$4 sm:$0xff]  }
 0xf37   :  { %v4719_v2 = vpop.f32.mrf.mxu1  ;;  %4767 = vmatprep.subr.bf16.mxu0 %v5515_v4 }
 0xf38   :  { %v4279_v2 = vld [vmem:[%s6390_s7 + $0x1] ss:$0 sm:$0xff]  ;;  %s5520_s7 = smov [#allocation26]  }
 0xf39   :  { %v2976_v5 = vpop.f32.mrf.mxu1 }
 0xf3a   :  { %4768 = vmatpush3.bf16.msra.mxu0 %v4993_v29  ;;  %v5011_v29 = vld [vmem:[#allocation11 + $0xa0] ss:$8 sps:$4 sm:$0xff]  }
 0xf3b   :  { %v4720_v6 = vpop.f32.mrf.mxu1  ;;  %4769 = vmatprep.subr.bf16.mxu0 %v5515_v4 }
 0xf3e   :  { %4770 = vmatpush3.bf16.msra.mxu0 %v4994_v33  ;;  %v5016_v33 = vld [vmem:[#allocation11 + $0x94] ss:$8 sps:$4 sm:$0xff]  }
 0xf3f   :  { %4771 = vmatprep.subr.bf16.mxu0 %v5515_v4 }
 0xf42   :  { %4772 = vmatpush3.bf16.msra.mxu0 %v4995_v35  ;;  %v5019_v35 = vld [vmem:[#allocation11 + $0x84] ss:$8 sps:$4 sm:$0xff]  }
 0xf4b   :  { %v6325_v32 = vpop.f32.mrf.mxu0 }
 0xf4d   :  { %v4713_v7 = vpop.f32.mrf.mxu0 }
 0xf4f   :  { %v2930_v8 = vpop.f32.mrf.mxu0 }
 0xf51   :  { %v4714_v9 = vpop.f32.mrf.mxu0 }
 0xf9f   :  { %v3019_v58 = vpop.f32.mrf.mxu0 }
 0xfa1   :  { %v4725_v10 = vpop.f32.mrf.mxu0 }
 0xfa2   :  { %v4998_v10 = vld [vmem:[#allocation11 + $0xf4] ss:$8 sps:$4 sm:$0xff]  }
 0xfa3   :  { %v3022_v14 = vpop.f32.mrf.mxu0  ;;  %3555 = vmatprep.subr.bf16.mxu1 %v4998_v10 }
 0xfa4   :  { %3556 = vmatpush1.bf16.msra.mxu1 %v4996_v3 }
 0xfa5   :  { %v4726_v13 = vpop.f32.mrf.mxu0  ;;  %3557 = vmatprep.subr.bf16.mxu1 %v5001_v18 }
 0xfa7   :  { %v3065_v15 = vpop.f32.mrf.mxu1 }
 0xfa8   :  { %v4861_v16 = vpack.i.bf16 %v3065_v15, %v3019_v58 }
 0xfa9   :  { %v4731_v17 = vpop.f32.mrf.mxu1 }
 0xfaa   :  { %4862 = vrot.lane.b32.xlu1 %v4861_v16, %s5509_s0  ;;  %s4100_s0 = sshll.u32 %s5520_s7, 4  ;;  %s4101_s0 = int_to_ptr.vmem [resolvable:$true] %s4100_s0 }
 0xfab   :  { %v3068_v19 = vpop.f32.mrf.mxu1  ;;  %v3111_v21 = vpop.f32.mrf.mxu0  ;;  %p5459_p6 = scmp.lt.s32.totalorder %s4101_s0, %s4101_s0 }
 0xfac   :  { %v4999_v19 = vld [vmem:[#allocation11 + $0xe0] ss:$8 sps:$4 sm:$0xff]  }
 0xfad   :  { %v4732_v22 = vpop.f32.mrf.mxu1  ;;  %v4737_v23 = vpop.f32.mrf.mxu0  ;;  %3558 = vmatpush1.bf16.msra.mxu1 %v4999_v19 }
 0xfae   :  { %v5007_v22 = vld [vmem:[#allocation11 + $0xc4] ss:$8 sps:$4 sm:$0xff]   ;;  %v5005_v23 = vld [vmem:[#allocation11 + $0xc0] ss:$8 sps:$4 sm:$0xff]  }
 0xfaf   :  { %v3114_v11 = vpop.f32.mrf.mxu0 }
 0xfb0   :  { %v5008_v11 = vld [vmem:[#allocation11 + $0xb0] ss:$8 sps:$4 sm:$0xff]  }
 0xfb1   :  { %v4738_v24 = vpop.f32.mrf.mxu0 }
 0xfb2   :  { %v5013_v24 = vld [vmem:[#allocation11 + $0xa4] ss:$8 sps:$4 sm:$0xff]  }
 0xfdc   :  { %v3157_v34 = vpop.f32.mrf.mxu1 }
 0xfdd   :  { %v4866_v37 = vpack.i.bf16 %v3157_v34, %v3111_v21  ;;  %v5002_v21 = vld [vmem:[#allocation11 + $0xd0] ss:$8 sps:$4 sm:$0xff]  }
 0xfde   :  { %v4743_v40 = vpop.f32.mrf.mxu1  ;;  %v5014_v34 = vld [vmem:[#allocation11 + $0x90] ss:$8 sps:$4 sm:$0xff]  }
 0xfdf   :  { %4867 = vrot.lane.b32.xlu0 %v4866_v37, %s5501_s30  ;;  %v5017_v37 = vld [vmem:[#allocation11 + $0x80] ss:$8 sps:$4 sm:$0xff]  }
 0xfe0   :  { %v3160_v36 = vpop.f32.mrf.mxu1 }
 0xfe2   :  { %v4744_v54 = vpop.f32.mrf.mxu1 }
 0xfe4   :  { %v3203_v48 = vpop.f32.mrf.mxu0  ;;  %v3249_v28 = vpop.f32.mrf.mxu1 }
 0xfe5   :  { %v4871_v42 = vpack.i.bf16 %v3249_v28, %v3203_v48 }
 0xfe6   :  { %v4749_v43 = vpop.f32.mrf.mxu0  ;;  %v4755_v31 = vpop.f32.mrf.mxu1 }
 0xfe7   :  { %4872 = vrot.lane.b32.xlu1 %v4871_v42, %s5518_s2  ;;  %s5454_s2 = scalar_lea.vmem %s4101_s0, 32 }
 0xfe8   :  { %v3206_v44 = vpop.f32.mrf.mxu0  ;;  %v3252_v63 = vpop.f32.mrf.mxu1  ;;  %p5455_p5 = scmp.ne.s32.totalorder %s4101_s0, %s5454_s2  ;;  %p5460_p7 = scmp.lt.s32.totalorder %s5454_s2, %s5454_s2 }
 0xfe9   :  { %v4288_v44 = vld [vmem:[#allocation8 + $0x1] ss:$0 sm:$0xff] }
 0xfea   :  { %v4750_v46 = vpop.f32.mrf.mxu0  ;;  %v4756_v38 = vpop.f32.mrf.mxu1  ;;  %p5461_p8 = por %p5460_p7, %p5459_p6 }
 0xfec   :  { %p5462_p9 = pnand %p5461_p8, %p5455_p5 }
0x101c   :  { %v4863_v49 = vpop.permute.xlu1 %4862 }
0x101d   :  { %v4865_v39 = vunpack.i.h.bf16 %v4863_v49  ;;  %v4864_v52 = vunpack.i.l.bf16 %v4863_v49  ;;  %v4289_v49 = vld [vmem:[#allocation10 + $0x1] ss:$0 sm:$0xff] }
0x101f   :  { %v3280_v41 = vsel %vm639_vm1, %v6323_v1, %v4865_v39  ;;  %v3279_v50 = vsel %vm639_vm1, %v6325_v32, %v4864_v52 }
0x1051   :  { %v4868_v47 = vpop.permute.xlu0 %4867 }
0x1052   :  { %v4870_v56 = vunpack.i.h.bf16 %v4868_v47  ;;  %v4869_v53 = vunpack.i.l.bf16 %v4868_v47 }
0x1054   :  { %v3282_v61 = vsel %vm1526_vm4, %v3280_v41, %v4870_v56  ;;  %v3281_v59 = vsel %vm1526_vm4, %v3279_v50, %v4869_v53  ;;  %v5020_v53 = vld [vmem:[#allocation14 + $0xf8] sm:$0xff]   ;;  %v5022_v41 = vld [vmem:[#allocation14 + $0xf0] sm:$0xff]  }
0x1055   :  { %4465 = vmatprep.subr.bf16.mxu0 %v5020_v53  ;;  %v5023_v50 = vld [vmem:[#allocation14 + $0xb0] sm:$0xff]  }
0x1059   :  { %v4873_v60 = vpop.permute.xlu1 %4872 }
0x105a   :  { %v4875_v25 = vunpack.i.h.bf16 %v4873_v60  ;;  %v4874_v26 = vunpack.i.l.bf16 %v4873_v60  ;;  %v5021_v60 = vld [vmem:[#allocation14 + $0xb8] sm:$0xff]  }
0x105c   :  { %v3284_v62 = vsel %vm1529_vm5, %v3282_v61, %v4875_v25  ;;  %v3283_v51 = vsel %vm1529_vm5, %v3281_v59, %v4874_v26  ;;  %v5024_v25 = vld [vmem:[#allocation14 + $0xe8] sm:$0xff]   ;;  %v5026_v61 = vld [vmem:[#allocation14 + $0xe0] sm:$0xff]  }
0x105d   :  { %v3285_v0 = vpack.c.bf16 %v3284_v62, %v3283_v51  ;;  %v5025_v26 = vld [vmem:[#allocation14 + $0xa8] sm:$0xff]   ;;  %v5027_v59 = vld [vmem:[#allocation14 + $0xa0] sm:$0xff]   ;;  %v5028_v62 = vld [vmem:[#allocation14 + $0xd8] sm:$0xff]  }
0x105e   :  { %v5029_v51 = vld [vmem:[#allocation14 + $0x98] sm:$0xff]  }
0x105f   :  { %4774 = vmatmul.mubr.bf16.vlgmr.msra.gmra.mxu0 %v3285_v0  ;;  %v5030_v0 = vld [vmem:[#allocation14 + $0xd0] sm:$0xff]  }
0x1060   :  { %4466 = vmatpush3.bf16.msra.mxu0 %v5021_v60 }
0x1061   :  { %4467 = vmatprep.subr.bf16.mxu0 %v5022_v41 }
0x1064   :  { %4468 = vmatpush3.bf16.msra.mxu0 %v5023_v50 }
0x1065   :  { %4469 = vmatprep.subr.bf16.mxu0 %v5024_v25 }
0x1068   :  { %4470 = vmatpush3.bf16.msra.mxu0 %v5025_v26  ;;  %v4306_v26 = vld [vmem:[#allocation16 + $0x1] ss:$0 sm:$0xff] }
0x1069   :  { %4471 = vmatprep.subr.bf16.mxu0 %v5026_v61 }
0x106c   :  { %4472 = vmatpush3.bf16.msra.mxu0 %v5027_v59 }
0x106d   :  { %4473 = vmatprep.subr.bf16.mxu0 %v5028_v62 }
0x1070   :  { %4474 = vmatpush3.bf16.msra.mxu0 %v5029_v51 }
0x1071   :  { %4475 = vmatprep.subr.bf16.mxu0 %v5030_v0 }
0x111f   :  { %v3393_v1 = vpop.f32.mrf.mxu0 }
0x1120   :  { %v3394_v5 = vadd.f32 %v4279_v2, %v3393_v1  ;;  %v5032_v1 = vld [vmem:[#allocation14 + $0xc8] sm:$0xff]  }
0x1121   :  { %v4775_v6 = vpop.f32.mrf.mxu0 }
0x1122   :  { %v3400_v32 = vadd.f32 %v3394_v5, %v6136_v30  ;;  %v5033_v5 = vld [vmem:[#allocation14 + $0x88] sm:$0xff]   ;;  %v5034_v6 = vld [vmem:[#allocation14 + $0xc0] sm:$0xff]  }
0x1123   :  { %v3396_v7 = vpop.f32.mrf.mxu0 }
0x1124   :  { %v3397_v8 = vadd.f32 %v4279_v2, %v3396_v7  ;;  %3406 = vadd.xlane.f32.xlu0 %v3400_v32  ;;  %v5031_v2 = vld [vmem:[#allocation14 + $0x90] sm:$0xff]   ;;  %v3463_v7 = vld [vmem:[#allocation13 + $0x2] sm:$0x3] }
0x1125   :  { %v4776_v9 = vpop.f32.mrf.mxu0  ;;  %4476 = vmatpush3.bf16.msra.mxu0 %v5031_v2 }
0x1126   :  { %v3401_v58 = vadd.f32 %v3397_v8, %v6138_v45  ;;  %v5004_v45 = vld [vmem:[#allocation11 + $0xd4] ss:$8 sps:$4 sm:$0xff]   ;;  %4477 = vmatprep.subr.bf16.mxu0 %v5032_v1  ;;  %v3468_v8 = vrot.slane %v3463_v7, %v5814_v55  ;;  %v3472_v9 = vrot.slane %v3463_v7, %v5820_v57 }
0x1127   :  { %3559 = vmatprep.subr.bf16.mxu1 %v5004_v45 }
0x1128   :  { %3408 = vadd.xlane.f32.xlu1 %v3401_v58  ;;  %3560 = vmatpush1.bf16.msra.mxu1 %v5002_v21 }
0x1129   :  { %3561 = vmatprep.subr.bf16.mxu1 %v5007_v22  ;;  %4478 = vmatpush3.bf16.msra.mxu0 %v5033_v5 }
0x112a   :  { %4479 = vmatprep.subr.bf16.mxu0 %v5034_v6 }
0x112c   :  { %3562 = vmatpush1.bf16.msra.mxu1 %v5005_v23 }
0x112d   :  { %3563 = vmatprep.subr.bf16.mxu1 %v5010_v20 }
0x1130   :  { %3564 = vmatpush1.bf16.msra.mxu1 %v5008_v11 }
0x1131   :  { %3565 = vmatprep.subr.bf16.mxu1 %v5013_v24 }
0x1134   :  { %3566 = vmatpush1.bf16.msra.mxu1 %v5011_v29 }
0x1135   :  { %3567 = vmatprep.subr.bf16.mxu1 %v5016_v33 }
0x1138   :  { %3568 = vmatpush1.bf16.msra.mxu1 %v5014_v34 }
0x1139   :  { %3569 = vmatprep.subr.bf16.mxu1 %v5019_v35 }
0x113c   :  { %3570 = vmatpush1.bf16.msra.mxu1 %v5017_v37 }
0x113d   :  { %4777 = vmatprep.subr.bf16.mxu1 %v5515_v4 }
0x11ad   :  { %v3407_v12 = vpop.xlane.xlu0 %3406 }
0x11ae   :  { %v3410_v14 = vmul.f32 0.0078125, %v3407_v12 }
0x11b0   :  { %v3412_v13 = vsub.f32 %v3400_v32, %v3410_v14  ;;  %v5035_v32 = vld [vmem:[#allocation14 + $0x80] sm:$0xff]  }
0x11b1   :  { %v3409_v27 = vpop.xlane.xlu1 %3408  ;;  %4480 = vmatpush3.bf16.msra.mxu0 %v5035_v32 }
0x11b2   :  { %v3411_v15 = vmul.f32 0.0078125, %v3409_v27  ;;  %v3414_v16 = vmul.f32 %v3412_v13, %v3412_v13  ;;  %4797 = vmatprep.subr.bf16.mxu0 %v5515_v4 }
0x11b4   :  { %v3413_v17 = vsub.f32 %v3401_v58, %v3411_v15  ;;  %3416 = vadd.xlane.f32.xlu0 %v3414_v16 }
0x11b6   :  { %v3415_v30 = vmul.f32 %v3413_v17, %v3413_v17 }
0x11b8   :  { %3418 = vadd.xlane.f32.xlu0 %v3415_v30 }
0x123d   :  { %v3417_v40 = vpop.xlane.xlu0 %3416 }
0x123e   :  { %v3420_v36 = vmul.f32 0.0078125, %v3417_v40 }
0x1240   :  { %v3422_v54 = vadd.f32 1e-05, %v3420_v36 }
0x1241   :  { %v3419_v48 = vpop.xlane.xlu0 %3418 }
0x1242   :  { %5136 = vrsqrt.f32 %v3422_v54  ;;  %v3421_v28 = vmul.f32 0.0078125, %v3419_v48 }
0x1244   :  { %v3423_v42 = vadd.f32 1e-05, %v3421_v28 }
0x1246   :  { %5138 = vrsqrt.f32 %v3423_v42 }
0x124f   :  { %v5137_v43 = vpop.eup %5136 }
0x1250   :  { %v3426_v31 = vmul.f32 %v5137_v43, %v3412_v13 }
0x1252   :  { %v3434_v38 = vmul.f32 %v4288_v44, %v3426_v31 }
0x1253   :  { %v5139_v63 = vpop.eup %5138 }
0x1254   :  { %v3427_v46 = vmul.f32 %v5139_v63, %v3413_v17  ;;  %v6351_v39 = vadd.f32 %v4289_v49, %v3434_v38 }
0x1256   :  { %v3435_v47 = vmul.f32 %v4288_v44, %v3427_v46 }
0x1258   :  { %v6353_v52 = vadd.f32 %v4289_v49, %v3435_v47 }
0x125a   :  { %v3444_v56 = vpack.c.bf16 %v6353_v52, %v6351_v39 }
0x125c   :  { %3588 = vmatmul.mubr.bf16.vlgmr.msra.gmra.mxu1 %v3444_v56 }
0x125d   :  { %4793 = vmatprep.mubr.msk.bf16.mxu1 %vm5517_vm0, %v5515_v4 }
0x131c   :  { %v3589_v58 = vpop.f32.mrf.mxu1 }
0x131d   :  { %v3590_v3 = vadd.f32 %v3589_v58, %v3468_v8 }
0x131e   :  { %v3591_v10 = vpop.f32.mrf.mxu1 }
0x131f   :  { %v3598_v12 = vmul.f32 %v3590_v3, %v3590_v3  ;;  %v3592_v14 = vadd.f32 %v3591_v10, %v3472_v9 }
0x1320   :  { %v3593_v13 = vpop.f32.mrf.mxu1 }
0x1321   :  { %v3602_v27 = vmul.f32 %v3598_v12, %v3590_v3  ;;  %v3599_v15 = vmul.f32 %v3592_v14, %v3592_v14  ;;  %v3594_v16 = vadd.f32 %v3593_v13, %v3468_v8  ;;  %v5039_v13 = vld [vmem:[#allocation20 + $0x20] sm:$0xff]  }
0x1322   :  { %v3595_v17 = vpop.f32.mrf.mxu1 }
0x1323   :  { %v3606_v30 = vmul.f32 0.044715, %v3602_v27  ;;  %v3603_v18 = vmul.f32 %v3599_v15, %v3592_v14  ;;  %v3600_v19 = vmul.f32 %v3594_v16, %v3594_v16  ;;  %v3596_v45 = vadd.f32 %v3595_v17, %v3472_v9  ;;  %v5040_v27 = vld [vmem:[#allocation20 + $0x18] sm:$0xff]   ;;  %v5041_v15 = vld [vmem:[#allocation20 + $0x10] sm:$0xff]   ;;  %v5043_v17 = vld [vmem:[#allocation20] sm:$0xff]  }
0x1325   :  { %v3610_v21 = vadd.f32 %v3606_v30, %v3590_v3  ;;  %v3607_v22 = vmul.f32 0.044715, %v3603_v18  ;;  %v3604_v23 = vmul.f32 %v3600_v19, %v3594_v16  ;;  %v3601_v55 = vmul.f32 %v3596_v45, %v3596_v45  ;;  %v5044_v30 = vld [vmem:[#allocation23 + $0x38] sm:$0xff]   ;;  %v5045_v18 = vld [vmem:[#allocation23 + $0x30] sm:$0xff]   ;;  %v5046_v19 = vld [vmem:[#allocation23 + $0x28] sm:$0xff]  }
0x1327   :  { %v3614_v20 = vmul.f32 0.7978846, %v3610_v21  ;;  %v3611_v57 = vadd.f32 %v3607_v22, %v3592_v14  ;;  %v3608_v11 = vmul.f32 0.044715, %v3604_v23  ;;  %v3605_v24 = vmul.f32 %v3601_v55, %v3596_v45 }
0x1329   :  { %v3615_v29 = vmul.f32 0.7978846, %v3611_v57  ;;  %v3612_v33 = vadd.f32 %v3608_v11, %v3594_v16  ;;  %v3609_v34 = vmul.f32 0.044715, %v3605_v24  ;;  %5140 = vtanh.f32 %v3614_v20  ;;  %v4323_v11 = vld [vmem:[#allocation17 + $0x1] ss:$0 sm:$0xff] }
0x132b   :  { %5142 = vtanh.f32 %v3615_v29  ;;  %v3616_v35 = vmul.f32 0.7978846, %v3612_v33  ;;  %v3613_v37 = vadd.f32 %v3609_v34, %v3596_v45  ;;  %v4324_v34 = vld [vmem:[#allocation19 + $0x1] ss:$0 sm:$0xff] }
0x132d   :  { %5144 = vtanh.f32 %v3616_v35  ;;  %v3617_v40 = vmul.f32 0.7978846, %v3613_v37 }
0x132f   :  { %5146 = vtanh.f32 %v3617_v40 }
0x1336   :  { %v5141_v36 = vpop.eup %5140 }
0x1337   :  { %v3622_v42 = vadd.f32 1.0, %v5141_v36 }
0x1338   :  { %v5143_v54 = vpop.eup %5142 }
0x1339   :  { %v3623_v48 = vadd.f32 1.0, %v5143_v54  ;;  %v3626_v38 = vmul.f32 0.5, %v3622_v42 }
0x133a   :  { %v5145_v28 = vpop.eup %5144 }
0x133b   :  { %v3624_v43 = vadd.f32 1.0, %v5145_v28  ;;  %v3627_v46 = vmul.f32 0.5, %v3623_v48  ;;  %v3630_v60 = vmul.f32 %v3626_v38, %v3590_v3  ;;  %v5049_v38 = vld [vmem:[#allocation23 + $0x10] sm:$0xff]  }
0x133c   :  { %v5147_v31 = vpop.eup %5146 }
0x133d   :  { %v3628_v44 = vmul.f32 0.5, %v3624_v43  ;;  %v3625_v63 = vadd.f32 1.0, %v5147_v31  ;;  %v3631_v56 = vmul.f32 %v3627_v46, %v3592_v14  ;;  %v5036_v14 = vld [vmem:[#allocation20 + $0x38] sm:$0xff]  }
0x133e   :  { %4778 = vmatpush3.bf16.msra.mxu1 %v5036_v14  ;;  %v5048_v46 = vld [vmem:[#allocation23 + $0x18] sm:$0xff]  }
0x133f   :  { %v3629_v49 = vmul.f32 0.5, %v3625_v63  ;;  %v3632_v47 = vmul.f32 %v3628_v44, %v3594_v16  ;;  %4779 = vmatprep.subr.bf16.mxu1 %v5515_v4  ;;  %v5042_v16 = vld [vmem:[#allocation20 + $0x8] sm:$0xff]  }
0x1340   :  { %v5047_v63 = vld [vmem:[#allocation23 + $0x20] sm:$0xff]  }
0x1341   :  { %v3633_v53 = vmul.f32 %v3629_v49, %v3596_v45  ;;  %v3634_v50 = vpack.c.bf16 %v3632_v47, %v3630_v60  ;;  %v5050_v49 = vld [vmem:[#allocation23 + $0x8] sm:$0xff]   ;;  %v5051_v47 = vld [vmem:[#allocation23] sm:$0xff]  }
0x1343   :  { %v3635_v41 = vpack.c.bf16 %v3633_v53, %v3631_v56  ;;  %v4325_v56 = vld [vmem:[#allocation22] ss:$0 sm:$0xff] }
0x1345   :  { %3805 = vmatprep.mubr.bf16.mxu0 %v3635_v41 }
0x1346   :  { %3806 = vmatmul.mubr.bf16.vlgmr.msra.gmra.mxu0 %v3634_v50 }
0x1347   :  { %4813 = vmatprep.mubr.msk.bf16.mxu0 %vm5517_vm0, %v5515_v4  ;;  %4798 = vmatpush3.bf16.msra.mxu0 %v5044_v30 }
0x1348   :  { %4799 = vmatprep.subr.bf16.mxu0 %v5515_v4 }
0x134b   :  { %4800 = vmatpush3.bf16.msra.mxu0 %v5045_v18 }
0x134c   :  { %4801 = vmatprep.subr.bf16.mxu0 %v5515_v4 }
0x134f   :  { %4802 = vmatpush3.bf16.msra.mxu0 %v5046_v19 }
0x1350   :  { %4803 = vmatprep.subr.bf16.mxu0 %v5515_v4 }
0x1353   :  { %4804 = vmatpush3.bf16.msra.mxu0 %v5047_v63 }
0x1354   :  { %4805 = vmatprep.subr.bf16.mxu0 %v5515_v4 }
0x1357   :  { %4806 = vmatpush3.bf16.msra.mxu0 %v5048_v46 }
0x1358   :  { %4807 = vmatprep.subr.bf16.mxu0 %v5515_v4 }
0x135b   :  { %4808 = vmatpush3.bf16.msra.mxu0 %v5049_v38 }
0x135c   :  { %4809 = vmatprep.subr.bf16.mxu0 %v5515_v4 }
0x135f   :  { %4810 = vmatpush3.bf16.msra.mxu0 %v5050_v49 }
0x1360   :  { %4811 = vmatprep.subr.bf16.mxu0 %v5515_v4 }
0x1363   :  { %4812 = vmatpush3.bf16.msra.mxu0 %v5051_v47 }
0x1406   :  { %v4481_v25 = vpop.f32.mrf.mxu0 }
0x1408   :  { %v4482_v61 = vpop.f32.mrf.mxu0 }
0x1409   :  { %v4483_v59 = vadd.f32 %v4482_v61, %v4481_v25 }
0x140a   :  { %v4484_v62 = vpop.f32.mrf.mxu0 }
0x140b   :  { %v3808_v51 = vadd.f32 %v4483_v59, %v4306_v26  ;;  %v4334_v59 = vld [vmem:[#allocation25] ss:$0 sm:$0xff] }
0x140c   :  { %v4485_v0 = vpop.f32.mrf.mxu0 }
0x140d   :  { %v4486_v2 = vadd.f32 %v4485_v0, %v4484_v62  ;;  %v3814_v1 = vadd.f32 %v3808_v51, %v6351_v39  ;;  %v5037_v39 = vld [vmem:[#allocation20 + $0x30] sm:$0xff]  }
0x140e   :  { %4780 = vmatpush3.bf16.msra.mxu1 %v5037_v39 }
0x140f   :  { %v3811_v5 = vadd.f32 %v4486_v2, %v4306_v26  ;;  %3820 = vadd.xlane.f32.xlu1 %v3814_v1  ;;  %4781 = vmatprep.subr.bf16.mxu1 %v5515_v4 }
0x1411   :  { %v3815_v6 = vadd.f32 %v3811_v5, %v6353_v52  ;;  %v5038_v52 = vld [vmem:[#allocation20 + $0x28] sm:$0xff]  }
0x1412   :  { %4782 = vmatpush3.bf16.msra.mxu1 %v5038_v52 }
0x1413   :  { %3822 = vadd.xlane.f32.xlu0 %v3815_v6  ;;  %4783 = vmatprep.subr.bf16.mxu1 %v5515_v4 }
0x1416   :  { %4784 = vmatpush3.bf16.msra.mxu1 %v5039_v13 }
0x1417   :  { %4785 = vmatprep.subr.bf16.mxu1 %v5515_v4 }
0x141a   :  { %4786 = vmatpush3.bf16.msra.mxu1 %v5040_v27 }
0x141b   :  { %4787 = vmatprep.subr.bf16.mxu1 %v5515_v4 }
0x141e   :  { %4788 = vmatpush3.bf16.msra.mxu1 %v5041_v15 }
0x141f   :  { %4789 = vmatprep.subr.bf16.mxu1 %v5515_v4 }
0x1422   :  { %4790 = vmatpush3.bf16.msra.mxu1 %v5042_v16 }
0x1423   :  { %4791 = vmatprep.subr.bf16.mxu1 %v5515_v4 }
0x1426   :  { %4792 = vmatpush3.bf16.msra.mxu1 %v5043_v17 }
0x1498   :  { %v3821_v32 = vpop.xlane.xlu1 %3820 }
0x1499   :  { %v3824_v7 = vmul.f32 0.0078125, %v3821_v32 }
0x149b   :  { %v3826_v8 = vsub.f32 %v3814_v1, %v3824_v7 }
0x149c   :  { %v3823_v9 = vpop.xlane.xlu0 %3822 }
0x149d   :  { %v3825_v58 = vmul.f32 0.0078125, %v3823_v9  ;;  %v3828_v3 = vmul.f32 %v3826_v8, %v3826_v8 }
0x149f   :  { %v3827_v10 = vsub.f32 %v3815_v6, %v3825_v58  ;;  %3830 = vadd.xlane.f32.xlu1 %v3828_v3 }
0x14a1   :  { %v3829_v12 = vmul.f32 %v3827_v10, %v3827_v10 }
0x14a3   :  { %3832 = vadd.xlane.f32.xlu0 %v3829_v12 }
0x1528   :  { %v3831_v45 = vpop.xlane.xlu1 %3830 }
0x1529   :  { %v3834_v21 = vmul.f32 0.0078125, %v3831_v45 }
0x152b   :  { %v3836_v22 = vadd.f32 1e-05, %v3834_v21 }
0x152c   :  { %v3833_v23 = vpop.xlane.xlu0 %3832 }
0x152d   :  { %5148 = vrsqrt.f32 %v3836_v22  ;;  %v3835_v55 = vmul.f32 0.0078125, %v3833_v23 }
0x152f   :  { %v3837_v20 = vadd.f32 1e-05, %v3835_v55 }
0x1531   :  { %5150 = vrsqrt.f32 %v3837_v20 }
0x153a   :  { %v5149_v57 = vpop.eup %5148 }
0x153b   :  { %v3840_v24 = vmul.f32 %v5149_v57, %v3826_v8 }
0x153d   :  { %v3848_v29 = vmul.f32 %v4323_v11, %v3840_v24 }
0x153e   :  { %v5151_v33 = vpop.eup %5150 }
0x153f   :  { %v3841_v35 = vmul.f32 %v5151_v33, %v3827_v10  ;;  %v3856_v40 = vadd.f32 %v4324_v34, %v3848_v29 }
0x1541   :  { %v3849_v37 = vmul.f32 %v4323_v11, %v3841_v35  ;;  %v3858_v54 = vpack.c.bf16 %v3856_v40, %v3856_v40 }
0x1543   :  { %v3857_v36 = vadd.f32 %v4324_v34, %v3849_v37  ;;  %v3885_v42 = vunpack.c.l.b16 %v3858_v54 }
0x1545   :  { %v3859_v48 = vpack.c.bf16 %v3857_v36, %v3857_v36 }
0x1547   :  { %v3886_v28 = vunpack.c.l.b16 %v3859_v48 }
0x1549   :  { %v3887_v43 = vrot.slane %v3886_v28, 7 }
0x154b   :  { %v3889_v31 = vsel %vm3888_vm6, %v3887_v43, %v3885_v42 }
0x154c   :  { %v3890_v44 = vpack.c.b16 %v3889_v31, %v3889_v31 }
0x154e   :  { %4794 = vmatmul.mubr.bf16.vlgmr.msra.gmra.mxu1 %v3890_v44 }
0x160e   :  { %v3974_v53 = vpop.f32.mrf.mxu1 }
0x160f   :  { %v3975_v60 = vadd.f32 %v4325_v56, %v3974_v53 }
0x1610   :  { %v4795_v41 = vpop.f32.mrf.mxu1 }
0x1611   :  { %5152 = vtanh.f32 %v3975_v60 }
0x1612   :  { %v3977_v50 = vpop.f32.mrf.mxu1 }
0x1614   :  { %v4796_v25 = vpop.f32.mrf.mxu1 }
0x161e   :  { %v5153_v26 = vpop.eup %5152 }
0x161f   :  { %v3981_v61 = vpack.c.bf16 %v5153_v26, %v5153_v26 }
0x1621   :  { %4814 = vmatmul.mubr.bf16.vlgmr.msra.gmra.mxu0 %v3981_v61 }
0x16e1   :  { %v4087_v62 = vpop.f32.mrf.mxu0 }
0x16e2   :  { %v4088_v51 = vadd.f32 %v4334_v59, %v4087_v62 }
0x16e3   :  { %v4815_v0 = vpop.f32.mrf.mxu0 }
0x16e4   :  { %4093 = vst [vmem:[#allocation26] sm:$0x3] %v4088_v51 }
0x16e5   :  { %v4090_v4 = vpop.f32.mrf.mxu0 }
0x16e6   :  { %5465 = shalt.err (!%p5462_p9)
}
0x16e7   :  { %4103 = dma.vmem_to_hbm [thread:$0]  %s4101_s0, 32, %s6403_s20, [#allocation4]   ;;  %v4816_v2 = vpop.f32.mrf.mxu0 }
0x16e8   :  { %5490 = dma.done.wait [#allocation4], 32  }
0x16e9   :  { %5491 = vsyncadd [#allocation4], 4294967264 }
0x16ea   :  { %4107 = vsyncpa [#allocation3], 1 }
0x16eb   :  { %4108 = vsyncpa [#allocation6], 1 }
0x16ec   :  { %4109 = vsyncpa [#allocation9], 1 }
0x16ed   :  { %4110 = vsyncpa [#allocation12], 1 }
0x16ee   :  { %4111 = vsyncpa [#allocation15], 1 }
0x16ef   :  { %4112 = vsyncpa [#allocation18], 1 }
0x16f0   :  { %4113 = vsyncpa [#allocation21], 1 }
0x16f1   :  { %4114 = vsyncpa [#allocation24], 1 }
0x16f2   :  { %4115 = vsyncpa [#allocation4], 1 }

</bundles_post_ra>
